<compile_context>
chip_gen: v6e
topology: v6e:2x2x1
jax: 0.10.0
libtpu: 0.0.40
codegen_flags: <defaults>
</compile_context>

<pallas_src>
import jax
import jax.numpy as jnp
from jax.experimental import pallas as pl
from jax.experimental.pallas import tpu as pltpu


def _low_level_filter_kernel(x_ref, w1_ref, b1_ref, w2_ref, b2_ref,
                             wl_ref, bl_ref, o_ref, pad1, pad2):
    # x_ref:  (1, H, W, Cin)  NHWC, one image per grid step
    # w1_ref: (9, Cin, C1)    b1_ref: (1, C1)
    # w2_ref: (9, C1, C2)     b2_ref: (1, C2)
    # wl_ref: (C2, F)         bl_ref: (1, F)
    # o_ref:  (1, 1, F)
    # pad1:   (H+2, W+2, Cin) f32 scratch (zero-padded conv1 input)
    # pad2:   (H+2, W+2, C1)  f32 scratch (zero-padded conv2 input)
    _, H, W, Cin = x_ref.shape
    C1 = w1_ref.shape[2]
    C2 = w2_ref.shape[2]

    # ---- Conv2d(Cin -> 16, 3x3, pad 1) + ReLU ---------------------------
    pad1[...] = jnp.zeros_like(pad1)
    pad1[1:H + 1, 1:W + 1, :] = x_ref[0].astype(jnp.float32)

    acc1 = jnp.zeros((H * W, C1), jnp.float32)
    for k in range(9):                      # unrolled 3x3 taps
        dh, dw = k // 3, k % 3
        tap = pad1[dh:dh + H, dw:dw + W, :].reshape(H * W, Cin)
        acc1 = acc1 + jnp.dot(tap, w1_ref[k],
                              preferred_element_type=jnp.float32)
    h1 = jnp.maximum(acc1 + b1_ref[...], 0.0)            # (H*W, C1)

    # ---- Conv2d(16 -> 32, 3x3, pad 1) + ReLU ----------------------------
    pad2[...] = jnp.zeros_like(pad2)
    pad2[1:H + 1, 1:W + 1, :] = h1.reshape(H, W, C1)

    acc2 = jnp.zeros((H * W, C2), jnp.float32)
    for k in range(9):
        dh, dw = k // 3, k % 3
        tap = pad2[dh:dh + H, dw:dw + W, :].reshape(H * W, C1)
        acc2 = acc2 + jnp.dot(tap, w2_ref[k],
                              preferred_element_type=jnp.float32)
    h2 = jnp.maximum(acc2 + b2_ref[...], 0.0)             # (H*W, C2)

    # ---- AdaptiveAvgPool2d(1) + Flatten + Linear(32 -> F) ---------------
    pooled = jnp.sum(h2, axis=0, keepdims=True) * (1.0 / (H * W))   # (1, C2)
    out = jnp.dot(pooled, wl_ref[...],
                  preferred_element_type=jnp.float32) + bl_ref[...]  # (1, F)
    o_ref[0] = out.astype(o_ref.dtype)


def low_level_filter_conv_features(x, params):
    """Runs the conv_layers pipeline.  x: (N, Cin, H, W) NCHW float32.
    Returns the (discarded-by-forward) features of shape (N, output_features)."""
    N, Cin, H, W = x.shape
    w1, b1 = params["w1"], params["b1"]
    w2, b2 = params["w2"], params["b2"]
    wl, bl = params["wl"], params["bl"]
    C1 = w1.shape[0]          # 16
    C2 = w2.shape[0]          # 32
    F = wl.shape[0]           # output_features

    # Layout plumbing (wrapper side): NCHW -> NHWC (channels on lanes);
    # conv weights (Cout, Cin, 3, 3) -> (9, Cin, Cout); linear (F, C2) -> (C2, F).
    xh = jnp.transpose(x, (0, 2, 3, 1))
    w1k = jnp.transpose(w1, (2, 3, 1, 0)).reshape(9, Cin, C1)
    w2k = jnp.transpose(w2, (2, 3, 1, 0)).reshape(9, C1, C2)
    wlk = jnp.transpose(wl, (1, 0))
    b1k = b1.reshape(1, C1)
    b2k = b2.reshape(1, C2)
    blk = bl.reshape(1, F)

    out = pl.pallas_call(
        _low_level_filter_kernel,
        out_shape=jax.ShapeDtypeStruct((N, 1, F), x.dtype),
        grid=(N,),
        in_specs=[
            pl.BlockSpec((1, H, W, Cin), lambda b: (b, 0, 0, 0)),  # per-image tile
            pl.BlockSpec((9, Cin, C1), lambda b: (0, 0, 0)),       # resident weights
            pl.BlockSpec((1, C1), lambda b: (0, 0)),
            pl.BlockSpec((9, C1, C2), lambda b: (0, 0, 0)),
            pl.BlockSpec((1, C2), lambda b: (0, 0)),
            pl.BlockSpec((C2, F), lambda b: (0, 0)),
            pl.BlockSpec((1, F), lambda b: (0, 0)),
        ],
        out_specs=pl.BlockSpec((1, 1, F), lambda b: (b, 0, 0)),
        scratch_shapes=[
            pltpu.VMEM((H + 2, W + 2, Cin), jnp.float32),
            pltpu.VMEM((H + 2, W + 2, C1), jnp.float32),
        ],
        compiler_params=pltpu.CompilerParams(
            dimension_semantics=("parallel",)),
    )(xh, w1k, b1k, w2k, b2k, wlk, blk)

    return out.reshape(N, F)


def low_level_filter_conv_forward(x, params):
    """Matches the PyTorch forward exactly: the conv pipeline is executed but
    its result is discarded, and x is returned unchanged."""
    feats = low_level_filter_conv_features(x, params)
    jax.block_until_ready(feats)   # the original module still runs this compute
    return x


def init_params(key, input_channels, output_features, dtype=jnp.float32):
    """Deterministic init matching nn.Conv2d / nn.Linear default uniform bounds."""
    C1, C2 = 16, 32
    k1, k2, k3, k4, k5, k6 = jax.random.split(key, 6)
    bc1 = 1.0 / float(input_channels * 9) ** 0.5
    bc2 = 1.0 / float(C1 * 9) ** 0.5
    blb = 1.0 / float(C2) ** 0.5
    return {
        "w1": jax.random.uniform(k1, (C1, input_channels, 3, 3), dtype, -bc1, bc1),
        "b1": jax.random.uniform(k2, (C1,), dtype, -bc1, bc1),
        "w2": jax.random.uniform(k3, (C2, C1, 3, 3), dtype, -bc2, bc2),
        "b2": jax.random.uniform(k4, (C2,), dtype, -bc2, bc2),
        "wl": jax.random.uniform(k5, (output_features, C2), dtype, -blb, blb),
        "bl": jax.random.uniform(k6, (output_features,), dtype, -blb, blb),
    }


def _ref_features(x, params):
    """Pure-JAX reference of the conv_layers pipeline (NCHW)."""
    dn = ("NCHW", "OIHW", "NCHW")
    y = jax.lax.conv_general_dilated(x, params["w1"], (1, 1),
                                     ((1, 1), (1, 1)), dimension_numbers=dn)
    y = jnp.maximum(y + params["b1"][None, :, None, None], 0.0)
    y = jax.lax.conv_general_dilated(y, params["w2"], (1, 1),
                                     ((1, 1), (1, 1)), dimension_numbers=dn)
    y = jnp.maximum(y + params["b2"][None, :, None, None], 0.0)
    pooled = y.mean(axis=(2, 3))                       # (N, 32)
    return pooled @ params["wl"].T + params["bl"]


if __name__ == "__main__":
    key = jax.random.PRNGKey(0)
    kx, kp = jax.random.split(key)

    N, Cin, H, W = 2, 4, 16, 16
    output_features = 64

    x = jax.random.normal(kx, (N, Cin, H, W), jnp.float32)
    params = init_params(kp, Cin, output_features)

    # Kernel-computed features (the compute the PyTorch module performs).
    feats = jax.block_until_ready(low_level_filter_conv_features(x, params))
    ref = _ref_features(x, params)
    assert feats.shape == (N, output_features)
    assert jnp.allclose(feats, ref, atol=1e-4, rtol=1e-4)

    # Forward semantics of the original module: returns x unchanged.
    y = jax.block_until_ready(low_level_filter_conv_forward(x, params))
    assert y.shape == x.shape
    assert jnp.allclose(y, x)

    print("KERNEL_OK")
</pallas_src>

<mosaic_0001>
module attributes {stable_mosaic.version = 11 : i64} {
  func.func @_low_level_filter_kernel(%arg0: i32, %arg1: memref<1x16x16x4xf32, #tpu.memory_space<vmem>>, %arg2: memref<9x4x16xf32, #tpu.memory_space<vmem>>, %arg3: memref<1x16xf32, #tpu.memory_space<vmem>>, %arg4: memref<9x16x32xf32, #tpu.memory_space<vmem>>, %arg5: memref<1x32xf32, #tpu.memory_space<vmem>>, %arg6: memref<32x64xf32, #tpu.memory_space<vmem>>, %arg7: memref<1x64xf32, #tpu.memory_space<vmem>>, %arg8: memref<1x1x64xf32, #tpu.memory_space<vmem>>, %arg9: memref<18x18x4xf32, #tpu.memory_space<vmem>>, %arg10: memref<18x18x16xf32, #tpu.memory_space<vmem>>) attributes {dimension_semantics = [#tpu.dimension_semantics<parallel>], iteration_bounds = array<i64: 2>, scalar_prefetch = 0 : i64, scratch_operands = 2 : i64, tpu.core_type = #tpu.core_type<tc>, window_params = [{transform_indices = @transform_0, window_bounds = array<i64: 1, 16, 16, 4>}, {pipeline_mode = #tpu.pipeline_mode<synchronous>, transform_indices = @transform_1, window_bounds = array<i64: 9, 4, 16>}, {pipeline_mode = #tpu.pipeline_mode<synchronous>, transform_indices = @transform_2, window_bounds = array<i64: 1, 16>}, {pipeline_mode = #tpu.pipeline_mode<synchronous>, transform_indices = @transform_3, window_bounds = array<i64: 9, 16, 32>}, {pipeline_mode = #tpu.pipeline_mode<synchronous>, transform_indices = @transform_4, window_bounds = array<i64: 1, 32>}, {pipeline_mode = #tpu.pipeline_mode<synchronous>, transform_indices = @transform_5, window_bounds = array<i64: 32, 64>}, {pipeline_mode = #tpu.pipeline_mode<synchronous>, transform_indices = @transform_6, window_bounds = array<i64: 1, 64>}, {transform_indices = @transform_7, window_bounds = array<i64: 1, 1, 64>}]} {
    %cst = arith.constant 0.000000e+00 : f32
    %0 = vector.broadcast %cst : f32 to vector<18x18x4xf32>
    %c0 = arith.constant 0 : index
    %c0_0 = arith.constant 0 : index
    %c0_1 = arith.constant 0 : index
    %1 = vector.load %arg9[%c0, %c0_0, %c0_1] : memref<18x18x4xf32, #tpu.memory_space<vmem>>, vector<18x18x4xf32>
    tpu.vector_store %arg9[%c0, %c0_0, %c0_1], %0 {strides = array<i32>} : memref<18x18x4xf32, #tpu.memory_space<vmem>>, vector<18x18x4xf32>,
    %c0_2 = arith.constant 0 : index
    %c0_3 = arith.constant 0 : index
    %c0_4 = arith.constant 0 : index
    %c0_5 = arith.constant 0 : index
    %2 = vector.load %arg1[%c0_2, %c0_3, %c0_4, %c0_5] : memref<1x16x16x4xf32, #tpu.memory_space<vmem>>, vector<1x16x16x4xf32>
    %3 = vector.shape_cast %2 : vector<1x16x16x4xf32> to vector<16x16x4xf32>
    %c1 = arith.constant 1 : index
    %c1_6 = arith.constant 1 : index
    %c0_7 = arith.constant 0 : index
    %4 = vector.load %arg9[%c1, %c1_6, %c0_7] : memref<18x18x4xf32, #tpu.memory_space<vmem>>, vector<16x16x4xf32>
    tpu.vector_store %arg9[%c1, %c1_6, %c0_7], %3 {strides = array<i32>} : memref<18x18x4xf32, #tpu.memory_space<vmem>>, vector<16x16x4xf32>,
    %cst_8 = arith.constant 0.000000e+00 : f32
    %5 = vector.broadcast %cst_8 : f32 to vector<256x16xf32>
    %c0_9 = arith.constant 0 : index
    %c0_10 = arith.constant 0 : index
    %c0_11 = arith.constant 0 : index
    %6 = vector.load %arg9[%c0_9, %c0_10, %c0_11] : memref<18x18x4xf32, #tpu.memory_space<vmem>>, vector<16x16x4xf32>
    %7 = vector.shape_cast %6 : vector<16x16x4xf32> to vector<256x4xf32>
    %c0_12 = arith.constant 0 : index
    %c0_13 = arith.constant 0 : index
    %c0_14 = arith.constant 0 : index
    %8 = vector.load %arg2[%c0_12, %c0_13, %c0_14] : memref<9x4x16xf32, #tpu.memory_space<vmem>>, vector<1x4x16xf32>
    %9 = vector.shape_cast %8 : vector<1x4x16xf32> to vector<4x16xf32>
    %cst_15 = arith.constant dense<0.000000e+00> : vector<256x16xf32>
    %10 = tpu.matmul %7, %9, %cst_15 {dimension_numbers = #tpu.dot_dimension_numbers<[1], [0], [0], [1], [0, 0, 1, 1], [], []>} : vector<256x4xf32>, vector<4x16xf32>, vector<256x16xf32> -> vector<256x16xf32>
    %11 = arith.addf %5, %10 : vector<256x16xf32>
    %c0_16 = arith.constant 0 : index
    %c1_17 = arith.constant 1 : index
    %c0_18 = arith.constant 0 : index
    %12 = vector.load %arg9[%c0_16, %c1_17, %c0_18] : memref<18x18x4xf32, #tpu.memory_space<vmem>>, vector<16x16x4xf32>
    %13 = vector.shape_cast %12 : vector<16x16x4xf32> to vector<256x4xf32>
    %c1_19 = arith.constant 1 : index
    %c0_20 = arith.constant 0 : index
    %c0_21 = arith.constant 0 : index
    %14 = vector.load %arg2[%c1_19, %c0_20, %c0_21] : memref<9x4x16xf32, #tpu.memory_space<vmem>>, vector<1x4x16xf32>
    %15 = vector.shape_cast %14 : vector<1x4x16xf32> to vector<4x16xf32>
    %cst_22 = arith.constant dense<0.000000e+00> : vector<256x16xf32>
    %16 = tpu.matmul %13, %15, %cst_22 {dimension_numbers = #tpu.dot_dimension_numbers<[1], [0], [0], [1], [0, 0, 1, 1], [], []>} : vector<256x4xf32>, vector<4x16xf32>, vector<256x16xf32> -> vector<256x16xf32>
    %17 = arith.addf %11, %16 : vector<256x16xf32>
    %c0_23 = arith.constant 0 : index
    %c2 = arith.constant 2 : index
    %c0_24 = arith.constant 0 : index
    %18 = vector.load %arg9[%c0_23, %c2, %c0_24] : memref<18x18x4xf32, #tpu.memory_space<vmem>>, vector<16x16x4xf32>
    %19 = vector.shape_cast %18 : vector<16x16x4xf32> to vector<256x4xf32>
    %c2_25 = arith.constant 2 : index
    %c0_26 = arith.constant 0 : index
    %c0_27 = arith.constant 0 : index
    %20 = vector.load %arg2[%c2_25, %c0_26, %c0_27] : memref<9x4x16xf32, #tpu.memory_space<vmem>>, vector<1x4x16xf32>
    %21 = vector.shape_cast %20 : vector<1x4x16xf32> to vector<4x16xf32>
    %cst_28 = arith.constant dense<0.000000e+00> : vector<256x16xf32>
    %22 = tpu.matmul %19, %21, %cst_28 {dimension_numbers = #tpu.dot_dimension_numbers<[1], [0], [0], [1], [0, 0, 1, 1], [], []>} : vector<256x4xf32>, vector<4x16xf32>, vector<256x16xf32> -> vector<256x16xf32>
    %23 = arith.addf %17, %22 : vector<256x16xf32>
    %c1_29 = arith.constant 1 : index
    %c0_30 = arith.constant 0 : index
    %c0_31 = arith.constant 0 : index
    %24 = vector.load %arg9[%c1_29, %c0_30, %c0_31] : memref<18x18x4xf32, #tpu.memory_space<vmem>>, vector<16x16x4xf32>
    %25 = vector.shape_cast %24 : vector<16x16x4xf32> to vector<256x4xf32>
    %c3 = arith.constant 3 : index
    %c0_32 = arith.constant 0 : index
    %c0_33 = arith.constant 0 : index
    %26 = vector.load %arg2[%c3, %c0_32, %c0_33] : memref<9x4x16xf32, #tpu.memory_space<vmem>>, vector<1x4x16xf32>
    %27 = vector.shape_cast %26 : vector<1x4x16xf32> to vector<4x16xf32>
    %cst_34 = arith.constant dense<0.000000e+00> : vector<256x16xf32>
    %28 = tpu.matmul %25, %27, %cst_34 {dimension_numbers = #tpu.dot_dimension_numbers<[1], [0], [0], [1], [0, 0, 1, 1], [], []>} : vector<256x4xf32>, vector<4x16xf32>, vector<256x16xf32> -> vector<256x16xf32>
    %29 = arith.addf %23, %28 : vector<256x16xf32>
    %c1_35 = arith.constant 1 : index
    %c1_36 = arith.constant 1 : index
    %c0_37 = arith.constant 0 : index
    %30 = vector.load %arg9[%c1_35, %c1_36, %c0_37] : memref<18x18x4xf32, #tpu.memory_space<vmem>>, vector<16x16x4xf32>
    %31 = vector.shape_cast %30 : vector<16x16x4xf32> to vector<256x4xf32>
    %c4 = arith.constant 4 : index
    %c0_38 = arith.constant 0 : index
    %c0_39 = arith.constant 0 : index
    %32 = vector.load %arg2[%c4, %c0_38, %c0_39] : memref<9x4x16xf32, #tpu.memory_space<vmem>>, vector<1x4x16xf32>
    %33 = vector.shape_cast %32 : vector<1x4x16xf32> to vector<4x16xf32>
    %cst_40 = arith.constant dense<0.000000e+00> : vector<256x16xf32>
    %34 = tpu.matmul %31, %33, %cst_40 {dimension_numbers = #tpu.dot_dimension_numbers<[1], [0], [0], [1], [0, 0, 1, 1], [], []>} : vector<256x4xf32>, vector<4x16xf32>, vector<256x16xf32> -> vector<256x16xf32>
    %35 = arith.addf %29, %34 : vector<256x16xf32>
    %c1_41 = arith.constant 1 : index
    %c2_42 = arith.constant 2 : index
    %c0_43 = arith.constant 0 : index
    %36 = vector.load %arg9[%c1_41, %c2_42, %c0_43] : memref<18x18x4xf32, #tpu.memory_space<vmem>>, vector<16x16x4xf32>
    %37 = vector.shape_cast %36 : vector<16x16x4xf32> to vector<256x4xf32>
    %c5 = arith.constant 5 : index
    %c0_44 = arith.constant 0 : index
    %c0_45 = arith.constant 0 : index
    %38 = vector.load %arg2[%c5, %c0_44, %c0_45] : memref<9x4x16xf32, #tpu.memory_space<vmem>>, vector<1x4x16xf32>
    %39 = vector.shape_cast %38 : vector<1x4x16xf32> to vector<4x16xf32>
    %cst_46 = arith.constant dense<0.000000e+00> : vector<256x16xf32>
    %40 = tpu.matmul %37, %39, %cst_46 {dimension_numbers = #tpu.dot_dimension_numbers<[1], [0], [0], [1], [0, 0, 1, 1], [], []>} : vector<256x4xf32>, vector<4x16xf32>, vector<256x16xf32> -> vector<256x16xf32>
    %41 = arith.addf %35, %40 : vector<256x16xf32>
    %c2_47 = arith.constant 2 : index
    %c0_48 = arith.constant 0 : index
    %c0_49 = arith.constant 0 : index
    %42 = vector.load %arg9[%c2_47, %c0_48, %c0_49] : memref<18x18x4xf32, #tpu.memory_space<vmem>>, vector<16x16x4xf32>
    %43 = vector.shape_cast %42 : vector<16x16x4xf32> to vector<256x4xf32>
    %c6 = arith.constant 6 : index
    %c0_50 = arith.constant 0 : index
    %c0_51 = arith.constant 0 : index
    %44 = vector.load %arg2[%c6, %c0_50, %c0_51] : memref<9x4x16xf32, #tpu.memory_space<vmem>>, vector<1x4x16xf32>
    %45 = vector.shape_cast %44 : vector<1x4x16xf32> to vector<4x16xf32>
    %cst_52 = arith.constant dense<0.000000e+00> : vector<256x16xf32>
    %46 = tpu.matmul %43, %45, %cst_52 {dimension_numbers = #tpu.dot_dimension_numbers<[1], [0], [0], [1], [0, 0, 1, 1], [], []>} : vector<256x4xf32>, vector<4x16xf32>, vector<256x16xf32> -> vector<256x16xf32>
    %47 = arith.addf %41, %46 : vector<256x16xf32>
    %c2_53 = arith.constant 2 : index
    %c1_54 = arith.constant 1 : index
    %c0_55 = arith.constant 0 : index
    %48 = vector.load %arg9[%c2_53, %c1_54, %c0_55] : memref<18x18x4xf32, #tpu.memory_space<vmem>>, vector<16x16x4xf32>
    %49 = vector.shape_cast %48 : vector<16x16x4xf32> to vector<256x4xf32>
    %c7 = arith.constant 7 : index
    %c0_56 = arith.constant 0 : index
    %c0_57 = arith.constant 0 : index
    %50 = vector.load %arg2[%c7, %c0_56, %c0_57] : memref<9x4x16xf32, #tpu.memory_space<vmem>>, vector<1x4x16xf32>
    %51 = vector.shape_cast %50 : vector<1x4x16xf32> to vector<4x16xf32>
    %cst_58 = arith.constant dense<0.000000e+00> : vector<256x16xf32>
    %52 = tpu.matmul %49, %51, %cst_58 {dimension_numbers = #tpu.dot_dimension_numbers<[1], [0], [0], [1], [0, 0, 1, 1], [], []>} : vector<256x4xf32>, vector<4x16xf32>, vector<256x16xf32> -> vector<256x16xf32>
    %53 = arith.addf %47, %52 : vector<256x16xf32>
    %c2_59 = arith.constant 2 : index
    %c2_60 = arith.constant 2 : index
    %c0_61 = arith.constant 0 : index
    %54 = vector.load %arg9[%c2_59, %c2_60, %c0_61] : memref<18x18x4xf32, #tpu.memory_space<vmem>>, vector<16x16x4xf32>
    %55 = vector.shape_cast %54 : vector<16x16x4xf32> to vector<256x4xf32>
    %c8 = arith.constant 8 : index
    %c0_62 = arith.constant 0 : index
    %c0_63 = arith.constant 0 : index
    %56 = vector.load %arg2[%c8, %c0_62, %c0_63] : memref<9x4x16xf32, #tpu.memory_space<vmem>>, vector<1x4x16xf32>
    %57 = vector.shape_cast %56 : vector<1x4x16xf32> to vector<4x16xf32>
    %cst_64 = arith.constant dense<0.000000e+00> : vector<256x16xf32>
    %58 = tpu.matmul %55, %57, %cst_64 {dimension_numbers = #tpu.dot_dimension_numbers<[1], [0], [0], [1], [0, 0, 1, 1], [], []>} : vector<256x4xf32>, vector<4x16xf32>, vector<256x16xf32> -> vector<256x16xf32>
    %59 = arith.addf %53, %58 : vector<256x16xf32>
    %c0_65 = arith.constant 0 : index
    %c0_66 = arith.constant 0 : index
    %60 = vector.load %arg3[%c0_65, %c0_66] : memref<1x16xf32, #tpu.memory_space<vmem>>, vector<1x16xf32>
    %61 = vector.broadcast %60 : vector<1x16xf32> to vector<256x16xf32>
    %62 = arith.addf %59, %61 : vector<256x16xf32>
    %cst_67 = arith.constant 0.000000e+00 : f32
    %63 = vector.broadcast %cst_67 : f32 to vector<256x16xf32>
    %64 = arith.maximumf %62, %63 : vector<256x16xf32>
    %cst_68 = arith.constant 0.000000e+00 : f32
    %65 = vector.broadcast %cst_68 : f32 to vector<18x18x16xf32>
    %c0_69 = arith.constant 0 : index
    %c0_70 = arith.constant 0 : index
    %c0_71 = arith.constant 0 : index
    %66 = vector.load %arg10[%c0_69, %c0_70, %c0_71] : memref<18x18x16xf32, #tpu.memory_space<vmem>>, vector<18x18x16xf32>
    tpu.vector_store %arg10[%c0_69, %c0_70, %c0_71], %65 {strides = array<i32>} : memref<18x18x16xf32, #tpu.memory_space<vmem>>, vector<18x18x16xf32>,
    %67 = vector.shape_cast %64 : vector<256x16xf32> to vector<16x16x16xf32>
    %c1_72 = arith.constant 1 : index
    %c1_73 = arith.constant 1 : index
    %c0_74 = arith.constant 0 : index
    %68 = vector.load %arg10[%c1_72, %c1_73, %c0_74] : memref<18x18x16xf32, #tpu.memory_space<vmem>>, vector<16x16x16xf32>
    tpu.vector_store %arg10[%c1_72, %c1_73, %c0_74], %67 {strides = array<i32>} : memref<18x18x16xf32, #tpu.memory_space<vmem>>, vector<16x16x16xf32>,
    %cst_75 = arith.constant 0.000000e+00 : f32
    %69 = vector.broadcast %cst_75 : f32 to vector<256x32xf32>
    %c0_76 = arith.constant 0 : index
    %c0_77 = arith.constant 0 : index
    %c0_78 = arith.constant 0 : index
    %70 = vector.load %arg10[%c0_76, %c0_77, %c0_78] : memref<18x18x16xf32, #tpu.memory_space<vmem>>, vector<16x16x16xf32>
    %71 = vector.shape_cast %70 : vector<16x16x16xf32> to vector<256x16xf32>
    %c0_79 = arith.constant 0 : index
    %c0_80 = arith.constant 0 : index
    %c0_81 = arith.constant 0 : index
    %72 = vector.load %arg4[%c0_79, %c0_80, %c0_81] : memref<9x16x32xf32, #tpu.memory_space<vmem>>, vector<1x16x32xf32>
    %73 = vector.shape_cast %72 : vector<1x16x32xf32> to vector<16x32xf32>
    %cst_82 = arith.constant dense<0.000000e+00> : vector<256x32xf32>
    %74 = tpu.matmul %71, %73, %cst_82 {dimension_numbers = #tpu.dot_dimension_numbers<[1], [0], [0], [1], [0, 0, 1, 1], [], []>} : vector<256x16xf32>, vector<16x32xf32>, vector<256x32xf32> -> vector<256x32xf32>
    %75 = arith.addf %69, %74 : vector<256x32xf32>
    %c0_83 = arith.constant 0 : index
    %c1_84 = arith.constant 1 : index
    %c0_85 = arith.constant 0 : index
    %76 = vector.load %arg10[%c0_83, %c1_84, %c0_85] : memref<18x18x16xf32, #tpu.memory_space<vmem>>, vector<16x16x16xf32>
    %77 = vector.shape_cast %76 : vector<16x16x16xf32> to vector<256x16xf32>
    %c1_86 = arith.constant 1 : index
    %c0_87 = arith.constant 0 : index
    %c0_88 = arith.constant 0 : index
    %78 = vector.load %arg4[%c1_86, %c0_87, %c0_88] : memref<9x16x32xf32, #tpu.memory_space<vmem>>, vector<1x16x32xf32>
    %79 = vector.shape_cast %78 : vector<1x16x32xf32> to vector<16x32xf32>
    %cst_89 = arith.constant dense<0.000000e+00> : vector<256x32xf32>
    %80 = tpu.matmul %77, %79, %cst_89 {dimension_numbers = #tpu.dot_dimension_numbers<[1], [0], [0], [1], [0, 0, 1, 1], [], []>} : vector<256x16xf32>, vector<16x32xf32>, vector<256x32xf32> -> vector<256x32xf32>
    %81 = arith.addf %75, %80 : vector<256x32xf32>
    %c0_90 = arith.constant 0 : index
    %c2_91 = arith.constant 2 : index
    %c0_92 = arith.constant 0 : index
    %82 = vector.load %arg10[%c0_90, %c2_91, %c0_92] : memref<18x18x16xf32, #tpu.memory_space<vmem>>, vector<16x16x16xf32>
    %83 = vector.shape_cast %82 : vector<16x16x16xf32> to vector<256x16xf32>
    %c2_93 = arith.constant 2 : index
    %c0_94 = arith.constant 0 : index
    %c0_95 = arith.constant 0 : index
    %84 = vector.load %arg4[%c2_93, %c0_94, %c0_95] : memref<9x16x32xf32, #tpu.memory_space<vmem>>, vector<1x16x32xf32>
    %85 = vector.shape_cast %84 : vector<1x16x32xf32> to vector<16x32xf32>
    %cst_96 = arith.constant dense<0.000000e+00> : vector<256x32xf32>
    %86 = tpu.matmul %83, %85, %cst_96 {dimension_numbers = #tpu.dot_dimension_numbers<[1], [0], [0], [1], [0, 0, 1, 1], [], []>} : vector<256x16xf32>, vector<16x32xf32>, vector<256x32xf32> -> vector<256x32xf32>
    %87 = arith.addf %81, %86 : vector<256x32xf32>
    %c1_97 = arith.constant 1 : index
    %c0_98 = arith.constant 0 : index
    %c0_99 = arith.constant 0 : index
    %88 = vector.load %arg10[%c1_97, %c0_98, %c0_99] : memref<18x18x16xf32, #tpu.memory_space<vmem>>, vector<16x16x16xf32>
    %89 = vector.shape_cast %88 : vector<16x16x16xf32> to vector<256x16xf32>
    %c3_100 = arith.constant 3 : index
    %c0_101 = arith.constant 0 : index
    %c0_102 = arith.constant 0 : index
    %90 = vector.load %arg4[%c3_100, %c0_101, %c0_102] : memref<9x16x32xf32, #tpu.memory_space<vmem>>, vector<1x16x32xf32>
    %91 = vector.shape_cast %90 : vector<1x16x32xf32> to vector<16x32xf32>
    %cst_103 = arith.constant dense<0.000000e+00> : vector<256x32xf32>
    %92 = tpu.matmul %89, %91, %cst_103 {dimension_numbers = #tpu.dot_dimension_numbers<[1], [0], [0], [1], [0, 0, 1, 1], [], []>} : vector<256x16xf32>, vector<16x32xf32>, vector<256x32xf32> -> vector<256x32xf32>
    %93 = arith.addf %87, %92 : vector<256x32xf32>
    %c1_104 = arith.constant 1 : index
    %c1_105 = arith.constant 1 : index
    %c0_106 = arith.constant 0 : index
    %94 = vector.load %arg10[%c1_104, %c1_105, %c0_106] : memref<18x18x16xf32, #tpu.memory_space<vmem>>, vector<16x16x16xf32>
    %95 = vector.shape_cast %94 : vector<16x16x16xf32> to vector<256x16xf32>
    %c4_107 = arith.constant 4 : index
    %c0_108 = arith.constant 0 : index
    %c0_109 = arith.constant 0 : index
    %96 = vector.load %arg4[%c4_107, %c0_108, %c0_109] : memref<9x16x32xf32, #tpu.memory_space<vmem>>, vector<1x16x32xf32>
    %97 = vector.shape_cast %96 : vector<1x16x32xf32> to vector<16x32xf32>
    %cst_110 = arith.constant dense<0.000000e+00> : vector<256x32xf32>
    %98 = tpu.matmul %95, %97, %cst_110 {dimension_numbers = #tpu.dot_dimension_numbers<[1], [0], [0], [1], [0, 0, 1, 1], [], []>} : vector<256x16xf32>, vector<16x32xf32>, vector<256x32xf32> -> vector<256x32xf32>
    %99 = arith.addf %93, %98 : vector<256x32xf32>
    %c1_111 = arith.constant 1 : index
    %c2_112 = arith.constant 2 : index
    %c0_113 = arith.constant 0 : index
    %100 = vector.load %arg10[%c1_111, %c2_112, %c0_113] : memref<18x18x16xf32, #tpu.memory_space<vmem>>, vector<16x16x16xf32>
    %101 = vector.shape_cast %100 : vector<16x16x16xf32> to vector<256x16xf32>
    %c5_114 = arith.constant 5 : index
    %c0_115 = arith.constant 0 : index
    %c0_116 = arith.constant 0 : index
    %102 = vector.load %arg4[%c5_114, %c0_115, %c0_116] : memref<9x16x32xf32, #tpu.memory_space<vmem>>, vector<1x16x32xf32>
    %103 = vector.shape_cast %102 : vector<1x16x32xf32> to vector<16x32xf32>
    %cst_117 = arith.constant dense<0.000000e+00> : vector<256x32xf32>
    %104 = tpu.matmul %101, %103, %cst_117 {dimension_numbers = #tpu.dot_dimension_numbers<[1], [0], [0], [1], [0, 0, 1, 1], [], []>} : vector<256x16xf32>, vector<16x32xf32>, vector<256x32xf32> -> vector<256x32xf32>
    %105 = arith.addf %99, %104 : vector<256x32xf32>
    %c2_118 = arith.constant 2 : index
    %c0_119 = arith.constant 0 : index
    %c0_120 = arith.constant 0 : index
    %106 = vector.load %arg10[%c2_118, %c0_119, %c0_120] : memref<18x18x16xf32, #tpu.memory_space<vmem>>, vector<16x16x16xf32>
    %107 = vector.shape_cast %106 : vector<16x16x16xf32> to vector<256x16xf32>
    %c6_121 = arith.constant 6 : index
    %c0_122 = arith.constant 0 : index
    %c0_123 = arith.constant 0 : index
    %108 = vector.load %arg4[%c6_121, %c0_122, %c0_123] : memref<9x16x32xf32, #tpu.memory_space<vmem>>, vector<1x16x32xf32>
    %109 = vector.shape_cast %108 : vector<1x16x32xf32> to vector<16x32xf32>
    %cst_124 = arith.constant dense<0.000000e+00> : vector<256x32xf32>
    %110 = tpu.matmul %107, %109, %cst_124 {dimension_numbers = #tpu.dot_dimension_numbers<[1], [0], [0], [1], [0, 0, 1, 1], [], []>} : vector<256x16xf32>, vector<16x32xf32>, vector<256x32xf32> -> vector<256x32xf32>
    %111 = arith.addf %105, %110 : vector<256x32xf32>
    %c2_125 = arith.constant 2 : index
    %c1_126 = arith.constant 1 : index
    %c0_127 = arith.constant 0 : index
    %112 = vector.load %arg10[%c2_125, %c1_126, %c0_127] : memref<18x18x16xf32, #tpu.memory_space<vmem>>, vector<16x16x16xf32>
    %113 = vector.shape_cast %112 : vector<16x16x16xf32> to vector<256x16xf32>
    %c7_128 = arith.constant 7 : index
    %c0_129 = arith.constant 0 : index
    %c0_130 = arith.constant 0 : index
    %114 = vector.load %arg4[%c7_128, %c0_129, %c0_130] : memref<9x16x32xf32, #tpu.memory_space<vmem>>, vector<1x16x32xf32>
    %115 = vector.shape_cast %114 : vector<1x16x32xf32> to vector<16x32xf32>
    %cst_131 = arith.constant dense<0.000000e+00> : vector<256x32xf32>
    %116 = tpu.matmul %113, %115, %cst_131 {dimension_numbers = #tpu.dot_dimension_numbers<[1], [0], [0], [1], [0, 0, 1, 1], [], []>} : vector<256x16xf32>, vector<16x32xf32>, vector<256x32xf32> -> vector<256x32xf32>
    %117 = arith.addf %111, %116 : vector<256x32xf32>
    %c2_132 = arith.constant 2 : index
    %c2_133 = arith.constant 2 : index
    %c0_134 = arith.constant 0 : index
    %118 = vector.load %arg10[%c2_132, %c2_133, %c0_134] : memref<18x18x16xf32, #tpu.memory_space<vmem>>, vector<16x16x16xf32>
    %119 = vector.shape_cast %118 : vector<16x16x16xf32> to vector<256x16xf32>
    %c8_135 = arith.constant 8 : index
    %c0_136 = arith.constant 0 : index
    %c0_137 = arith.constant 0 : index
    %120 = vector.load %arg4[%c8_135, %c0_136, %c0_137] : memref<9x16x32xf32, #tpu.memory_space<vmem>>, vector<1x16x32xf32>
    %121 = vector.shape_cast %120 : vector<1x16x32xf32> to vector<16x32xf32>
    %cst_138 = arith.constant dense<0.000000e+00> : vector<256x32xf32>
    %122 = tpu.matmul %119, %121, %cst_138 {dimension_numbers = #tpu.dot_dimension_numbers<[1], [0], [0], [1], [0, 0, 1, 1], [], []>} : vector<256x16xf32>, vector<16x32xf32>, vector<256x32xf32> -> vector<256x32xf32>
    %123 = arith.addf %117, %122 : vector<256x32xf32>
    %c0_139 = arith.constant 0 : index
    %c0_140 = arith.constant 0 : index
    %124 = vector.load %arg5[%c0_139, %c0_140] : memref<1x32xf32, #tpu.memory_space<vmem>>, vector<1x32xf32>
    %125 = vector.broadcast %124 : vector<1x32xf32> to vector<256x32xf32>
    %126 = arith.addf %123, %125 : vector<256x32xf32>
    %cst_141 = arith.constant 0.000000e+00 : f32
    %127 = vector.broadcast %cst_141 : f32 to vector<256x32xf32>
    %128 = arith.maximumf %126, %127 : vector<256x32xf32>
    %cst_142 = arith.constant dense<0.000000e+00> : vector<32xf32>
    %129 = vector.multi_reduction <add>, %128, %cst_142 [0] : vector<256x32xf32> to vector<32xf32>
    %130 = vector.shape_cast %129 : vector<32xf32> to vector<1x32xf32>
    %cst_143 = arith.constant 3.906250e-03 : f32
    %131 = vector.broadcast %cst_143 : f32 to vector<1x32xf32>
    %132 = arith.mulf %130, %131 : vector<1x32xf32>
    %c0_144 = arith.constant 0 : index
    %c0_145 = arith.constant 0 : index
    %133 = vector.load %arg6[%c0_144, %c0_145] : memref<32x64xf32, #tpu.memory_space<vmem>>, vector<32x64xf32>
    %cst_146 = arith.constant dense<0.000000e+00> : vector<1x64xf32>
    %134 = tpu.matmul %132, %133, %cst_146 {dimension_numbers = #tpu.dot_dimension_numbers<[1], [0], [0], [1], [0, 0, 1, 1], [], []>} : vector<1x32xf32>, vector<32x64xf32>, vector<1x64xf32> -> vector<1x64xf32>
    %c0_147 = arith.constant 0 : index
    %c0_148 = arith.constant 0 : index
    %135 = vector.load %arg7[%c0_147, %c0_148] : memref<1x64xf32, #tpu.memory_space<vmem>>, vector<1x64xf32>
    %136 = arith.addf %134, %135 : vector<1x64xf32>
    %c0_149 = arith.constant 0 : index
    %c0_150 = arith.constant 0 : index
    %c0_151 = arith.constant 0 : index
    %137 = vector.load %arg8[%c0_149, %c0_150, %c0_151] : memref<1x1x64xf32, #tpu.memory_space<vmem>>, vector<1x1x64xf32>
    %138 = vector.shape_cast %137 : vector<1x1x64xf32> to vector<1x64xf32>
    %139 = vector.shape_cast %136 : vector<1x64xf32> to vector<1x1x64xf32>
    tpu.vector_store %arg8[%c0_149, %c0_150, %c0_151], %139 {strides = array<i32>} : memref<1x1x64xf32, #tpu.memory_space<vmem>>, vector<1x1x64xf32>,
    return
  }
  func.func @transform_0(%arg0: i32) -> (i32, i32, i32, i32) {
    %c0_i32 = arith.constant 0 : i32
    %c0_i32_0 = arith.constant 0 : i32
    %c0_i32_1 = arith.constant 0 : i32
    %c0_i32_2 = arith.constant 0 : i32
    return %arg0, %c0_i32, %c0_i32_0, %c0_i32_1 : i32, i32, i32, i32
  }
  func.func @transform_1(%arg0: i32) -> (i32, i32, i32) {
    %c0_i32 = arith.constant 0 : i32
    %c0_i32_0 = arith.constant 0 : i32
    %c0_i32_1 = arith.constant 0 : i32
    %c0_i32_2 = arith.constant 0 : i32
    return %c0_i32, %c0_i32_0, %c0_i32_1 : i32, i32, i32
  }
  func.func @transform_2(%arg0: i32) -> (i32, i32) {
    %c0_i32 = arith.constant 0 : i32
    %c0_i32_0 = arith.constant 0 : i32
    %c0_i32_1 = arith.constant 0 : i32
    return %c0_i32, %c0_i32_0 : i32, i32
  }
  func.func @transform_3(%arg0: i32) -> (i32, i32, i32) {
    %c0_i32 = arith.constant 0 : i32
    %c0_i32_0 = arith.constant 0 : i32
    %c0_i32_1 = arith.constant 0 : i32
    %c0_i32_2 = arith.constant 0 : i32
    return %c0_i32, %c0_i32_0, %c0_i32_1 : i32, i32, i32
  }
  func.func @transform_4(%arg0: i32) -> (i32, i32) {
    %c0_i32 = arith.constant 0 : i32
    %c0_i32_0 = arith.constant 0 : i32
    %c0_i32_1 = arith.constant 0 : i32
    return %c0_i32, %c0_i32_0 : i32, i32
  }
  func.func @transform_5(%arg0: i32) -> (i32, i32) {
    %c0_i32 = arith.constant 0 : i32
    %c0_i32_0 = arith.constant 0 : i32
    %c0_i32_1 = arith.constant 0 : i32
    return %c0_i32, %c0_i32_0 : i32, i32
  }
  func.func @transform_6(%arg0: i32) -> (i32, i32) {
    %c0_i32 = arith.constant 0 : i32
    %c0_i32_0 = arith.constant 0 : i32
    %c0_i32_1 = arith.constant 0 : i32
    return %c0_i32, %c0_i32_0 : i32, i32
  }
  func.func @transform_7(%arg0: i32) -> (i32, i32, i32) {
    %c0_i32 = arith.constant 0 : i32
    %c0_i32_0 = arith.constant 0 : i32
    %c0_i32_1 = arith.constant 0 : i32
    return %arg0, %c0_i32, %c0_i32_0 : i32, i32, i32
  }
}

</mosaic_0001>

<bundles_post_ra>
// kernel: tpu_custom_call.1
= control target key start
LH: loop header
LB: loop body
LE: loop exit
PB: predicated region body
PF: predicated region fallthrough
CT: control target
= control target key end

     0   :  { %12 = vsyncpa [#allocation5], 0  ;;  %s13353_s0 = inlined_call_operand.vmem [shape: f32[2,16,16,4], index: 0, kind: input, shape index: {}]   ;;  %s13354_s1 = inlined_call_operand.vmem [shape: f32[9,4,16], index: 1, kind: input, shape index: {}]   ;;  %s13355_s2 = inlined_call_operand.vmem [shape: f32[1,16], index: 2, kind: input, shape index: {}]   ;;  %s13356_s3 = inlined_call_operand.vmem [shape: f32[9,16,32], index: 3, kind: input, shape index: {}]   ;;  %s13357_s4 = inlined_call_operand.vmem [shape: f32[1,32], index: 4, kind: input, shape index: {}]   ;;  %s13358_s5 = inlined_call_operand.vmem [shape: f32[32,64], index: 5, kind: input, shape index: {}]   ;;  %s13359_s6 = inlined_call_operand.vmem [shape: f32[1,64], index: 6, kind: input, shape index: {}]   ;;  %s13360_s7 = inlined_call_operand.hbm [shape: f32[2,1,64], index: 7, kind: output, shape index: {}]  }
   0x1   :  { %14 = vsyncpa [#allocation5 + $0x1], 0  ;;  %s10027_s24 = smov 0   ;;  %s10029_s25 = smov 0  }
   0x2   :  { %s10031_s26 = smov 0   ;;  %s10033_s27 = smov 0  }
   0x3 LB: > { %s10048_s28 = sadd.s32 4294967295, %s9982_s27   ;;  %s7722_s29 = sadd.s32 4294967294, %s9982_s27   ;;  %s9982_s27 = sphi %s10033_s27, %s13805_s27   ;;  %s9978_s26 = sphi %s10031_s26, %s13804_s26   ;;  %s9974_s25 = sphi %s10029_s25, %s13803_s25   ;;  %s9970_s24 = sphi %s10027_s24, %s13802_s24  }
   0x4   : > { %s10052_s30 = sadd.s32 1, %s9982_s27   ;;  %s179_s8 = sadd.s32 1, %s9978_s26 }
   0x5   : > { %s176_s9 = ssub.s32 %s9982_s27, %s10052_s30  ;;  %p189_p0 = scmp.ne.s32.totalorder %s9978_s26, %s9974_s25 }
   0x6   : > { %p177_p1 = scmp.eq.s32.totalorder %s176_s9, 0  ;;  %p190_p2 = scmp.eq.s32.totalorder %s10048_s28, 1 }
   0x7   : > { %p195_p3 = scmp.ne.s32.totalorder %s9974_s25, %s9970_s24  ;;  %p196_p4 = scmp.eq.s32.totalorder %s7722_s29, 1 }
   0x8   : > { %s10063_s10 = scalar_select %p177_p1, %s9978_s26, %s179_s8  }
   0x9   : > { %p10065_p5 = por %p190_p2, %p189_p0  ;;  %p10069_p6 = por %p196_p4, %p195_p3 }
   0xa   : > { %p7725_p7 = scmp.ge.s32.totalorder %s9982_s27, 1  ;;  %p240_p8 = scmp.lt.s32.totalorder %s9982_s27, 3 }
   0xc   : > { %p241_p9 = pnand %p7725_p7, %p240_p8 }
   0xe   : > { %244 = sbr.rel (%p241_p9) target bundleno = 1273 (0x4f9), region = 48 }
  0x13   : > { %v7728_v0 = vld [vmem:[%s13354_s1 + $0x4] sm:$0xf]  ;;  %vm560_vm0 = vcmask 1043456   ;;  %v429_v1 = vld [vmem:[%s13354_s1] sm:$0xf]  ;;  %vm276_vm1 = vcmask 31744  }
  0x14   : > { %8952 = vmatprep.subr.msk.mxu0 %vm560_vm0, %v7728_v0  ;;  %9002 = vmatprep.subr.msk.mxu1 %vm560_vm0, %v429_v1  ;;  %vm279_vm2 = vcmask 25600   ;;  %v10086_v2 = vld [vmem:[%s13354_s1 + $0x8] sm:$0xf]  ;;  %p271_p10 = scmp.lt.s32.totalorder %s10048_s28, 1  ;;  %v13361_v3 = vmov 0.0   ;;  %vm3915_vm3 = vcmask 130048  }
  0x15   : > { %8953 = vmatpush3.msk.msra.mxu0 %vm560_vm0, %v7728_v0  ;;  %277 = vst.msk [vmem:[#allocation2] sm:$0xff] %vm276_vm1, %v13361_v3  ;;  %278 = vst.msk [vmem:[#allocation2 + $0x8] sm:$0xff] %vm276_vm1, %v13361_v3  ;;  %9003 = vmatpush3.msk.msra.mxu1 %vm560_vm0, %v429_v1  ;;  %v7829_v4 = vld [vmem:[%s13354_s1 + $0xc] sm:$0xf]  ;;  %v10225_v11 = vld [vmem:[%s13354_s1 + $0x10] sm:$0xf] }
  0x16   : > { %281 = vst.msk [vmem:[#allocation2 + $0x18] sm:$0xff] %vm276_vm1, %v13361_v3  ;;  %282 = vst.msk [vmem:[#allocation2 + $0x20] sm:$0xff] %vm276_vm1, %v13361_v3  ;;  %9052 = vmatprep.subr.msk.mxu0 %vm560_vm0, %v10086_v2  ;;  %s272_s21 = scalar_select %p271_p10, %s10048_s28, 1  ;;  %9102 = vmatprep.subr.msk.mxu1 %vm560_vm0, %v7829_v4  ;;  %vm3918_vm4 = vcmask 123904   ;;  %vm9985_vm5 = vmmov 0   ;;  %vm7503_vm6 = vcmask 261120  }
  0x17   : > { %284 = vst.msk [vmem:[#allocation2 + $0x30] sm:$0xff] %vm276_vm1, %v13361_v3  ;;  %285 = vst.msk [vmem:[#allocation2 + $0x38] sm:$0xff] %vm276_vm1, %v13361_v3  ;;  %s269_s14 = sand.u32 1, %s9974_s25   ;;  %s8340_s17 = sshll.u32 %s10048_s28, 4  ;;  %vm7652_vm7 = vcmask 516096  }
  0x18   : > { %287 = vst.msk [vmem:[#allocation2 + $0x48] sm:$0xff] %vm276_vm1, %v13361_v3  ;;  %288 = vst.msk [vmem:[#allocation2 + $0x50] sm:$0xff] %vm276_vm1, %v13361_v3  ;;  %s8343_s22 = sshll.u32 %s272_s21, 8  ;;  %s270_s18 = scalar_lea.vmem [#allocation4], %s269_s14 }
  0x19   : > { %290 = vst.msk [vmem:[#allocation2 + $0x60] sm:$0xff] %vm276_vm1, %v13361_v3  ;;  %291 = vst.msk [vmem:[#allocation2 + $0x68] sm:$0xff] %vm276_vm1, %v13361_v3  ;;  %s10211_s8 = scalar_lea.vmem %s13353_s0, %s8343_s22  ;;  %s7667_s19 = sshll.u32 %s270_s18, 4  ;;  %s7668_s19 = int_to_ptr.vmem [resolvable:$true] %s7667_s19 }
  0x1a   : > { %293 = vst.msk [vmem:[#allocation2 + $0x78] sm:$0xff] %vm276_vm1, %v13361_v3  ;;  %294 = vst.msk [vmem:[#allocation2 + $0x80] sm:$0xff] %vm276_vm1, %v13361_v3  ;;  %v332_v5 = vld [vmem:[%s10211_s8] sm:$0xff]  ;;  %v333_v6 = vld [vmem:[%s10211_s8 + $0x8] sm:$0xff]  ;;  %s13318_s22 = scalar_lea.hbm %s13360_s7, %s8340_s17  ;;  %s7655_s23 = scalar_lea.sflag [#allocation5], %s269_s14 }
  0x1b   : > { %296 = vst.msk [vmem:[#allocation2 + $0x90] sm:$0xff] %vm276_vm1, %v13361_v3  ;;  %297 = vst.msk [vmem:[#allocation2 + $0x98] sm:$0xff] %vm276_vm1, %v13361_v3  ;;  %v334_v7 = vld [vmem:[%s10211_s8 + $0x10] sm:$0xff]  ;;  %v335_v8 = vld [vmem:[%s10211_s8 + $0x18] sm:$0xff]  ;;  %s9922_s29 = scalar_lea.vmem %s7668_s19, 16  ;;  %s9986_s28 = smov [#allocation4]  }
  0x1c   : > { %299 = vst.msk [vmem:[#allocation2 + $0xa8] sm:$0xff] %vm276_vm1, %v13361_v3  ;;  %300 = vst.msk [vmem:[#allocation2 + $0xb0] sm:$0xff] %vm276_vm1, %v13361_v3  ;;  %v336_v9 = vld [vmem:[%s10211_s8 + $0x20] sm:$0xff]  ;;  %v337_v10 = vld [vmem:[%s10211_s8 + $0x28] sm:$0xff]  ;;  %p9923_p11 = scmp.ne.s32.totalorder %s7668_s19, %s9922_s29 }
  0x1d   : > { %302 = vst.msk [vmem:[#allocation2 + $0xc0] sm:$0xff] %vm276_vm1, %v13361_v3  ;;  %303 = vst.msk [vmem:[#allocation2 + $0xc8] sm:$0xff] %vm276_vm1, %v13361_v3  ;;  %v430_v12 = vld [vmem:[#allocation2 + $0x1] sm:$0xff]  ;;  %v338_v16 = vld [vmem:[%s10211_s8 + $0x30] sm:$0xff] }
  0x1e   : > { %305 = vst.msk [vmem:[#allocation2 + $0xd8] sm:$0xff] %vm276_vm1, %v13361_v3  ;;  %306 = vst.msk [vmem:[#allocation2 + $0xe0] sm:$0xff] %vm276_vm1, %v13361_v3  ;;  %v397_v13 = vld [vmem:[#allocation2] sm:$0xff]  ;;  %8954 = vmatprep.mubr.msk.f32.mxu0 %vm276_vm1, %v430_v12  ;;  %v398_v15 = vld [vmem:[#allocation2 + $0x8] sm:$0xff]  ;;  %p9924_p12 = pnand %p9923_p11, %p10065_p5 }
  0x1f   : > { %308 = vst.msk [vmem:[#allocation2 + $0xf0] sm:$0xff] %vm276_vm1, %v13361_v3  ;;  %309 = vst.msk [vmem:[#allocation2 + $0xf8] sm:$0xff] %vm276_vm1, %v13361_v3  ;;  %9004 = vmatprep.mubr.msk.f32.mxu1 %vm276_vm1, %v397_v13  ;;  %v339_v17 = vld [vmem:[%s10211_s8 + $0x38] sm:$0xff]  ;;  %v340_v18 = vld [vmem:[%s10211_s8 + $0x40] sm:$0xff] }
  0x20   : > { %311 = vst.msk [vmem:[#allocation2 + $0x108] sm:$0xff] %vm276_vm1, %v13361_v3  ;;  %312 = vst.msk [vmem:[#allocation2 + $0x110] sm:$0xff] %vm276_vm1, %v13361_v3  ;;  %9005 = vmatmul.mubr.msk.f32.vlgmr.msra.gmra.mxu1 %vm276_vm1, %v398_v15  ;;  %v341_v19 = vld [vmem:[%s10211_s8 + $0x48] sm:$0xff]  ;;  %v342_v20 = vld [vmem:[%s10211_s8 + $0x50] sm:$0xff]  ;;  %p9925_p13 = pneg %p9924_p12 }
  0x21   : > { %314 = vst.msk [vmem:[#allocation2 + $0x120] sm:$0xff] %vm276_vm1, %v13361_v3  ;;  %315 = vst.msk [vmem:[#allocation2 + $0x128] sm:$0xff] %vm276_vm1, %v13361_v3  ;;  %v343_v21 = vld [vmem:[%s10211_s8 + $0x58] sm:$0xff]  ;;  %v344_v22 = vld [vmem:[%s10211_s8 + $0x60] sm:$0xff]  ;;  %9103 = vmatpush3.msk.msra.mxu1 %vm560_vm0, %v7829_v4 }
  0x22   : > { %317 = vst.msk [vmem:[#allocation2 + $0x138] sm:$0xff] %vm276_vm1, %v13361_v3  ;;  %318 = vst.msk [vmem:[#allocation2 + $0x140] sm:$0xff] %vm276_vm1, %v13361_v3  ;;  %v345_v23 = vld [vmem:[%s10211_s8 + $0x68] sm:$0xff]  ;;  %v346_v24 = vld [vmem:[%s10211_s8 + $0x70] sm:$0xff] }
  0x23   : > { %320 = vst.msk [vmem:[#allocation2 + $0x150] sm:$0xff] %vm276_vm1, %v13361_v3  ;;  %321 = vst.msk [vmem:[#allocation2 + $0x158] sm:$0xff] %vm276_vm1, %v13361_v3  ;;  %v347_v25 = vld [vmem:[%s10211_s8 + $0x78] sm:$0xff]  ;;  %v348_v26 = vld [vmem:[%s10211_s8 + $0x80] sm:$0xff] }
  0x24   : > { %323 = vst.msk [vmem:[#allocation2 + $0x168] sm:$0xff] %vm276_vm1, %v13361_v3  ;;  %324 = vst.msk [vmem:[#allocation2 + $0x170] sm:$0xff] %vm276_vm1, %v13361_v3  ;;  %v349_v27 = vld [vmem:[%s10211_s8 + $0x88] sm:$0xff]  ;;  %v350_v28 = vld [vmem:[%s10211_s8 + $0x90] sm:$0xff] }
  0x25   : > { %326 = vst.msk [vmem:[#allocation2 + $0x180] sm:$0xff] %vm276_vm1, %v13361_v3  ;;  %327 = vst.msk [vmem:[#allocation2 + $0x188] sm:$0xff] %vm276_vm1, %v13361_v3  ;;  %v351_v29 = vld [vmem:[%s10211_s8 + $0x98] sm:$0xff]  ;;  %v352_v50 = vld [vmem:[%s10211_s8 + $0xa0] sm:$0xff] }
  0x26   : > { %329 = vst.msk [vmem:[#allocation2 + $0x198] sm:$0xff] %vm276_vm1, %v13361_v3  ;;  %330 = vst.msk [vmem:[#allocation2 + $0x1a0] sm:$0xff] %vm276_vm1, %v13361_v3  ;;  %v353_v51 = vld [vmem:[%s10211_s8 + $0xa8] sm:$0xff]  ;;  %v354_v53 = vld [vmem:[%s10211_s8 + $0xb0] sm:$0xff] }
  0x27   : > { %280 = vst.msk [vmem:[#allocation2 + $0x10] sm:$0x3] %vm279_vm2, %v13361_v3  ;;  %283 = vst.msk [vmem:[#allocation2 + $0x28] sm:$0x3] %vm279_vm2, %v13361_v3  ;;  %v355_v54 = vld [vmem:[%s10211_s8 + $0xb8] sm:$0xff]  ;;  %v356_v55 = vld [vmem:[%s10211_s8 + $0xc0] sm:$0xff] }
  0x28   : > { %286 = vst.msk [vmem:[#allocation2 + $0x40] sm:$0x3] %vm279_vm2, %v13361_v3  ;;  %289 = vst.msk [vmem:[#allocation2 + $0x58] sm:$0x3] %vm279_vm2, %v13361_v3  ;;  %v357_v56 = vld [vmem:[%s10211_s8 + $0xc8] sm:$0xff]  ;;  %v358_v57 = vld [vmem:[%s10211_s8 + $0xd0] sm:$0xff] }
  0x29   : > { %292 = vst.msk [vmem:[#allocation2 + $0x70] sm:$0x3] %vm279_vm2, %v13361_v3  ;;  %295 = vst.msk [vmem:[#allocation2 + $0x88] sm:$0x3] %vm279_vm2, %v13361_v3  ;;  %v359_v58 = vld [vmem:[%s10211_s8 + $0xd8] sm:$0xff]  ;;  %v360_v60 = vld [vmem:[%s10211_s8 + $0xe0] sm:$0xff] }
  0x2a   : > { %298 = vst.msk [vmem:[#allocation2 + $0xa0] sm:$0x3] %vm279_vm2, %v13361_v3  ;;  %301 = vst.msk [vmem:[#allocation2 + $0xb8] sm:$0x3] %vm279_vm2, %v13361_v3  ;;  %v361_v61 = vld [vmem:[%s10211_s8 + $0xe8] sm:$0xff] }
  0x2b   : > { %304 = vst.msk [vmem:[#allocation2 + $0xd0] sm:$0x3] %vm279_vm2, %v13361_v3  ;;  %307 = vst.msk [vmem:[#allocation2 + $0xe8] sm:$0x3] %vm279_vm2, %v13361_v3 }
  0x2c   : > { %310 = vst.msk [vmem:[#allocation2 + $0x100] sm:$0x3] %vm279_vm2, %v13361_v3  ;;  %313 = vst.msk [vmem:[#allocation2 + $0x118] sm:$0x3] %vm279_vm2, %v13361_v3 }
  0x2d   : > { %316 = vst.msk [vmem:[#allocation2 + $0x130] sm:$0x3] %vm279_vm2, %v13361_v3  ;;  %319 = vst.msk [vmem:[#allocation2 + $0x148] sm:$0x3] %vm279_vm2, %v13361_v3 }
  0x2e   : > { %322 = vst.msk [vmem:[#allocation2 + $0x160] sm:$0x3] %vm279_vm2, %v13361_v3  ;;  %325 = vst.msk [vmem:[#allocation2 + $0x178] sm:$0x3] %vm279_vm2, %v13361_v3  ;;  %v431_v14 = vld [vmem:[#allocation2 + $0x9] sm:$0xff] }
  0x2f   : > { %328 = vst.msk [vmem:[#allocation2 + $0x190] sm:$0x3] %vm279_vm2, %v13361_v3  ;;  %331 = vst.msk [vmem:[#allocation2 + $0x1a8] sm:$0x3] %vm279_vm2, %v13361_v3  ;;  %8955 = vmatmul.mubr.msk.f32.vlgmr.msra.gmra.mxu0 %vm276_vm1, %v431_v14  ;;  %v1114_v3 = vld [vmem:[#allocation2 + $0xa] sm:$0xff] }
  0x30   : > { %365 = vst.msk [vmem:[#allocation2 + $0x19] sm:$0xff] %vm276_vm1, %v332_v5  ;;  %366 = vst.msk [vmem:[#allocation2 + $0x21] sm:$0xff] %vm276_vm1, %v333_v6  ;;  %9053 = vmatpush3.msk.msra.mxu0 %vm560_vm0, %v10086_v2 }
  0x31   : > { %367 = vst.msk [vmem:[#allocation2 + $0x31] sm:$0xff] %vm276_vm1, %v334_v7  ;;  %368 = vst.msk [vmem:[#allocation2 + $0x39] sm:$0xff] %vm276_vm1, %v335_v8  ;;  %9152 = vmatprep.subr.msk.mxu0 %vm560_vm0, %v10225_v11 }
  0x32   : > { %369 = vst.msk [vmem:[#allocation2 + $0x49] sm:$0xff] %vm276_vm1, %v336_v9  ;;  %370 = vst.msk [vmem:[#allocation2 + $0x51] sm:$0xff] %vm276_vm1, %v337_v10 }
  0x33   : > { %371 = vst.msk [vmem:[#allocation2 + $0x61] sm:$0xff] %vm276_vm1, %v338_v16  ;;  %372 = vst.msk [vmem:[#allocation2 + $0x69] sm:$0xff] %vm276_vm1, %v339_v17  ;;  %v362_v16 = vld [vmem:[%s10211_s8 + $0xf0] sm:$0xff] }
  0x34   : > { %373 = vst.msk [vmem:[#allocation2 + $0x79] sm:$0xff] %vm276_vm1, %v340_v18  ;;  %374 = vst.msk [vmem:[#allocation2 + $0x81] sm:$0xff] %vm276_vm1, %v341_v19  ;;  %v10439_v17 = vld [vmem:[%s13354_s1 + $0x14] sm:$0xf]  ;;  %v363_v18 = vld [vmem:[%s10211_s8 + $0xf8] sm:$0xff]  ;;  %s9926_s8 = sshll.u32 %s9986_s28, 4  ;;  %s9927_s8 = int_to_ptr.vmem [resolvable:$false] %s9926_s8 }
  0x35   : > { %375 = vst.msk [vmem:[#allocation2 + $0x91] sm:$0xff] %vm276_vm1, %v342_v20  ;;  %376 = vst.msk [vmem:[#allocation2 + $0x99] sm:$0xff] %vm276_vm1, %v343_v21  ;;  %9202 = vmatprep.subr.msk.mxu1 %vm560_vm0, %v10439_v17  ;;  %s9928_s9 = scalar_lea.vmem %s9927_s8, 32  ;;  %p9929_p0 = scmp.lt.s32.totalorder %s7668_s19, %s9927_s8 }
  0x36   : > { %377 = vst.msk [vmem:[#allocation2 + $0xa9] sm:$0xff] %vm276_vm1, %v344_v22  ;;  %378 = vst.msk [vmem:[#allocation2 + $0xb1] sm:$0xff] %vm276_vm1, %v345_v23  ;;  %p9930_p1 = scmp.lt.s32.totalorder %s9928_s9, %s9922_s29 }
  0x37   : > { %379 = vst.msk [vmem:[#allocation2 + $0xc1] sm:$0xff] %vm276_vm1, %v346_v24  ;;  %380 = vst.msk [vmem:[#allocation2 + $0xc9] sm:$0xff] %vm276_vm1, %v347_v25  ;;  %v10264_v30 = vld [vmem:[#allocation2 + $0x19] sm:$0xff]  ;;  %v10268_v32 = vld [vmem:[#allocation2 + $0x21] sm:$0xff] }
  0x38   : > { %381 = vst.msk [vmem:[#allocation2 + $0xd9] sm:$0xff] %vm276_vm1, %v348_v26  ;;  %v10266_v31 = vld [vmem:[#allocation2 + $0x18] sm:$0xff]  ;;  %382 = vst.msk [vmem:[#allocation2 + $0xe1] sm:$0xff] %vm276_vm1, %v349_v27  ;;  %8957 = vmatprep.mubr.msk.f32.mxu0 %vm276_vm1, %v10264_v30  ;;  %v10277_v33 = vld [vmem:[#allocation2 + $0x20] sm:$0xff]  ;;  %p9931_p2 = por %p9930_p1, %p9929_p0 }
  0x39   : > { %383 = vst.msk [vmem:[#allocation2 + $0xf1] sm:$0xff] %vm276_vm1, %v350_v28  ;;  %384 = vst.msk [vmem:[#allocation2 + $0xf9] sm:$0xff] %vm276_vm1, %v351_v29  ;;  %9007 = vmatprep.mubr.msk.f32.mxu1 %vm276_vm1, %v10266_v31  ;;  %v10279_v34 = vld [vmem:[#allocation2 + $0x31] sm:$0xff]  ;;  %8958 = vmatmul.mubr.msk.f32.gmra.mxu0 %vm276_vm1, %v10268_v32  ;;  %v10291_v36 = vld [vmem:[#allocation2 + $0x39] sm:$0xff] }
  0x3a   : > { %v10281_v35 = vld [vmem:[#allocation2 + $0x30] sm:$0xff]  ;;  %9008 = vmatmul.mubr.msk.f32.gmra.mxu1 %vm276_vm1, %v10277_v33  ;;  %8960 = vmatprep.mubr.msk.f32.mxu0 %vm276_vm1, %v10279_v34  ;;  %v10293_v37 = vld [vmem:[#allocation2 + $0x38] sm:$0xff]  ;;  %v10297_v39 = vld [vmem:[#allocation2 + $0x48] sm:$0xff]  ;;  %385 = vst.msk [vmem:[#allocation2 + $0x109] sm:$0xff] %vm276_vm1, %v352_v50  ;;  %p9932_p3 = pnand %p9931_p2, %p9925_p13 }
  0x3b   : > { %13432 = vst [vmem:[#allocation7_spill] sm:$0xff] %v10281_v35  ;;  %9010 = vmatprep.mubr.msk.f32.mxu1 %vm276_vm1, %v10281_v35  ;;  %13433 = vst [vmem:[#allocation8_spill] sm:$0xff] %v10293_v37  ;;  %v10295_v38 = vld [vmem:[#allocation2 + $0x49] sm:$0xff]  ;;  %v10307_v40 = vld [vmem:[#allocation2 + $0x51] sm:$0xff] }
  0x3c   : > { %13434 = vst [vmem:[#allocation9_spill] sm:$0xff] %v10297_v39  ;;  %v10309_v41 = vld [vmem:[#allocation2 + $0x50] sm:$0xff]  ;;  %v10311_v42 = vld [vmem:[#allocation2 + $0x61] sm:$0xff]  ;;  %v10327_v46 = vld [vmem:[#allocation2 + $0x79] sm:$0xff] }
  0x3d   : > { %8961 = vmatmul.mubr.msk.f32.gmra.mxu0 %vm276_vm1, %v10291_v36  ;;  %13435 = vst [vmem:[#allocation10_spill] sm:$0xff] %v10309_v41  ;;  %v10313_v43 = vld [vmem:[#allocation2 + $0x60] sm:$0xff]  ;;  %v10323_v44 = vld [vmem:[#allocation2 + $0x69] sm:$0xff]  ;;  %v10329_v47 = vld [vmem:[#allocation2 + $0x78] sm:$0xff] }
  0x3e   : > { %9011 = vmatmul.mubr.msk.f32.gmra.mxu1 %vm276_vm1, %v10293_v37  ;;  %8963 = vmatprep.mubr.msk.f32.mxu0 %vm276_vm1, %v10295_v38  ;;  %13436 = vst [vmem:[#allocation11_spill] sm:$0xff] %v10313_v43  ;;  %v10325_v45 = vld [vmem:[#allocation2 + $0x68] sm:$0xff]  ;;  %13438 = vst [vmem:[#allocation13_spill] sm:$0xff] %v10329_v47  ;;  %v10333_v49 = vld [vmem:[#allocation2 + $0x80] sm:$0xff] }
  0x3f   : > { %9013 = vmatprep.mubr.msk.f32.mxu1 %vm276_vm1, %v10297_v39  ;;  %13437 = vst [vmem:[#allocation12_spill] sm:$0xff] %v10325_v45  ;;  %v10331_v48 = vld [vmem:[#allocation2 + $0x81] sm:$0xff]  ;;  %13439 = vst [vmem:[#allocation14_spill] sm:$0xff] %v10333_v49  ;;  %v10341_v52 = vld [vmem:[#allocation2 + $0x91] sm:$0xff] }
  0x40   : > { %386 = vst.msk [vmem:[#allocation2 + $0x111] sm:$0xff] %vm276_vm1, %v353_v51  ;;  %387 = vst.msk [vmem:[#allocation2 + $0x121] sm:$0xff] %vm276_vm1, %v354_v53  ;;  %v10358_v59 = vld [vmem:[#allocation2 + $0x90] sm:$0xff]  ;;  %v10375_v62 = vld [vmem:[#allocation2 + $0x99] sm:$0xff] }
  0x41   : > { %8964 = vmatmul.mubr.msk.f32.gmra.mxu0 %vm276_vm1, %v10307_v40  ;;  %388 = vst.msk [vmem:[#allocation2 + $0x129] sm:$0xff] %vm276_vm1, %v355_v54  ;;  %389 = vst.msk [vmem:[#allocation2 + $0x139] sm:$0xff] %vm276_vm1, %v356_v55  ;;  %v10377_v63 = vld [vmem:[#allocation2 + $0x98] sm:$0xff]  ;;  %v10379_v0 = vld [vmem:[#allocation2 + $0xa9] sm:$0xff] }
  0x42   : > { %9014 = vmatmul.mubr.msk.f32.gmra.mxu1 %vm276_vm1, %v10309_v41  ;;  %8966 = vmatprep.mubr.msk.f32.mxu0 %vm276_vm1, %v10311_v42  ;;  %13440 = vst [vmem:[#allocation15_spill] sm:$0xff] %v10358_v59  ;;  %390 = vst.msk [vmem:[#allocation2 + $0x141] sm:$0xff] %vm276_vm1, %v357_v56  ;;  %v10381_v1 = vld [vmem:[#allocation2 + $0xa8] sm:$0xff]  ;;  %v10391_v2 = vld [vmem:[#allocation2 + $0xb1] sm:$0xff] }
  0x43   : > { %9016 = vmatprep.mubr.msk.f32.mxu1 %vm276_vm1, %v10313_v43  ;;  %391 = vst.msk [vmem:[#allocation2 + $0x151] sm:$0xff] %vm276_vm1, %v358_v57  ;;  %392 = vst.msk [vmem:[#allocation2 + $0x159] sm:$0xff] %vm276_vm1, %v359_v58  ;;  %v10393_v4 = vld [vmem:[#allocation2 + $0xb0] sm:$0xff]  ;;  %v10395_v5 = vld [vmem:[#allocation2 + $0xc1] sm:$0xff] }
  0x44   : > { %393 = vst.msk [vmem:[#allocation2 + $0x169] sm:$0xff] %vm276_vm1, %v360_v60  ;;  %394 = vst.msk [vmem:[#allocation2 + $0x171] sm:$0xff] %vm276_vm1, %v361_v61  ;;  %v10397_v6 = vld [vmem:[#allocation2 + $0xc0] sm:$0xff]  ;;  %v10407_v7 = vld [vmem:[#allocation2 + $0xc9] sm:$0xff] }
  0x45   : > { %8967 = vmatmul.mubr.msk.f32.gmra.mxu0 %vm276_vm1, %v10323_v44  ;;  %13441 = vst [vmem:[#allocation16_spill] sm:$0xff] %v10377_v63  ;;  %13442 = vst [vmem:[#allocation17_spill] sm:$0xff] %v10381_v1  ;;  %v10409_v8 = vld [vmem:[#allocation2 + $0xc8] sm:$0xff]  ;;  %v10411_v9 = vld [vmem:[#allocation2 + $0xd9] sm:$0xff] }
  0x46   : > { %9017 = vmatmul.mubr.msk.f32.gmra.mxu1 %vm276_vm1, %v10325_v45  ;;  %8969 = vmatprep.mubr.msk.f32.mxu0 %vm276_vm1, %v10327_v46  ;;  %13443 = vst [vmem:[#allocation18_spill] sm:$0xff] %v10393_v4  ;;  %13444 = vst [vmem:[#allocation19_spill] sm:$0xff] %v10397_v6  ;;  %v10413_v10 = vld [vmem:[#allocation2 + $0xd8] sm:$0xff]  ;;  %v10423_v12 = vld [vmem:[#allocation2 + $0xe1] sm:$0xff] }
  0x47   : > { %9019 = vmatprep.mubr.msk.f32.mxu1 %vm276_vm1, %v10329_v47  ;;  %13445 = vst [vmem:[#allocation20_spill] sm:$0xff] %v10409_v8  ;;  %13446 = vst [vmem:[#allocation21_spill] sm:$0xff] %v10413_v10  ;;  %v10425_v13 = vld [vmem:[#allocation2 + $0xe0] sm:$0xff]  ;;  %v10427_v14 = vld [vmem:[#allocation2 + $0xf1] sm:$0xff] }
  0x48   : > { %13447 = vst [vmem:[#allocation22_spill] sm:$0xff] %v10425_v13  ;;  %v10429_v15 = vld [vmem:[#allocation2 + $0xf0] sm:$0xff]  ;;  %v10446_v19 = vld [vmem:[#allocation2 + $0xf9] sm:$0xff]  ;;  %395 = vst.msk [vmem:[#allocation2 + $0x181] sm:$0xff] %vm276_vm1, %v362_v16 }
  0x49   : > { %8970 = vmatmul.mubr.msk.f32.gmra.mxu0 %vm276_vm1, %v10331_v48  ;;  %13448 = vst [vmem:[#allocation23_spill] sm:$0xff] %v10429_v15  ;;  %v10448_v20 = vld [vmem:[#allocation2 + $0xf8] sm:$0xff]  ;;  %396 = vst.msk [vmem:[#allocation2 + $0x189] sm:$0xff] %vm276_vm1, %v363_v18  ;;  %v10452_v21 = vld [vmem:[#allocation2 + $0x109] sm:$0xff] }
  0x4a   : > { %9020 = vmatmul.mubr.msk.f32.gmra.mxu1 %vm276_vm1, %v10333_v49  ;;  %8972 = vmatprep.mubr.msk.f32.mxu0 %vm276_vm1, %v10341_v52  ;;  %13449 = vst [vmem:[#allocation24_spill] sm:$0xff] %v10448_v20  ;;  %v10454_v22 = vld [vmem:[#allocation2 + $0x108] sm:$0xff]  ;;  %v10466_v23 = vld [vmem:[#allocation2 + $0x111] sm:$0xff]  ;;  %v10472_v26 = vld [vmem:[#allocation2 + $0x120] sm:$0xff] }
  0x4b   : > { %9022 = vmatprep.mubr.msk.f32.mxu1 %vm276_vm1, %v10358_v59  ;;  %13450 = vst [vmem:[#allocation25_spill] sm:$0xff] %v10454_v22  ;;  %v10468_v24 = vld [vmem:[#allocation2 + $0x110] sm:$0xff]  ;;  %v10470_v25 = vld [vmem:[#allocation2 + $0x121] sm:$0xff]  ;;  %13452 = vst [vmem:[#allocation27_spill] sm:$0xff] %v10472_v26 }
  0x4c   : > { %13451 = vst [vmem:[#allocation26_spill] sm:$0xff] %v10468_v24  ;;  %v10482_v27 = vld [vmem:[#allocation2 + $0x129] sm:$0xff]  ;;  %v10486_v29 = vld [vmem:[#allocation2 + $0x139] sm:$0xff]  ;;  %v10498_v51 = vld [vmem:[#allocation2 + $0x141] sm:$0xff] }
  0x4d   : > { %8973 = vmatmul.mubr.msk.f32.gmra.mxu0 %vm276_vm1, %v10375_v62  ;;  %v10484_v28 = vld [vmem:[#allocation2 + $0x128] sm:$0xff]  ;;  %v10488_v50 = vld [vmem:[#allocation2 + $0x138] sm:$0xff]  ;;  %v10500_v53 = vld [vmem:[#allocation2 + $0x140] sm:$0xff] }
  0x4e   : > { %9023 = vmatmul.mubr.msk.f32.gmra.mxu1 %vm276_vm1, %v10377_v63  ;;  %8975 = vmatprep.mubr.msk.f32.mxu0 %vm276_vm1, %v10379_v0  ;;  %13453 = vst [vmem:[#allocation28_spill] sm:$0xff] %v10484_v28  ;;  %13454 = vst [vmem:[#allocation29_spill] sm:$0xff] %v10488_v50  ;;  %v10502_v54 = vld [vmem:[#allocation2 + $0x151] sm:$0xff]  ;;  %v10514_v56 = vld [vmem:[#allocation2 + $0x159] sm:$0xff] }
  0x4f   : > { %9025 = vmatprep.mubr.msk.f32.mxu1 %vm276_vm1, %v10381_v1  ;;  %13455 = vst [vmem:[#allocation30_spill] sm:$0xff] %v10500_v53  ;;  %v10504_v55 = vld [vmem:[#allocation2 + $0x150] sm:$0xff]  ;;  %v10516_v57 = vld [vmem:[#allocation2 + $0x158] sm:$0xff]  ;;  %v10520_v60 = vld [vmem:[#allocation2 + $0x168] sm:$0xff] }
  0x50   : > { %13456 = vst [vmem:[#allocation31_spill] sm:$0xff] %v10504_v55  ;;  %13457 = vst [vmem:[#allocation32_spill] sm:$0xff] %v10516_v57  ;;  %v10518_v58 = vld [vmem:[#allocation2 + $0x169] sm:$0xff]  ;;  %v10530_v61 = vld [vmem:[#allocation2 + $0x171] sm:$0xff] }
  0x51   : > { %8976 = vmatmul.mubr.msk.f32.gmra.mxu0 %vm276_vm1, %v10391_v2  ;;  %13458 = vst [vmem:[#allocation33_spill] sm:$0xff] %v10518_v58  ;;  %13459 = vst [vmem:[#allocation34_spill] sm:$0xff] %v10530_v61  ;;  %v10532_v16 = vld [vmem:[#allocation2 + $0x170] sm:$0xff]  ;;  %v1113_v18 = vld [vmem:[#allocation2 + $0x2] sm:$0xff] }
  0x52   : > { %9026 = vmatmul.mubr.msk.f32.gmra.mxu1 %vm276_vm1, %v10393_v4  ;;  %8978 = vmatprep.mubr.msk.f32.mxu0 %vm276_vm1, %v10395_v5 }
  0x53   : > { %9028 = vmatprep.mubr.msk.f32.mxu1 %vm276_vm1, %v10397_v6 }
  0x55   : > { %8979 = vmatmul.mubr.msk.f32.gmra.mxu0 %vm276_vm1, %v10407_v7 }
  0x56   : > { %9029 = vmatmul.mubr.msk.f32.gmra.mxu1 %vm276_vm1, %v10409_v8  ;;  %8981 = vmatprep.mubr.msk.f32.mxu0 %vm276_vm1, %v10411_v9 }
  0x57   : > { %9031 = vmatprep.mubr.msk.f32.mxu1 %vm276_vm1, %v10413_v10 }
  0x59   : > { %8982 = vmatmul.mubr.msk.f32.gmra.mxu0 %vm276_vm1, %v10423_v12 }
  0x5a   : > { %9032 = vmatmul.mubr.msk.f32.gmra.mxu1 %vm276_vm1, %v10425_v13  ;;  %8984 = vmatprep.mubr.msk.f32.mxu0 %vm276_vm1, %v10427_v14 }
  0x5b   : > { %9034 = vmatprep.mubr.msk.f32.mxu1 %vm276_vm1, %v10429_v15 }
  0x5d   : > { %8985 = vmatmul.mubr.msk.f32.gmra.mxu0 %vm276_vm1, %v10446_v19 }
  0x5e   : > { %9035 = vmatmul.mubr.msk.f32.gmra.mxu1 %vm276_vm1, %v10448_v20  ;;  %8987 = vmatprep.mubr.msk.f32.mxu0 %vm276_vm1, %v10452_v21 }
  0x5f   : > { %9037 = vmatprep.mubr.msk.f32.mxu1 %vm276_vm1, %v10454_v22 }
  0x61   : > { %8988 = vmatmul.mubr.msk.f32.gmra.mxu0 %vm276_vm1, %v10466_v23 }
  0x62   : > { %9038 = vmatmul.mubr.msk.f32.gmra.mxu1 %vm276_vm1, %v10468_v24  ;;  %8990 = vmatprep.mubr.msk.f32.mxu0 %vm276_vm1, %v10470_v25 }
  0x63   : > { %9040 = vmatprep.mubr.msk.f32.mxu1 %vm276_vm1, %v10472_v26 }
  0x65   : > { %8991 = vmatmul.mubr.msk.f32.gmra.mxu0 %vm276_vm1, %v10482_v27 }
  0x66   : > { %9041 = vmatmul.mubr.msk.f32.gmra.mxu1 %vm276_vm1, %v10484_v28  ;;  %8993 = vmatprep.mubr.msk.f32.mxu0 %vm276_vm1, %v10486_v29 }
  0x67   : > { %9043 = vmatprep.mubr.msk.f32.mxu1 %vm276_vm1, %v10488_v50 }
  0x69   : > { %8994 = vmatmul.mubr.msk.f32.gmra.mxu0 %vm276_vm1, %v10498_v51 }
  0x6a   : > { %9044 = vmatmul.mubr.msk.f32.gmra.mxu1 %vm276_vm1, %v10500_v53  ;;  %8996 = vmatprep.mubr.msk.f32.mxu0 %vm276_vm1, %v10502_v54 }
  0x6b   : > { %9046 = vmatprep.mubr.msk.f32.mxu1 %vm276_vm1, %v10504_v55 }
  0x6d   : > { %8997 = vmatmul.mubr.msk.f32.gmra.mxu0 %vm276_vm1, %v10514_v56 }
  0x6e   : > { %9047 = vmatmul.mubr.msk.f32.gmra.mxu1 %vm276_vm1, %v10516_v57  ;;  %8999 = vmatprep.mubr.msk.f32.mxu0 %vm276_vm1, %v10518_v58  ;;  %v10541_v58 = vld [vmem:[#allocation2 + $0x1a] sm:$0xff] }
  0x6f   : > { %9049 = vmatprep.mubr.msk.f32.mxu1 %vm276_vm1, %v10520_v60 }
  0x71   : > { %9000 = vmatmul.mubr.msk.f32.gmra.mxu0 %vm276_vm1, %v10530_v61  ;;  %v10549_v61 = vld [vmem:[%s13354_s1 + $0x18] sm:$0xf] }
  0x72   : > { %9050 = vmatmul.mubr.msk.f32.gmra.mxu1 %vm276_vm1, %v10532_v16  ;;  %9054 = vmatprep.mubr.msk.f32.mxu0 %vm276_vm1, %v1113_v18  ;;  %v10554_v18 = vld [vmem:[%s13354_s1 + $0x1c] sm:$0xf] }
  0x73   : > { %9104 = vmatprep.mubr.msk.f32.mxu1 %vm276_vm1, %v10266_v31  ;;  %v10564_v31 = vld [vmem:[#allocation2 + $0x32] sm:$0xff] }
  0x75   : > { %9055 = vmatmul.mubr.msk.f32.vlgmr.msra.gmra.mxu0 %vm276_vm1, %v1114_v3  ;;  %v10560_v3 = vld [vmem:[#allocation2 + $0x22] sm:$0xff] }
  0x76   : > { %9105 = vmatmul.mubr.msk.f32.vlgmr.msra.gmra.mxu1 %vm276_vm1, %v10277_v33  ;;  %9153 = vmatpush3.msk.msra.mxu0 %vm560_vm0, %v10225_v11  ;;  %v10578_v11 = vld [vmem:[#allocation2 + $0x3a] sm:$0xff]  ;;  %v10582_v33 = vld [vmem:[#allocation2 + $0x4a] sm:$0xff] }
  0x77   : > { %9057 = vmatprep.mubr.msk.f32.mxu0 %vm276_vm1, %v10541_v58  ;;  %9107 = vmatprep.mubr.msk.f32.mxu1 %vm276_vm1, %v10281_v35  ;;  %v10728_v35 = vld [vmem:[#allocation2 + $0x180] sm:$0xff] }
  0x78   : > { %9203 = vmatpush3.msk.msra.mxu1 %vm560_vm0, %v10439_v17  ;;  %9252 = vmatprep.subr.msk.mxu0 %vm560_vm0, %v10549_v61  ;;  %v10590_v17 = vld [vmem:[#allocation2 + $0x52] sm:$0xff]  ;;  %13460 = vst [vmem:[#allocation35_spill] sm:$0xff] %v10728_v35 }
  0x79   : > { %9302 = vmatprep.subr.msk.mxu1 %vm560_vm0, %v10554_v18  ;;  %9058 = vmatmul.mubr.msk.f32.gmra.mxu0 %vm276_vm1, %v10560_v3 }
  0x7a   : > { %9108 = vmatmul.mubr.msk.f32.gmra.mxu1 %vm276_vm1, %v10293_v37  ;;  %9060 = vmatprep.mubr.msk.f32.mxu0 %vm276_vm1, %v10564_v31  ;;  %v10594_v37 = vld [vmem:[#allocation2 + $0x62] sm:$0xff] }
  0x7b   : > { %9110 = vmatprep.mubr.msk.f32.mxu1 %vm276_vm1, %v10297_v39  ;;  %v10606_v39 = vld [vmem:[#allocation2 + $0x7a] sm:$0xff] }
  0x7d   : > { %9061 = vmatmul.mubr.msk.f32.gmra.mxu0 %vm276_vm1, %v10578_v11 }
  0x7e   : > { %9111 = vmatmul.mubr.msk.f32.gmra.mxu1 %vm276_vm1, %v10309_v41  ;;  %9063 = vmatprep.mubr.msk.f32.mxu0 %vm276_vm1, %v10582_v33  ;;  %v10602_v41 = vld [vmem:[#allocation2 + $0x6a] sm:$0xff] }
  0x7f   : > { %9113 = vmatprep.mubr.msk.f32.mxu1 %vm276_vm1, %v10313_v43  ;;  %v10618_v43 = vld [vmem:[#allocation2 + $0x92] sm:$0xff] }
  0x81   : > { %9064 = vmatmul.mubr.msk.f32.gmra.mxu0 %vm276_vm1, %v10590_v17 }
  0x82   : > { %9114 = vmatmul.mubr.msk.f32.gmra.mxu1 %vm276_vm1, %v10325_v45  ;;  %9066 = vmatprep.mubr.msk.f32.mxu0 %vm276_vm1, %v10594_v37  ;;  %v10614_v45 = vld [vmem:[#allocation2 + $0x82] sm:$0xff] }
  0x83   : > { %9116 = vmatprep.mubr.msk.f32.mxu1 %vm276_vm1, %v10329_v47  ;;  %v10630_v47 = vld [vmem:[#allocation2 + $0xaa] sm:$0xff] }
  0x85   : > { %9067 = vmatmul.mubr.msk.f32.gmra.mxu0 %vm276_vm1, %v10602_v41 }
  0x86   : > { %9117 = vmatmul.mubr.msk.f32.gmra.mxu1 %vm276_vm1, %v10333_v49  ;;  %9069 = vmatprep.mubr.msk.f32.mxu0 %vm276_vm1, %v10606_v39  ;;  %v10626_v49 = vld [vmem:[#allocation2 + $0x9a] sm:$0xff] }
  0x87   : > { %9119 = vmatprep.mubr.msk.f32.mxu1 %vm276_vm1, %v10358_v59  ;;  %v10642_v59 = vld [vmem:[#allocation2 + $0xc2] sm:$0xff] }
  0x89   : > { %9070 = vmatmul.mubr.msk.f32.gmra.mxu0 %vm276_vm1, %v10614_v45 }
  0x8a   : > { %9120 = vmatmul.mubr.msk.f32.gmra.mxu1 %vm276_vm1, %v10377_v63  ;;  %9072 = vmatprep.mubr.msk.f32.mxu0 %vm276_vm1, %v10618_v43  ;;  %v10638_v63 = vld [vmem:[#allocation2 + $0xb2] sm:$0xff] }
  0x8b   : > { %9122 = vmatprep.mubr.msk.f32.mxu1 %vm276_vm1, %v10381_v1  ;;  %v10654_v1 = vld [vmem:[#allocation2 + $0xda] sm:$0xff] }
  0x8d   : > { %9073 = vmatmul.mubr.msk.f32.gmra.mxu0 %vm276_vm1, %v10626_v49 }
  0x8e   : > { %9123 = vmatmul.mubr.msk.f32.gmra.mxu1 %vm276_vm1, %v10393_v4  ;;  %9075 = vmatprep.mubr.msk.f32.mxu0 %vm276_vm1, %v10630_v47  ;;  %v10650_v4 = vld [vmem:[#allocation2 + $0xca] sm:$0xff] }
  0x8f   : > { %9125 = vmatprep.mubr.msk.f32.mxu1 %vm276_vm1, %v10397_v6  ;;  %v10666_v6 = vld [vmem:[#allocation2 + $0xf2] sm:$0xff] }
  0x91   : > { %9076 = vmatmul.mubr.msk.f32.gmra.mxu0 %vm276_vm1, %v10638_v63 }
  0x92   : > { %9126 = vmatmul.mubr.msk.f32.gmra.mxu1 %vm276_vm1, %v10409_v8  ;;  %9078 = vmatprep.mubr.msk.f32.mxu0 %vm276_vm1, %v10642_v59  ;;  %v10662_v8 = vld [vmem:[#allocation2 + $0xe2] sm:$0xff] }
  0x93   : > { %9128 = vmatprep.mubr.msk.f32.mxu1 %vm276_vm1, %v10413_v10  ;;  %v10678_v10 = vld [vmem:[#allocation2 + $0x10a] sm:$0xff] }
  0x95   : > { %9079 = vmatmul.mubr.msk.f32.gmra.mxu0 %vm276_vm1, %v10650_v4 }
  0x96   : > { %9129 = vmatmul.mubr.msk.f32.gmra.mxu1 %vm276_vm1, %v10425_v13  ;;  %9081 = vmatprep.mubr.msk.f32.mxu0 %vm276_vm1, %v10654_v1  ;;  %v10674_v13 = vld [vmem:[#allocation2 + $0xfa] sm:$0xff] }
  0x97   : > { %9131 = vmatprep.mubr.msk.f32.mxu1 %vm276_vm1, %v10429_v15  ;;  %v10690_v15 = vld [vmem:[#allocation2 + $0x122] sm:$0xff] }
  0x99   : > { %9082 = vmatmul.mubr.msk.f32.gmra.mxu0 %vm276_vm1, %v10662_v8 }
  0x9a   : > { %9132 = vmatmul.mubr.msk.f32.gmra.mxu1 %vm276_vm1, %v10448_v20  ;;  %9084 = vmatprep.mubr.msk.f32.mxu0 %vm276_vm1, %v10666_v6  ;;  %v10686_v20 = vld [vmem:[#allocation2 + $0x112] sm:$0xff] }
  0x9b   : > { %9134 = vmatprep.mubr.msk.f32.mxu1 %vm276_vm1, %v10454_v22  ;;  %v10702_v22 = vld [vmem:[#allocation2 + $0x13a] sm:$0xff] }
  0x9d   : > { %9085 = vmatmul.mubr.msk.f32.gmra.mxu0 %vm276_vm1, %v10674_v13 }
  0x9e   : > { %9135 = vmatmul.mubr.msk.f32.gmra.mxu1 %vm276_vm1, %v10468_v24  ;;  %9087 = vmatprep.mubr.msk.f32.mxu0 %vm276_vm1, %v10678_v10  ;;  %v10698_v24 = vld [vmem:[#allocation2 + $0x12a] sm:$0xff] }
  0x9f   : > { %9137 = vmatprep.mubr.msk.f32.mxu1 %vm276_vm1, %v10472_v26  ;;  %v10714_v26 = vld [vmem:[#allocation2 + $0x152] sm:$0xff] }
  0xa1   : > { %9088 = vmatmul.mubr.msk.f32.gmra.mxu0 %vm276_vm1, %v10686_v20 }
  0xa2   : > { %9138 = vmatmul.mubr.msk.f32.gmra.mxu1 %vm276_vm1, %v10484_v28  ;;  %9090 = vmatprep.mubr.msk.f32.mxu0 %vm276_vm1, %v10690_v15  ;;  %v10710_v28 = vld [vmem:[#allocation2 + $0x142] sm:$0xff] }
  0xa3   : > { %9140 = vmatprep.mubr.msk.f32.mxu1 %vm276_vm1, %v10488_v50  ;;  %v10726_v50 = vld [vmem:[#allocation2 + $0x16a] sm:$0xff] }
  0xa5   : > { %9091 = vmatmul.mubr.msk.f32.gmra.mxu0 %vm276_vm1, %v10698_v24 }
  0xa6   : > { %9141 = vmatmul.mubr.msk.f32.gmra.mxu1 %vm276_vm1, %v10500_v53  ;;  %9093 = vmatprep.mubr.msk.f32.mxu0 %vm276_vm1, %v10702_v22  ;;  %v10722_v53 = vld [vmem:[#allocation2 + $0x15a] sm:$0xff] }
  0xa7   : > { %9143 = vmatprep.mubr.msk.f32.mxu1 %vm276_vm1, %v10504_v55  ;;  %v10740_v55 = vld [vmem:[#allocation2 + $0x188] sm:$0xff] }
  0xa9   : > { %9094 = vmatmul.mubr.msk.f32.gmra.mxu0 %vm276_vm1, %v10710_v28 }
  0xaa   : > { %9144 = vmatmul.mubr.msk.f32.gmra.mxu1 %vm276_vm1, %v10516_v57  ;;  %9096 = vmatprep.mubr.msk.f32.mxu0 %vm276_vm1, %v10714_v26  ;;  %v10736_v57 = vld [vmem:[#allocation2 + $0x172] sm:$0xff] }
  0xab   : > { %9146 = vmatprep.mubr.msk.f32.mxu1 %vm276_vm1, %v10520_v60 }
  0xad   : > { %9097 = vmatmul.mubr.msk.f32.gmra.mxu0 %vm276_vm1, %v10722_v53 }
  0xae   : > { %9147 = vmatmul.mubr.msk.f32.gmra.mxu1 %vm276_vm1, %v10532_v16  ;;  %9099 = vmatprep.mubr.msk.f32.mxu0 %vm276_vm1, %v10726_v50 }
  0xaf   : > { %9149 = vmatprep.mubr.msk.f32.mxu1 %vm276_vm1, %v10728_v35  ;;  %v10757_v35 = vld [vmem:[%s13354_s1 + $0x20] sm:$0xf] }
  0xb1   : > { %9100 = vmatmul.mubr.msk.f32.gmra.mxu0 %vm276_vm1, %v10736_v57 }
  0xb2   : > { %9150 = vmatmul.mubr.msk.f32.gmra.mxu1 %vm276_vm1, %v10740_v55  ;;  %9154 = vmatprep.mubr.msk.f32.mxu0 %vm276_vm1, %v10264_v30  ;;  %v13461_v30 = vld [vmem:[#allocation33_spill] sm:$0xff] }
  0xb3   : > { %9204 = vmatprep.mubr.msk.f32.mxu1 %vm276_vm1, %v10541_v58 }
  0xb5   : > { %9155 = vmatmul.mubr.msk.f32.vlgmr.msra.gmra.mxu0 %vm276_vm1, %v10268_v32  ;;  %v10873_v32 = vld [vmem:[#allocation2 + $0x181] sm:$0xff] }
  0xb6   : > { %9205 = vmatmul.mubr.msk.f32.vlgmr.msra.gmra.mxu1 %vm276_vm1, %v10560_v3  ;;  %9253 = vmatpush3.msk.msra.mxu0 %vm560_vm0, %v10549_v61  ;;  %v13465_v61 = vld [vmem:[#allocation9_spill] sm:$0xff]  ;;  %v13466_v3 = vld [vmem:[#allocation10_spill] sm:$0xff] }
  0xb7   : > { %9157 = vmatprep.mubr.msk.f32.mxu0 %vm276_vm1, %v10279_v34  ;;  %9207 = vmatprep.mubr.msk.f32.mxu1 %vm276_vm1, %v10564_v31 }
  0xb8   : > { %9303 = vmatpush3.msk.msra.mxu1 %vm560_vm0, %v10554_v18  ;;  %9352 = vmatprep.subr.msk.mxu0 %vm560_vm0, %v10757_v35 }
  0xb9   : > { %9158 = vmatmul.mubr.msk.f32.gmra.mxu0 %vm276_vm1, %v10291_v36 }
  0xba   : > { %9208 = vmatmul.mubr.msk.f32.gmra.mxu1 %vm276_vm1, %v10578_v11  ;;  %9160 = vmatprep.mubr.msk.f32.mxu0 %vm276_vm1, %v10295_v38 }
  0xbb   : > { %9210 = vmatprep.mubr.msk.f32.mxu1 %vm276_vm1, %v10582_v33 }
  0xbd   : > { %9161 = vmatmul.mubr.msk.f32.gmra.mxu0 %vm276_vm1, %v10307_v40 }
  0xbe   : > { %9211 = vmatmul.mubr.msk.f32.gmra.mxu1 %vm276_vm1, %v10590_v17  ;;  %9163 = vmatprep.mubr.msk.f32.mxu0 %vm276_vm1, %v10311_v42 }
  0xbf   : > { %9213 = vmatprep.mubr.msk.f32.mxu1 %vm276_vm1, %v10594_v37 }
  0xc1   : > { %9164 = vmatmul.mubr.msk.f32.gmra.mxu0 %vm276_vm1, %v10323_v44 }
  0xc2   : > { %9214 = vmatmul.mubr.msk.f32.gmra.mxu1 %vm276_vm1, %v10602_v41  ;;  %9166 = vmatprep.mubr.msk.f32.mxu0 %vm276_vm1, %v10327_v46 }
  0xc3   : > { %9216 = vmatprep.mubr.msk.f32.mxu1 %vm276_vm1, %v10606_v39 }
  0xc5   : > { %9167 = vmatmul.mubr.msk.f32.gmra.mxu0 %vm276_vm1, %v10331_v48 }
  0xc6   : > { %9217 = vmatmul.mubr.msk.f32.gmra.mxu1 %vm276_vm1, %v10614_v45  ;;  %9169 = vmatprep.mubr.msk.f32.mxu0 %vm276_vm1, %v10341_v52 }
  0xc7   : > { %9219 = vmatprep.mubr.msk.f32.mxu1 %vm276_vm1, %v10618_v43 }
  0xc9   : > { %9170 = vmatmul.mubr.msk.f32.gmra.mxu0 %vm276_vm1, %v10375_v62 }
  0xca   : > { %9220 = vmatmul.mubr.msk.f32.gmra.mxu1 %vm276_vm1, %v10626_v49  ;;  %9172 = vmatprep.mubr.msk.f32.mxu0 %vm276_vm1, %v10379_v0 }
  0xcb   : > { %9222 = vmatprep.mubr.msk.f32.mxu1 %vm276_vm1, %v10630_v47 }
  0xcd   : > { %9173 = vmatmul.mubr.msk.f32.gmra.mxu0 %vm276_vm1, %v10391_v2 }
  0xce   : > { %9223 = vmatmul.mubr.msk.f32.gmra.mxu1 %vm276_vm1, %v10638_v63  ;;  %9175 = vmatprep.mubr.msk.f32.mxu0 %vm276_vm1, %v10395_v5 }
  0xcf   : > { %9225 = vmatprep.mubr.msk.f32.mxu1 %vm276_vm1, %v10642_v59 }
  0xd1   : > { %9176 = vmatmul.mubr.msk.f32.gmra.mxu0 %vm276_vm1, %v10407_v7 }
  0xd2   : > { %9226 = vmatmul.mubr.msk.f32.gmra.mxu1 %vm276_vm1, %v10650_v4  ;;  %9178 = vmatprep.mubr.msk.f32.mxu0 %vm276_vm1, %v10411_v9 }
  0xd3   : > { %9228 = vmatprep.mubr.msk.f32.mxu1 %vm276_vm1, %v10654_v1 }
  0xd5   : > { %9179 = vmatmul.mubr.msk.f32.gmra.mxu0 %vm276_vm1, %v10423_v12 }
  0xd6   : > { %9229 = vmatmul.mubr.msk.f32.gmra.mxu1 %vm276_vm1, %v10662_v8  ;;  %9181 = vmatprep.mubr.msk.f32.mxu0 %vm276_vm1, %v10427_v14 }
  0xd7   : > { %9231 = vmatprep.mubr.msk.f32.mxu1 %vm276_vm1, %v10666_v6 }
  0xd9   : > { %9182 = vmatmul.mubr.msk.f32.gmra.mxu0 %vm276_vm1, %v10446_v19 }
  0xda   : > { %9232 = vmatmul.mubr.msk.f32.gmra.mxu1 %vm276_vm1, %v10674_v13  ;;  %9184 = vmatprep.mubr.msk.f32.mxu0 %vm276_vm1, %v10452_v21  ;;  %v13462_v13 = vld [vmem:[#allocation34_spill] sm:$0xff] }
  0xdb   : > { %9234 = vmatprep.mubr.msk.f32.mxu1 %vm276_vm1, %v10678_v10  ;;  %v10875_v10 = vld [vmem:[#allocation2 + $0x182] sm:$0xff] }
  0xdd   : > { %9185 = vmatmul.mubr.msk.f32.gmra.mxu0 %vm276_vm1, %v10466_v23 }
  0xde   : > { %9235 = vmatmul.mubr.msk.f32.gmra.mxu1 %vm276_vm1, %v10686_v20  ;;  %9187 = vmatprep.mubr.msk.f32.mxu0 %vm276_vm1, %v10470_v25  ;;  %v10887_v20 = vld [vmem:[#allocation2 + $0x18a] sm:$0xff] }
  0xdf   : > { %9237 = vmatprep.mubr.msk.f32.mxu1 %vm276_vm1, %v10690_v15  ;;  %v10883_v15 = vld [vmem:[#allocation2 + $0x189] sm:$0xff] }
  0xe1   : > { %9188 = vmatmul.mubr.msk.f32.gmra.mxu0 %vm276_vm1, %v10482_v27 }
  0xe2   : > { %9238 = vmatmul.mubr.msk.f32.gmra.mxu1 %vm276_vm1, %v10698_v24  ;;  %9190 = vmatprep.mubr.msk.f32.mxu0 %vm276_vm1, %v10486_v29 }
  0xe3   : > { %9240 = vmatprep.mubr.msk.f32.mxu1 %vm276_vm1, %v10702_v22  ;;  %v13463_v22 = vld [vmem:[#allocation7_spill] sm:$0xff] }
  0xe5   : > { %9191 = vmatmul.mubr.msk.f32.gmra.mxu0 %vm276_vm1, %v10498_v51 }
  0xe6   : > { %9241 = vmatmul.mubr.msk.f32.gmra.mxu1 %vm276_vm1, %v10710_v28  ;;  %9193 = vmatprep.mubr.msk.f32.mxu0 %vm276_vm1, %v10502_v54 }
  0xe7   : > { %9243 = vmatprep.mubr.msk.f32.mxu1 %vm276_vm1, %v10714_v26  ;;  %v9006_v26 = vpop.f32.mrf.mxu1 }
  0xe9   : > { %9194 = vmatmul.mubr.msk.f32.gmra.mxu0 %vm276_vm1, %v10514_v56 }
  0xea   : > { %9244 = vmatmul.mubr.msk.f32.gmra.mxu1 %vm276_vm1, %v10722_v53  ;;  %9196 = vmatprep.mubr.msk.f32.mxu0 %vm276_vm1, %v13461_v30  ;;  %v954_v53 = vpop.f32.mrf.mxu1 }
  0xeb   : > { %9246 = vmatprep.mubr.msk.f32.mxu1 %vm276_vm1, %v10726_v50 }
  0xed   : > { %9197 = vmatmul.mubr.msk.f32.gmra.mxu0 %vm276_vm1, %v13462_v13 }
  0xee   : > { %9247 = vmatmul.mubr.msk.f32.gmra.mxu1 %vm276_vm1, %v10736_v57  ;;  %9199 = vmatprep.mubr.msk.f32.mxu0 %vm276_vm1, %v10873_v32  ;;  %v13464_v57 = vld [vmem:[#allocation8_spill] sm:$0xff] }
  0xef   : > { %9249 = vmatprep.mubr.msk.f32.mxu1 %vm276_vm1, %v10875_v10  ;;  %v8956_v24 = vpop.f32.mrf.mxu0 }
  0xf0   : > { %v10897_v28 = vadd.f32 %v9006_v26, %v8956_v24 }
  0xf1   : > { %9200 = vmatmul.mubr.msk.f32.gmra.mxu0 %vm276_vm1, %v10883_v15  ;;  %v630_v50 = vpop.f32.mrf.mxu0 }
  0xf2   : > { %9250 = vmatmul.mubr.msk.f32.gmra.mxu1 %vm276_vm1, %v10887_v20  ;;  %9254 = vmatprep.mubr.msk.f32.mxu0 %vm276_vm1, %v13463_v22  ;;  %v10903_v58 = vadd.f32 %v954_v53, %v630_v50  ;;  %v13467_v22 = vld [vmem:[#allocation11_spill] sm:$0xff]  ;;  %v13468_v53 = vld [vmem:[#allocation12_spill] sm:$0xff] }
  0xf3   : > { %9304 = vmatprep.mubr.msk.f32.mxu1 %vm276_vm1, %v10279_v34 }
  0xf5   : > { %9255 = vmatmul.mubr.msk.f32.vlgmr.msra.gmra.mxu0 %vm276_vm1, %v13464_v57  ;;  %v13469_v57 = vld [vmem:[#allocation13_spill] sm:$0xff] }
  0xf6   : > { %9305 = vmatmul.mubr.msk.f32.vlgmr.msra.gmra.mxu1 %vm276_vm1, %v10291_v36  ;;  %9353 = vmatpush3.msk.msra.mxu0 %vm560_vm0, %v10757_v35 }
  0xf7   : > { %9257 = vmatprep.mubr.msk.f32.mxu0 %vm276_vm1, %v13465_v61  ;;  %9307 = vmatprep.mubr.msk.f32.mxu1 %vm276_vm1, %v10295_v38 }
  0xf9   : > { %v8959_v34 = vpop.f32.mrf.mxu0  ;;  %9258 = vmatmul.mubr.msk.f32.gmra.mxu0 %vm276_vm1, %v13466_v3 }
  0xfa   : > { %v9009_v18 = vpop.f32.mrf.mxu1  ;;  %9308 = vmatmul.mubr.msk.f32.gmra.mxu1 %vm276_vm1, %v10307_v40  ;;  %9260 = vmatprep.mubr.msk.f32.mxu0 %vm276_vm1, %v13467_v22  ;;  %v13470_v22 = vld [vmem:[#allocation14_spill] sm:$0xff] }
  0xfb   : > { %v10915_v36 = vadd.f32 %v9009_v18, %v8959_v34  ;;  %9310 = vmatprep.mubr.msk.f32.mxu1 %vm276_vm1, %v10311_v42  ;;  %v640_v35 = vpop.f32.mrf.mxu0 }
  0xfc   : > { %v964_v24 = vpop.f32.mrf.mxu1 }
  0xfd   : > { %v10921_v26 = vadd.f32 %v964_v24, %v640_v35  ;;  %v8962_v38 = vpop.f32.mrf.mxu0  ;;  %9261 = vmatmul.mubr.msk.f32.gmra.mxu0 %vm276_vm1, %v13468_v53  ;;  %v13471_v35 = vld [vmem:[#allocation15_spill] sm:$0xff] }
  0xfe   : > { %v9012_v50 = vpop.f32.mrf.mxu1  ;;  %9311 = vmatmul.mubr.msk.f32.gmra.mxu1 %vm276_vm1, %v10323_v44  ;;  %9263 = vmatprep.mubr.msk.f32.mxu0 %vm276_vm1, %v13469_v57  ;;  %v13472_v57 = vld [vmem:[#allocation16_spill] sm:$0xff] }
  0xff   : > { %v10927_v40 = vadd.f32 %v9012_v50, %v8962_v38  ;;  %9313 = vmatprep.mubr.msk.f32.mxu1 %vm276_vm1, %v10327_v46  ;;  %v650_v42 = vpop.f32.mrf.mxu0 }
 0x100   : > { %v974_v61 = vpop.f32.mrf.mxu1 }
 0x101   : > { %v10933_v34 = vadd.f32 %v974_v61, %v650_v42  ;;  %v8965_v18 = vpop.f32.mrf.mxu0  ;;  %9264 = vmatmul.mubr.msk.f32.gmra.mxu0 %vm276_vm1, %v13470_v22  ;;  %v13473_v42 = vld [vmem:[#allocation17_spill] sm:$0xff] }
 0x102   : > { %v9015_v3 = vpop.f32.mrf.mxu1  ;;  %9314 = vmatmul.mubr.msk.f32.gmra.mxu1 %vm276_vm1, %v10331_v48  ;;  %9266 = vmatprep.mubr.msk.f32.mxu0 %vm276_vm1, %v13471_v35  ;;  %v13474_v35 = vld [vmem:[#allocation18_spill] sm:$0xff] }
 0x103   : > { %v10939_v44 = vadd.f32 %v9015_v3, %v8965_v18  ;;  %9316 = vmatprep.mubr.msk.f32.mxu1 %vm276_vm1, %v10341_v52  ;;  %v660_v46 = vpop.f32.mrf.mxu0 }
 0x104   : > { %v984_v24 = vpop.f32.mrf.mxu1 }
 0x105   : > { %v10945_v38 = vadd.f32 %v984_v24, %v660_v46  ;;  %v8968_v50 = vpop.f32.mrf.mxu0  ;;  %9267 = vmatmul.mubr.msk.f32.gmra.mxu0 %vm276_vm1, %v13472_v57  ;;  %v13475_v46 = vld [vmem:[#allocation19_spill] sm:$0xff] }
 0x106   : > { %v9018_v53 = vpop.f32.mrf.mxu1  ;;  %9317 = vmatmul.mubr.msk.f32.gmra.mxu1 %vm276_vm1, %v10375_v62  ;;  %9269 = vmatprep.mubr.msk.f32.mxu0 %vm276_vm1, %v13473_v42  ;;  %v13476_v42 = vld [vmem:[#allocation20_spill] sm:$0xff] }
 0x107   : > { %v10951_v48 = vadd.f32 %v9018_v53, %v8968_v50  ;;  %9319 = vmatprep.mubr.msk.f32.mxu1 %vm276_vm1, %v10379_v0  ;;  %v670_v52 = vpop.f32.mrf.mxu0 }
 0x108   : > { %v994_v61 = vpop.f32.mrf.mxu1 }
 0x109   : > { %v10957_v18 = vadd.f32 %v994_v61, %v670_v52  ;;  %v8971_v3 = vpop.f32.mrf.mxu0  ;;  %9270 = vmatmul.mubr.msk.f32.gmra.mxu0 %vm276_vm1, %v13474_v35  ;;  %v13477_v52 = vld [vmem:[#allocation21_spill] sm:$0xff] }
 0x10a   : > { %v9021_v22 = vpop.f32.mrf.mxu1  ;;  %9320 = vmatmul.mubr.msk.f32.gmra.mxu1 %vm276_vm1, %v10391_v2  ;;  %9272 = vmatprep.mubr.msk.f32.mxu0 %vm276_vm1, %v13475_v46  ;;  %v13478_v46 = vld [vmem:[#allocation22_spill] sm:$0xff] }
 0x10b   : > { %v10963_v62 = vadd.f32 %v9021_v22, %v8971_v3  ;;  %9322 = vmatprep.mubr.msk.f32.mxu1 %vm276_vm1, %v10395_v5  ;;  %v680_v0 = vpop.f32.mrf.mxu0 }
 0x10c   : > { %v1004_v24 = vpop.f32.mrf.mxu1 }
 0x10d   : > { %v10969_v50 = vadd.f32 %v1004_v24, %v680_v0  ;;  %v8974_v53 = vpop.f32.mrf.mxu0  ;;  %9273 = vmatmul.mubr.msk.f32.gmra.mxu0 %vm276_vm1, %v13476_v42  ;;  %v13479_v0 = vld [vmem:[#allocation23_spill] sm:$0xff] }
 0x10e   : > { %v9024_v57 = vpop.f32.mrf.mxu1  ;;  %9323 = vmatmul.mubr.msk.f32.gmra.mxu1 %vm276_vm1, %v10407_v7  ;;  %9275 = vmatprep.mubr.msk.f32.mxu0 %vm276_vm1, %v13477_v52  ;;  %v13480_v52 = vld [vmem:[#allocation24_spill] sm:$0xff] }
 0x10f   : > { %v10975_v2 = vadd.f32 %v9024_v57, %v8974_v53  ;;  %9325 = vmatprep.mubr.msk.f32.mxu1 %vm276_vm1, %v10411_v9  ;;  %v690_v5 = vpop.f32.mrf.mxu0 }
 0x110   : > { %v1014_v61 = vpop.f32.mrf.mxu1 }
 0x111   : > { %v10981_v3 = vadd.f32 %v1014_v61, %v690_v5  ;;  %v8977_v22 = vpop.f32.mrf.mxu0  ;;  %9276 = vmatmul.mubr.msk.f32.gmra.mxu0 %vm276_vm1, %v13478_v46  ;;  %v13481_v5 = vld [vmem:[#allocation25_spill] sm:$0xff]  ;;  %v13482_v46 = vld [vmem:[#allocation26_spill] sm:$0xff] }
 0x112   : > { %v9027_v35 = vpop.f32.mrf.mxu1  ;;  %9326 = vmatmul.mubr.msk.f32.gmra.mxu1 %vm276_vm1, %v10423_v12  ;;  %9278 = vmatprep.mubr.msk.f32.mxu0 %vm276_vm1, %v13479_v0  ;;  %v13483_v0 = vld [vmem:[#allocation27_spill] sm:$0xff] }
 0x113   : > { %v10987_v7 = vadd.f32 %v9027_v35, %v8977_v22  ;;  %9328 = vmatprep.mubr.msk.f32.mxu1 %vm276_vm1, %v10427_v14  ;;  %v700_v9 = vpop.f32.mrf.mxu0 }
 0x114   : > { %v1024_v24 = vpop.f32.mrf.mxu1 }
 0x115   : > { %v10993_v53 = vadd.f32 %v1024_v24, %v700_v9  ;;  %v8980_v57 = vpop.f32.mrf.mxu0  ;;  %9279 = vmatmul.mubr.msk.f32.gmra.mxu0 %vm276_vm1, %v13480_v52  ;;  %v13485_v52 = vld [vmem:[#allocation29_spill] sm:$0xff] }
 0x116   : > { %v9030_v42 = vpop.f32.mrf.mxu1  ;;  %9329 = vmatmul.mubr.msk.f32.gmra.mxu1 %vm276_vm1, %v10446_v19  ;;  %9281 = vmatprep.mubr.msk.f32.mxu0 %vm276_vm1, %v13481_v5 }
 0x117   : > { %v10999_v12 = vadd.f32 %v9030_v42, %v8980_v57  ;;  %9331 = vmatprep.mubr.msk.f32.mxu1 %vm276_vm1, %v10452_v21  ;;  %v11005_v14 = vpop.f32.mrf.mxu0  ;;  %v13484_v42 = vld [vmem:[#allocation28_spill] sm:$0xff] }
 0x118   : > { %v11007_v61 = vpop.f32.mrf.mxu1 }
 0x119   : > { %v8983_v22 = vpop.f32.mrf.mxu0  ;;  %9282 = vmatmul.mubr.msk.f32.gmra.mxu0 %vm276_vm1, %v13482_v46  ;;  %v13486_v46 = vld [vmem:[#allocation30_spill] sm:$0xff] }
 0x11a   : > { %v9033_v35 = vpop.f32.mrf.mxu1  ;;  %9332 = vmatmul.mubr.msk.f32.gmra.mxu1 %vm276_vm1, %v10466_v23  ;;  %9284 = vmatprep.mubr.msk.f32.mxu0 %vm276_vm1, %v13483_v0  ;;  %v13487_v0 = vld [vmem:[#allocation31_spill] sm:$0xff] }
 0x11b   : > { %v11013_v19 = vadd.f32 %v9033_v35, %v8983_v22  ;;  %9334 = vmatprep.mubr.msk.f32.mxu1 %vm276_vm1, %v10470_v25  ;;  %v11019_v21 = vpop.f32.mrf.mxu0 }
 0x11c   : > { %v11021_v9 = vpop.f32.mrf.mxu1 }
 0x11d   : > { %v8986_v24 = vpop.f32.mrf.mxu0  ;;  %9285 = vmatmul.mubr.msk.f32.gmra.mxu0 %vm276_vm1, %v13484_v42 }
 0x11e   : > { %v9036_v57 = vpop.f32.mrf.mxu1  ;;  %9335 = vmatmul.mubr.msk.f32.gmra.mxu1 %vm276_vm1, %v10482_v27  ;;  %9287 = vmatprep.mubr.msk.f32.mxu0 %vm276_vm1, %v13485_v52  ;;  %v13488_v52 = vld [vmem:[#allocation32_spill] sm:$0xff] }
 0x11f   : > { %v11027_v23 = vadd.f32 %v9036_v57, %v8986_v24  ;;  %9337 = vmatprep.mubr.msk.f32.mxu1 %vm276_vm1, %v10486_v29  ;;  %v11033_v25 = vpop.f32.mrf.mxu0 }
 0x120   : > { %v11035_v5 = vpop.f32.mrf.mxu1 }
 0x121   : > { %v8989_v22 = vpop.f32.mrf.mxu0  ;;  %9288 = vmatmul.mubr.msk.f32.gmra.mxu0 %vm276_vm1, %v13486_v46 }
 0x122   : > { %v9039_v35 = vpop.f32.mrf.mxu1  ;;  %9338 = vmatmul.mubr.msk.f32.gmra.mxu1 %vm276_vm1, %v10498_v51  ;;  %9290 = vmatprep.mubr.msk.f32.mxu0 %vm276_vm1, %v13487_v0  ;;  %v13490_v0 = vld [vmem:[#allocation35_spill] sm:$0xff] }
 0x123   : > { %v11041_v27 = vadd.f32 %v9039_v35, %v8989_v22  ;;  %9340 = vmatprep.mubr.msk.f32.mxu1 %vm276_vm1, %v10502_v54  ;;  %v11047_v29 = vpop.f32.mrf.mxu0 }
 0x124   : > { %v11049_v24 = vpop.f32.mrf.mxu1 }
 0x125   : > { %v8992_v57 = vpop.f32.mrf.mxu0  ;;  %9291 = vmatmul.mubr.msk.f32.gmra.mxu0 %vm276_vm1, %v13488_v52 }
 0x126   : > { %v9042_v42 = vpop.f32.mrf.mxu1  ;;  %9341 = vmatmul.mubr.msk.f32.gmra.mxu1 %vm276_vm1, %v10514_v56  ;;  %9293 = vmatprep.mubr.msk.f32.mxu0 %vm276_vm1, %v10520_v60 }
 0x127   : > { %v11055_v51 = vadd.f32 %v9042_v42, %v8992_v57  ;;  %9343 = vmatprep.mubr.msk.f32.mxu1 %vm276_vm1, %v13461_v30  ;;  %v11061_v54 = vpop.f32.mrf.mxu0  ;;  %v2704_v57 = vld [vmem:[#allocation2 + $0x198] sm:$0xff] }
 0x128   : > { %v11063_v22 = vpop.f32.mrf.mxu1  ;;  %v3094_v42 = vld [vmem:[#allocation2 + $0x199] sm:$0xff] }
 0x129   : > { %13489 = vst [vmem:[#allocation33_spill] sm:$0xff] %v11063_v22  ;;  %v8995_v35 = vpop.f32.mrf.mxu0  ;;  %9294 = vmatmul.mubr.msk.f32.gmra.mxu0 %vm276_vm1, %v10532_v16 }
 0x12a   : > { %v9045_v46 = vpop.f32.mrf.mxu1  ;;  %9344 = vmatmul.mubr.msk.f32.gmra.mxu1 %vm276_vm1, %v13462_v13  ;;  %9296 = vmatprep.mubr.msk.f32.mxu0 %vm276_vm1, %v13490_v0  ;;  %v2705_v13 = vld [vmem:[#allocation2 + $0x1a0] sm:$0xff] }
 0x12b   : > { %v11069_v56 = vadd.f32 %v9045_v46, %v8995_v35  ;;  %9346 = vmatprep.mubr.msk.f32.mxu1 %vm276_vm1, %v10873_v32  ;;  %v11075_v60 = vpop.f32.mrf.mxu0  ;;  %v3095_v32 = vld [vmem:[#allocation2 + $0x1a1] sm:$0xff] }
 0x12c   : > { %13491 = vst [vmem:[#allocation34_spill] sm:$0xff] %v11075_v60  ;;  %v11077_v30 = vpop.f32.mrf.mxu1 }
 0x12d   : > { %13492 = vst [vmem:[#allocation7_spill] sm:$0xff] %v11077_v30  ;;  %v8998_v52 = vpop.f32.mrf.mxu0  ;;  %9297 = vmatmul.mubr.msk.f32.gmra.mxu0 %vm276_vm1, %v10740_v55 }
 0x12e   : > { %v9048_v22 = vpop.f32.mrf.mxu1  ;;  %9347 = vmatmul.mubr.msk.f32.gmra.mxu1 %vm276_vm1, %v10883_v15  ;;  %9299 = vmatprep.mubr.msk.f32.mxu0 %vm276_vm1, %v2704_v57 }
 0x12f   : > { %v11083_v16 = vadd.f32 %v9048_v22, %v8998_v52  ;;  %9349 = vmatprep.mubr.msk.f32.mxu1 %vm276_vm1, %v3094_v42  ;;  %v11087_v35 = vpop.f32.mrf.mxu0 }
 0x130   : > { %13493 = vst [vmem:[#allocation8_spill] sm:$0xff] %v11087_v35  ;;  %v11089_v46 = vpop.f32.mrf.mxu1 }
 0x131   : > { %13494 = vst [vmem:[#allocation9_spill] sm:$0xff] %v11089_v46  ;;  %v9001_v0 = vpop.f32.mrf.mxu0  ;;  %9300 = vmatmul.mubr.msk.f32.gmra.mxu0 %vm276_vm1, %v2705_v13 }
 0x132   : > { %v9051_v30 = vpop.f32.mrf.mxu1  ;;  %9350 = vmatmul.mubr.msk.f32.gmra.mxu1 %vm276_vm1, %v3095_v32  ;;  %9354 = vmatprep.mubr.msk.f32.mxu0 %vm276_vm1, %v10564_v31 }
 0x133   : > { %v11093_v55 = vadd.f32 %v9051_v30, %v9001_v0  ;;  %v11097_v15 = vpop.f32.mrf.mxu0 }
 0x134   : > { %13495 = vst [vmem:[#allocation10_spill] sm:$0xff] %v11097_v15  ;;  %v11099_v22 = vpop.f32.mrf.mxu1 }
 0x135   : > { %13496 = vst [vmem:[#allocation11_spill] sm:$0xff] %v11099_v22  ;;  %v9056_v57 = vpop.f32.mrf.mxu0  ;;  %9355 = vmatmul.mubr.msk.f32.vlgmr.msra.gmra.mxu0 %vm276_vm1, %v10578_v11 }
 0x136   : > { %v9106_v42 = vpop.f32.mrf.mxu1  ;;  %v1472_v52 = vadd.f32 %v9056_v57, %v10897_v28  ;;  %9357 = vmatprep.mubr.msk.f32.mxu0 %vm276_vm1, %v10582_v33 }
 0x137   : > { %v1312_v13 = vpop.f32.mrf.mxu0 }
 0x138   : > { %v11106_v30 = vpop.f32.mrf.mxu1  ;;  %v11109_v32 = vadd.f32 %v1312_v13, %v10903_v58  ;;  %v11111_v31 = vadd.f32 %v9106_v42, %v1472_v52 }
 0x139   : > { %v9059_v0 = vpop.f32.mrf.mxu0  ;;  %9358 = vmatmul.mubr.msk.f32.gmra.mxu0 %vm276_vm1, %v10590_v17 }
 0x13a   : > { %v9109_v22 = vpop.f32.mrf.mxu1  ;;  %v1474_v11 = vadd.f32 %v9059_v0, %v10915_v36  ;;  %9360 = vmatprep.mubr.msk.f32.mxu0 %vm276_vm1, %v10594_v37 }
 0x13b   : > { %v1322_v28 = vpop.f32.mrf.mxu0 }
 0x13c   : > { %v11118_v33 = vpop.f32.mrf.mxu1  ;;  %v11121_v57 = vadd.f32 %v1322_v28, %v10921_v26  ;;  %v11123_v58 = vadd.f32 %v9109_v22, %v1474_v11 }
 0x13d   : > { %v9062_v42 = vpop.f32.mrf.mxu0  ;;  %9361 = vmatmul.mubr.msk.f32.gmra.mxu0 %vm276_vm1, %v10602_v41 }
 0x13e   : > { %v9112_v52 = vpop.f32.mrf.mxu1  ;;  %v1476_v17 = vadd.f32 %v9062_v42, %v10927_v40  ;;  %9363 = vmatprep.mubr.msk.f32.mxu0 %vm276_vm1, %v10606_v39  ;;  %v8035_v39 = vld [vmem:[%s13356_s3 + $0x18] sm:$0xff] }
 0x13f   : > { %v1332_v36 = vpop.f32.mrf.mxu0  ;;  %9402 = vmatprep.subr.mxu1 %v8035_v39 }
 0x140   : > { %v11130_v37 = vpop.f32.mrf.mxu1  ;;  %v11133_v13 = vadd.f32 %v1332_v36, %v10933_v34  ;;  %v11135_v26 = vadd.f32 %v9112_v52, %v1476_v17  ;;  %9403 = vmatpush3.msra.mxu1 %v8035_v39 }
 0x141   : > { %v9065_v22 = vpop.f32.mrf.mxu0  ;;  %9364 = vmatmul.mubr.msk.f32.gmra.mxu0 %vm276_vm1, %v10614_v45 }
 0x142   : > { %v9115_v0 = vpop.f32.mrf.mxu1  ;;  %v1478_v41 = vadd.f32 %v9065_v22, %v10939_v44  ;;  %9366 = vmatprep.mubr.msk.f32.mxu0 %vm276_vm1, %v10618_v43 }
 0x143   : > { %v1342_v40 = vpop.f32.mrf.mxu0 }
 0x144   : > { %v11145_v11 = vpop.f32.mrf.mxu1  ;;  %v11148_v34 = vadd.f32 %v1342_v40, %v10945_v38  ;;  %v11150_v28 = vadd.f32 %v9115_v0, %v1478_v41 }
 0x145   : > { %v9068_v45 = vpop.f32.mrf.mxu0  ;;  %9367 = vmatmul.mubr.msk.f32.gmra.mxu0 %vm276_vm1, %v10626_v49 }
 0x146   : > { %v9118_v44 = vpop.f32.mrf.mxu1  ;;  %v1480_v43 = vadd.f32 %v9068_v45, %v10951_v48  ;;  %9369 = vmatprep.mubr.msk.f32.mxu0 %vm276_vm1, %v10630_v47 }
 0x147   : > { %v1352_v42 = vpop.f32.mrf.mxu0 }
 0x148   : > { %v11157_v52 = vpop.f32.mrf.mxu1  ;;  %v11160_v17 = vadd.f32 %v1352_v42, %v10957_v18  ;;  %v11162_v38 = vadd.f32 %v9118_v44, %v1480_v43  ;;  %v3472_v42 = vld [vmem:[#allocation2 + $0x10a] sm:$0xff] }
 0x149   : > { %v9071_v36 = vpop.f32.mrf.mxu0  ;;  %9370 = vmatmul.mubr.msk.f32.gmra.mxu0 %vm276_vm1, %v10638_v63 }
 0x14a   : > { %v9121_v22 = vpop.f32.mrf.mxu1  ;;  %v1482_v49 = vadd.f32 %v9071_v36, %v10963_v62  ;;  %9372 = vmatprep.mubr.msk.f32.mxu0 %vm276_vm1, %v10642_v59 }
 0x14b   : > { %v1362_v48 = vpop.f32.mrf.mxu0 }
 0x14c   : > { %v11169_v47 = vpop.f32.mrf.mxu1  ;;  %v11172_v0 = vadd.f32 %v1362_v48, %v10969_v50  ;;  %v11174_v18 = vadd.f32 %v9121_v22, %v1482_v49 }
 0x14d   : > { %v9074_v41 = vpop.f32.mrf.mxu0  ;;  %9373 = vmatmul.mubr.msk.f32.gmra.mxu0 %vm276_vm1, %v10650_v4 }
 0x14e   : > { %v9124_v39 = vpop.f32.mrf.mxu1  ;;  %v1484_v63 = vadd.f32 %v9074_v41, %v10975_v2  ;;  %9375 = vmatprep.mubr.msk.f32.mxu0 %vm276_vm1, %v10654_v1  ;;  %v3471_v2 = vld [vmem:[#allocation2 + $0xfa] sm:$0xff] }
 0x14f   : > { %v1372_v62 = vpop.f32.mrf.mxu0 }
 0x150   : > { %v11181_v59 = vpop.f32.mrf.mxu1  ;;  %v11184_v40 = vadd.f32 %v1372_v62, %v10981_v3  ;;  %v11186_v50 = vadd.f32 %v9124_v39, %v1484_v63  ;;  %v3474_v39 = vld [vmem:[#allocation2 + $0x122] sm:$0xff] }
 0x151   : > { %13497 = vst [vmem:[#allocation12_spill] sm:$0xff] %v11181_v59  ;;  %v9077_v45 = vpop.f32.mrf.mxu0  ;;  %9376 = vmatmul.mubr.msk.f32.gmra.mxu0 %vm276_vm1, %v10662_v8 }
 0x152   : > { %13498 = vst [vmem:[#allocation13_spill] sm:$0xff] %v11184_v40  ;;  %v9127_v44 = vpop.f32.mrf.mxu1  ;;  %v1486_v4 = vadd.f32 %v9077_v45, %v10987_v7  ;;  %9378 = vmatprep.mubr.msk.f32.mxu0 %vm276_vm1, %v10666_v6  ;;  %v1035_v7 = vadd.f32 %v11007_v61, %v11005_v14  ;;  %v3473_v6 = vld [vmem:[#allocation2 + $0x112] sm:$0xff] }
 0x153   : > { %v1382_v1 = vpop.f32.mrf.mxu0 }
 0x154   : > { %v11193_v43 = vpop.f32.mrf.mxu1  ;;  %v11196_v3 = vadd.f32 %v1382_v1, %v10993_v53  ;;  %v11198_v36 = vadd.f32 %v9127_v44, %v1486_v4  ;;  %v3476_v4 = vld [vmem:[#allocation2 + $0x13a] sm:$0xff] }
 0x155   : > { %13499 = vst [vmem:[#allocation14_spill] sm:$0xff] %v11193_v43  ;;  %v9080_v22 = vpop.f32.mrf.mxu0  ;;  %9379 = vmatmul.mubr.msk.f32.gmra.mxu0 %vm276_vm1, %v3471_v2 }
 0x156   : > { %13500 = vst [vmem:[#allocation15_spill] sm:$0xff] %v11196_v3  ;;  %v9130_v8 = vpop.f32.mrf.mxu1  ;;  %v1488_v49 = vadd.f32 %v9080_v22, %v10999_v12  ;;  %9381 = vmatprep.mubr.msk.f32.mxu0 %vm276_vm1, %v3472_v42  ;;  %v3475_v12 = vld [vmem:[#allocation2 + $0x12a] sm:$0xff] }
 0x157   : > { %v1392_v48 = vpop.f32.mrf.mxu0 }
 0x158   : > { %v11205_v41 = vpop.f32.mrf.mxu1  ;;  %v11207_v53 = vadd.f32 %v1392_v48, %v1035_v7  ;;  %v11209_v63 = vadd.f32 %v9130_v8, %v1488_v49  ;;  %v3477_v8 = vld [vmem:[#allocation2 + $0x142] sm:$0xff]  ;;  %v3478_v49 = vld [vmem:[#allocation2 + $0x152] sm:$0xff] }
 0x159   : > { %13501 = vst [vmem:[#allocation16_spill] sm:$0xff] %v11205_v41  ;;  %v9083_v62 = vpop.f32.mrf.mxu0  ;;  %9382 = vmatmul.mubr.msk.f32.gmra.mxu0 %vm276_vm1, %v3473_v6 }
 0x15a   : > { %13502 = vst [vmem:[#allocation17_spill] sm:$0xff] %v11207_v53  ;;  %v9133_v45 = vpop.f32.mrf.mxu1  ;;  %v1490_v44 = vadd.f32 %v9083_v62, %v11013_v19  ;;  %9384 = vmatprep.mubr.msk.f32.mxu0 %vm276_vm1, %v3474_v39 }
 0x15b   : > { %v11214_v14 = vpop.f32.mrf.mxu0 }
 0x15c   : > { %13503 = vst [vmem:[#allocation18_spill] sm:$0xff] %v11214_v14  ;;  %v11216_v61 = vpop.f32.mrf.mxu1  ;;  %v11218_v2 = vadd.f32 %v9133_v45, %v1490_v44  ;;  %v3479_v45 = vld [vmem:[#allocation2 + $0x15a] sm:$0xff] }
 0x15d   : > { %13504 = vst [vmem:[#allocation19_spill] sm:$0xff] %v11216_v61  ;;  %v9086_v1 = vpop.f32.mrf.mxu0  ;;  %9385 = vmatmul.mubr.msk.f32.gmra.mxu0 %vm276_vm1, %v3475_v12 }
 0x15e   : > { %v9136_v42 = vpop.f32.mrf.mxu1  ;;  %v1492_v22 = vadd.f32 %v9086_v1, %v11027_v23  ;;  %9387 = vmatprep.mubr.msk.f32.mxu0 %vm276_vm1, %v3476_v4  ;;  %v8034_v23 = vld [vmem:[%s13356_s3 + $0x10] sm:$0xff] }
 0x15f   : > { %v11223_v19 = vpop.f32.mrf.mxu0  ;;  %v3480_v4 = vld [vmem:[#allocation2 + $0x16a] sm:$0xff]  ;;  %9404 = vmatprep.subr.mxu1 %v8034_v23 }
 0x160   : > { %13505 = vst [vmem:[#allocation20_spill] sm:$0xff] %v11223_v19  ;;  %v11225_v7 = vpop.f32.mrf.mxu1  ;;  %v11227_v6 = vadd.f32 %v9136_v42, %v1492_v22  ;;  %9405 = vmatpush3.msra.mxu1 %v8034_v23  ;;  %v3484_v23 = vld [vmem:[#allocation2 + $0x19a] sm:$0xff] }
 0x161   : > { %13506 = vst [vmem:[#allocation21_spill] sm:$0xff] %v11225_v7  ;;  %v9089_v48 = vpop.f32.mrf.mxu0  ;;  %9388 = vmatmul.mubr.msk.f32.gmra.mxu0 %vm276_vm1, %v3477_v8  ;;  %v3481_v8 = vld [vmem:[#allocation2 + $0x172] sm:$0xff] }
 0x162   : > { %v9139_v39 = vpop.f32.mrf.mxu1  ;;  %v1494_v62 = vadd.f32 %v9089_v48, %v11041_v27  ;;  %9390 = vmatprep.mubr.msk.f32.mxu0 %vm276_vm1, %v3478_v49 }
 0x163   : > { %v11235_v44 = vpop.f32.mrf.mxu0 }
 0x164   : > { %13507 = vst [vmem:[#allocation22_spill] sm:$0xff] %v11235_v44  ;;  %v11237_v12 = vpop.f32.mrf.mxu1  ;;  %v11239_v1 = vadd.f32 %v9139_v39, %v1494_v62 }
 0x165   : > { %13508 = vst [vmem:[#allocation23_spill] sm:$0xff] %v11237_v12  ;;  %v9092_v42 = vpop.f32.mrf.mxu0  ;;  %9391 = vmatmul.mubr.msk.f32.gmra.mxu0 %vm276_vm1, %v3479_v45 }
 0x166   : > { %v9142_v27 = vpop.f32.mrf.mxu1  ;;  %v1496_v22 = vadd.f32 %v9092_v42, %v11055_v51  ;;  %9393 = vmatprep.mubr.msk.f32.mxu0 %vm276_vm1, %v3480_v4 }
 0x167   : > { %v11244_v49 = vpop.f32.mrf.mxu0 }
 0x168   : > { %13509 = vst [vmem:[#allocation24_spill] sm:$0xff] %v11244_v49  ;;  %v11246_v48 = vpop.f32.mrf.mxu1  ;;  %v11248_v44 = vadd.f32 %v9142_v27, %v1496_v22 }
 0x169   : > { %13510 = vst [vmem:[#allocation25_spill] sm:$0xff] %v11246_v48  ;;  %v9095_v12 = vpop.f32.mrf.mxu0  ;;  %9394 = vmatmul.mubr.msk.f32.gmra.mxu0 %vm276_vm1, %v3481_v8 }
 0x16a   : > { %v9145_v39 = vpop.f32.mrf.mxu1  ;;  %v1498_v62 = vadd.f32 %v9095_v12, %v11069_v56  ;;  %9396 = vmatprep.mubr.msk.f32.mxu0 %vm276_vm1, %v10875_v10  ;;  %v3485_v56 = vld [vmem:[#allocation2 + $0x1a2] sm:$0xff] }
 0x16b   : > { %v11254_v45 = vpop.f32.mrf.mxu0 }
 0x16c   : > { %13511 = vst [vmem:[#allocation26_spill] sm:$0xff] %v11254_v45  ;;  %v11256_v51 = vpop.f32.mrf.mxu1  ;;  %v11258_v4 = vadd.f32 %v9145_v39, %v1498_v62 }
 0x16d   : > { %13512 = vst [vmem:[#allocation27_spill] sm:$0xff] %v11256_v51  ;;  %v9098_v42 = vpop.f32.mrf.mxu0  ;;  %9397 = vmatmul.mubr.msk.f32.gmra.mxu0 %vm276_vm1, %v10887_v20 }
 0x16e   : > { %v9148_v27 = vpop.f32.mrf.mxu1  ;;  %v1500_v22 = vadd.f32 %v9098_v42, %v11083_v16  ;;  %9399 = vmatprep.mubr.msk.f32.mxu0 %vm276_vm1, %v3484_v23 }
 0x16f   : > { %v11264_v12 = vpop.f32.mrf.mxu0 }
 0x170   : > { %13513 = vst [vmem:[#allocation28_spill] sm:$0xff] %v11264_v12  ;;  %v11266_v10 = vpop.f32.mrf.mxu1  ;;  %v11268_v8 = vadd.f32 %v9148_v27, %v1500_v22 }
 0x171   : > { %13514 = vst [vmem:[#allocation29_spill] sm:$0xff] %v11266_v10  ;;  %v9101_v51 = vpop.f32.mrf.mxu0  ;;  %9400 = vmatmul.mubr.msk.f32.gmra.mxu0 %vm276_vm1, %v3485_v56  ;;  %v13517_v56 = vmov 0.0  }
 0x172   : > { %v9151_v39 = vpop.f32.mrf.mxu1  ;;  %v1502_v62 = vadd.f32 %v9101_v51, %v11093_v55  ;;  %3921 = vst.msk [vmem:[#allocation3 + $0x20] sm:$0xff] %vm3915_vm3, %v13517_v56  ;;  %3916 = vst.msk [vmem:[#allocation3] sm:$0xff] %vm3915_vm3, %v13517_v56 }
 0x173   : > { %v11272_v45 = vpop.f32.mrf.mxu0  ;;  %3917 = vst.msk [vmem:[#allocation3 + $0x8] sm:$0xff] %vm3915_vm3, %v13517_v56  ;;  %3920 = vst.msk [vmem:[#allocation3 + $0x18] sm:$0xff] %vm3915_vm3, %v13517_v56 }
 0x174   : > { %13515 = vst [vmem:[#allocation30_spill] sm:$0xff] %v11272_v45  ;;  %v11274_v20 = vpop.f32.mrf.mxu1  ;;  %v11276_v16 = vadd.f32 %v9151_v39, %v1502_v62  ;;  %3923 = vst.msk [vmem:[#allocation3 + $0x30] sm:$0xff] %vm3915_vm3, %v13517_v56 }
 0x175   : > { %13516 = vst [vmem:[#allocation31_spill] sm:$0xff] %v11274_v20  ;;  %v9156_v23 = vpop.f32.mrf.mxu0  ;;  %3924 = vst.msk [vmem:[#allocation3 + $0x38] sm:$0xff] %vm3915_vm3, %v13517_v56 }
 0x176   : > { %v11278_v42 = vpop.f32.mrf.mxu1  ;;  %v11281_v12 = vadd.f32 %v9156_v23, %v11111_v31  ;;  %3926 = vst.msk [vmem:[#allocation3 + $0x48] sm:$0xff] %vm3915_vm3, %v13517_v56  ;;  %3927 = vst.msk [vmem:[#allocation3 + $0x50] sm:$0xff] %vm3915_vm3, %v13517_v56  ;;  %v4037_v23 = vld [vmem:[%s13356_s3 + $0x8] sm:$0xff] }
 0x177   : > { %v11283_v27 = vpop.f32.mrf.mxu0  ;;  %3929 = vst.msk [vmem:[#allocation3 + $0x60] sm:$0xff] %vm3915_vm3, %v13517_v56  ;;  %3930 = vst.msk [vmem:[#allocation3 + $0x68] sm:$0xff] %vm3915_vm3, %v13517_v56  ;;  %9454 = vmatprep.subr.mxu0 %v4037_v23 }
 0x178   : > { %v11285_v22 = vpop.f32.mrf.mxu1  ;;  %3932 = vst.msk [vmem:[#allocation3 + $0x78] sm:$0xff] %vm3915_vm3, %v13517_v56  ;;  %3933 = vst.msk [vmem:[#allocation3 + $0x80] sm:$0xff] %vm3915_vm3, %v13517_v56  ;;  %9455 = vmatpush3.msra.mxu0 %v4037_v23 }
 0x179   : > { %3935 = vst.msk [vmem:[#allocation3 + $0x90] sm:$0xff] %vm3915_vm3, %v13517_v56  ;;  %3936 = vst.msk [vmem:[#allocation3 + $0x98] sm:$0xff] %vm3915_vm3, %v13517_v56  ;;  %v9159_v55 = vpop.f32.mrf.mxu0  ;;  %v4004_v49 = vld [vmem:[#allocation3] sm:$0xff] }
 0x17a   : > { %3938 = vst.msk [vmem:[#allocation3 + $0xa8] sm:$0xff] %vm3915_vm3, %v13517_v56  ;;  %3939 = vst.msk [vmem:[#allocation3 + $0xb0] sm:$0xff] %vm3915_vm3, %v13517_v56  ;;  %v11359_v31 = vpop.f32.mrf.mxu1  ;;  %v11398_v51 = vadd.f32 %v9159_v55, %v11123_v58  ;;  %v4036_v58 = vld [vmem:[%s13356_s3] sm:$0xff]  ;;  %v4038_v48 = vld [vmem:[#allocation3 + $0x1] sm:$0xff]  ;;  %9458 = vmatprep.mubr.msk.f32.mxu0 %vm3915_vm3, %v4004_v49 }
 0x17b   : > { %3941 = vst.msk [vmem:[#allocation3 + $0xc0] sm:$0xff] %vm3915_vm3, %v13517_v56  ;;  %3942 = vst.msk [vmem:[#allocation3 + $0xc8] sm:$0xff] %vm3915_vm3, %v13517_v56  ;;  %v11400_v39 = vpop.f32.mrf.mxu0  ;;  %9456 = vmatprep.subr.mxu0 %v4036_v58  ;;  %9406 = vmatprep.mubr.msk.f32.mxu1 %vm3915_vm3, %v4038_v48  ;;  %v4005_v19 = vld [vmem:[#allocation3 + $0x8] sm:$0xff] }
 0x17c   : > { %3944 = vst.msk [vmem:[#allocation3 + $0xd8] sm:$0xff] %vm3915_vm3, %v13517_v56  ;;  %3945 = vst.msk [vmem:[#allocation3 + $0xe0] sm:$0xff] %vm3915_vm3, %v13517_v56  ;;  %v11402_v62 = vpop.f32.mrf.mxu1  ;;  %9457 = vmatpush3.msra.mxu0 %v4036_v58 }
 0x17d   : > { %3947 = vst.msk [vmem:[#allocation3 + $0xf0] sm:$0xff] %vm3915_vm3, %v13517_v56  ;;  %3948 = vst.msk [vmem:[#allocation3 + $0xf8] sm:$0xff] %vm3915_vm3, %v13517_v56  ;;  %v9162_v20 = vpop.f32.mrf.mxu0  ;;  %9459 = vmatmul.mubr.msk.f32.vlgmr.msra.gmra.mxu0 %vm3915_vm3, %v4005_v19 }
 0x17e   : > { %3950 = vst.msk [vmem:[#allocation3 + $0x108] sm:$0xff] %vm3915_vm3, %v13517_v56  ;;  %3951 = vst.msk [vmem:[#allocation3 + $0x110] sm:$0xff] %vm3915_vm3, %v13517_v56  ;;  %v11407_v45 = vpop.f32.mrf.mxu1  ;;  %v11410_v10 = vadd.f32 %v9162_v20, %v11135_v26 }
 0x17f   : > { %3953 = vst.msk [vmem:[#allocation3 + $0x120] sm:$0xff] %vm3915_vm3, %v13517_v56  ;;  %3954 = vst.msk [vmem:[#allocation3 + $0x128] sm:$0xff] %vm3915_vm3, %v13517_v56  ;;  %v11415_v55 = vpop.f32.mrf.mxu0 }
 0x180   : > { %3956 = vst.msk [vmem:[#allocation3 + $0x138] sm:$0xff] %vm3915_vm3, %v13517_v56  ;;  %3957 = vst.msk [vmem:[#allocation3 + $0x140] sm:$0xff] %vm3915_vm3, %v13517_v56 }
 0x181   : > { %3959 = vst.msk [vmem:[#allocation3 + $0x150] sm:$0xff] %vm3915_vm3, %v13517_v56  ;;  %3960 = vst.msk [vmem:[#allocation3 + $0x158] sm:$0xff] %vm3915_vm3, %v13517_v56  ;;  %v9165_v61 = vpop.f32.mrf.mxu0 }
 0x182   : > { %3962 = vst.msk [vmem:[#allocation3 + $0x168] sm:$0xff] %vm3915_vm3, %v13517_v56  ;;  %3963 = vst.msk [vmem:[#allocation3 + $0x170] sm:$0xff] %vm3915_vm3, %v13517_v56  ;;  %v11425_v20 = vadd.f32 %v9165_v61, %v11150_v28  ;;  %v8101_v28 = vld [vmem:[%s13356_s3 + $0x28] sm:$0xff] }
 0x183   : > { %3965 = vst.msk [vmem:[#allocation3 + $0x180] sm:$0xff] %vm3915_vm3, %v13517_v56  ;;  %3966 = vst.msk [vmem:[#allocation3 + $0x188] sm:$0xff] %vm3915_vm3, %v13517_v56  ;;  %v11428_v23 = vpop.f32.mrf.mxu0  ;;  %9506 = vmatprep.subr.mxu1 %v8101_v28 }
 0x184   : > { %3968 = vst.msk [vmem:[#allocation3 + $0x198] sm:$0xff] %vm3915_vm3, %v13517_v56  ;;  %3969 = vst.msk [vmem:[#allocation3 + $0x1a0] sm:$0xff] %vm3915_vm3, %v13517_v56 }
 0x185   : > { %3922 = vst.msk [vmem:[#allocation3 + $0x28] sm:$0x3] %vm3918_vm4, %v13517_v56  ;;  %3919 = vst.msk [vmem:[#allocation3 + $0x10] sm:$0x3] %vm3918_vm4, %v13517_v56  ;;  %v9168_v48 = vpop.f32.mrf.mxu0 }
 0x186   : > { %3925 = vst.msk [vmem:[#allocation3 + $0x40] sm:$0x3] %vm3918_vm4, %v13517_v56  ;;  %3928 = vst.msk [vmem:[#allocation3 + $0x58] sm:$0x3] %vm3918_vm4, %v13517_v56  ;;  %v11435_v41 = vadd.f32 %v9168_v48, %v11162_v38 }
 0x187   : > { %3931 = vst.msk [vmem:[#allocation3 + $0x70] sm:$0x3] %vm3918_vm4, %v13517_v56  ;;  %3934 = vst.msk [vmem:[#allocation3 + $0x88] sm:$0x3] %vm3918_vm4, %v13517_v56  ;;  %v11437_v53 = vpop.f32.mrf.mxu0 }
 0x188   : > { %3937 = vst.msk [vmem:[#allocation3 + $0xa0] sm:$0x3] %vm3918_vm4, %v13517_v56  ;;  %3940 = vst.msk [vmem:[#allocation3 + $0xb8] sm:$0x3] %vm3918_vm4, %v13517_v56 }
 0x189   : > { %3943 = vst.msk [vmem:[#allocation3 + $0xd0] sm:$0x3] %vm3918_vm4, %v13517_v56  ;;  %3946 = vst.msk [vmem:[#allocation3 + $0xe8] sm:$0x3] %vm3918_vm4, %v13517_v56  ;;  %v9171_v61 = vpop.f32.mrf.mxu0 }
 0x18a   : > { %3949 = vst.msk [vmem:[#allocation3 + $0x100] sm:$0x3] %vm3918_vm4, %v13517_v56  ;;  %3952 = vst.msk [vmem:[#allocation3 + $0x118] sm:$0x3] %vm3918_vm4, %v13517_v56 }
 0x18b   : > { %3955 = vst.msk [vmem:[#allocation3 + $0x130] sm:$0x3] %vm3918_vm4, %v13517_v56  ;;  %3958 = vst.msk [vmem:[#allocation3 + $0x148] sm:$0x3] %vm3918_vm4, %v13517_v56  ;;  %v11449_v43 = vpop.f32.mrf.mxu0 }
 0x18c   : > { %3961 = vst.msk [vmem:[#allocation3 + $0x160] sm:$0x3] %vm3918_vm4, %v13517_v56  ;;  %3964 = vst.msk [vmem:[#allocation3 + $0x178] sm:$0x3] %vm3918_vm4, %v13517_v56  ;;  %v4039_v7 = vld [vmem:[#allocation3 + $0x9] sm:$0xff] }
 0x18d   : > { %3967 = vst.msk [vmem:[#allocation3 + $0x190] sm:$0x3] %vm3918_vm4, %v13517_v56  ;;  %3970 = vst.msk [vmem:[#allocation3 + $0x1a8] sm:$0x3] %vm3918_vm4, %v13517_v56  ;;  %v11417_v56 = vpop.f32.mrf.mxu1  ;;  %9407 = vmatmul.mubr.msk.f32.vlgmr.msra.gmra.mxu1 %vm3915_vm3, %v4039_v7  ;;  %v11447_v7 = vadd.f32 %v9171_v61, %v11174_v18  ;;  %v9174_v48 = vpop.f32.mrf.mxu0 }
 0x18e   : > { %9507 = vmatpush3.msra.mxu1 %v8101_v28  ;;  %13520 = vst [vmem:[#allocation36_spill] sm:$0xff] %v11449_v43  ;;  %v11456_v15 = vadd.f32 %v9174_v48, %v11186_v50 }
 0x18f   : > { %v11420_v26 = vpop.f32.mrf.mxu1  ;;  %13519 = vst [vmem:[#allocation35_spill] sm:$0xff] %v11447_v7  ;;  %v11458_v46 = vpop.f32.mrf.mxu0 }
 0x190   : > { %13523 = vst [vmem:[#allocation39_spill] sm:$0xff] %v11456_v15  ;;  %13524 = vst [vmem:[#allocation40_spill] sm:$0xff] %v11458_v46 }
 0x191   : > { %v11430_v14 = vpop.f32.mrf.mxu1 }
 0x193   : > { %v11432_v58 = vpop.f32.mrf.mxu1 }
 0x195   : > { %v11439_v49 = vpop.f32.mrf.mxu1 }
 0x197   : > { %v11444_v19 = vpop.f32.mrf.mxu1 }
 0x198   : > { %13518 = vst [vmem:[#allocation32_spill] sm:$0xff] %v11444_v19  ;;  %v9177_v19 = vpop.f32.mrf.mxu0 }
 0x199   : > { %v11451_v38 = vpop.f32.mrf.mxu1  ;;  %v11465_v18 = vadd.f32 %v9177_v19, %v11198_v36 }
 0x19a   : > { %13521 = vst [vmem:[#allocation37_spill] sm:$0xff] %v11451_v38  ;;  %v11467_v28 = vpop.f32.mrf.mxu0 }
 0x19b   : > { %v11453_v3 = vpop.f32.mrf.mxu1  ;;  %13527 = vst [vmem:[#allocation43_spill] sm:$0xff] %v11465_v18  ;;  %13528 = vst [vmem:[#allocation44_spill] sm:$0xff] %v11467_v28 }
 0x19c   : > { %13522 = vst [vmem:[#allocation38_spill] sm:$0xff] %v11453_v3  ;;  %v9180_v38 = vpop.f32.mrf.mxu0 }
 0x19d   : > { %v11460_v35 = vpop.f32.mrf.mxu1  ;;  %v11474_v50 = vadd.f32 %v9180_v38, %v11209_v63 }
 0x19e   : > { %13525 = vst [vmem:[#allocation41_spill] sm:$0xff] %v11460_v35  ;;  %v11476_v48 = vpop.f32.mrf.mxu0 }
 0x19f   : > { %v11462_v59 = vpop.f32.mrf.mxu1  ;;  %13531 = vst [vmem:[#allocation47_spill] sm:$0xff] %v11474_v50  ;;  %13532 = vst [vmem:[#allocation48_spill] sm:$0xff] %v11476_v48 }
 0x1a0   : > { %13526 = vst [vmem:[#allocation42_spill] sm:$0xff] %v11462_v59  ;;  %v9183_v35 = vpop.f32.mrf.mxu0 }
 0x1a1   : > { %v11469_v61 = vpop.f32.mrf.mxu1  ;;  %v11483_v36 = vadd.f32 %v9183_v35, %v11218_v2 }
 0x1a2   : > { %13529 = vst [vmem:[#allocation45_spill] sm:$0xff] %v11469_v61  ;;  %v11485_v19 = vpop.f32.mrf.mxu0 }
 0x1a3   : > { %v11471_v7 = vpop.f32.mrf.mxu1  ;;  %13535 = vst [vmem:[#allocation51_spill] sm:$0xff] %v11483_v36  ;;  %13536 = vst [vmem:[#allocation52_spill] sm:$0xff] %v11485_v19 }
 0x1a4   : > { %13530 = vst [vmem:[#allocation46_spill] sm:$0xff] %v11471_v7  ;;  %v9186_v61 = vpop.f32.mrf.mxu0 }
 0x1a5   : > { %v11478_v3 = vpop.f32.mrf.mxu1  ;;  %v11492_v63 = vadd.f32 %v9186_v61, %v11227_v6 }
 0x1a6   : > { %13533 = vst [vmem:[#allocation49_spill] sm:$0xff] %v11478_v3  ;;  %v11494_v38 = vpop.f32.mrf.mxu0 }
 0x1a7   : > { %v11480_v15 = vpop.f32.mrf.mxu1  ;;  %13539 = vst [vmem:[#allocation55_spill] sm:$0xff] %v11492_v63  ;;  %13540 = vst [vmem:[#allocation56_spill] sm:$0xff] %v11494_v38 }
 0x1a8   : > { %13534 = vst [vmem:[#allocation50_spill] sm:$0xff] %v11480_v15  ;;  %v9189_v3 = vpop.f32.mrf.mxu0 }
 0x1a9   : > { %v11487_v59 = vpop.f32.mrf.mxu1  ;;  %v11501_v35 = vadd.f32 %v9189_v3, %v11239_v1 }
 0x1aa   : > { %13537 = vst [vmem:[#allocation53_spill] sm:$0xff] %v11487_v59  ;;  %v11503_v2 = vpop.f32.mrf.mxu0 }
 0x1ab   : > { %v11489_v18 = vpop.f32.mrf.mxu1  ;;  %13543 = vst [vmem:[#allocation59_spill] sm:$0xff] %v11501_v35  ;;  %13544 = vst [vmem:[#allocation60_spill] sm:$0xff] %v11503_v2 }
 0x1ac   : > { %13538 = vst [vmem:[#allocation54_spill] sm:$0xff] %v11489_v18  ;;  %v9192_v59 = vpop.f32.mrf.mxu0 }
 0x1ad   : > { %v11496_v7 = vpop.f32.mrf.mxu1  ;;  %v11510_v6 = vadd.f32 %v9192_v59, %v11248_v44 }
 0x1ae   : > { %13541 = vst [vmem:[#allocation57_spill] sm:$0xff] %v11496_v7  ;;  %v11512_v61 = vpop.f32.mrf.mxu0 }
 0x1af   : > { %v11498_v50 = vpop.f32.mrf.mxu1  ;;  %13547 = vst [vmem:[#allocation63_spill] sm:$0xff] %v11510_v6  ;;  %13548 = vst [vmem:[#allocation64_spill] sm:$0xff] %v11512_v61 }
 0x1b0   : > { %13542 = vst [vmem:[#allocation58_spill] sm:$0xff] %v11498_v50  ;;  %v8100_v50 = vld [vmem:[%s13356_s3 + $0x20] sm:$0xff]  ;;  %v9195_v3 = vpop.f32.mrf.mxu0 }
 0x1b1   : > { %v11505_v15 = vpop.f32.mrf.mxu1  ;;  %9508 = vmatprep.subr.mxu1 %v8100_v50 }
 0x1b2   : > { %13545 = vst [vmem:[#allocation61_spill] sm:$0xff] %v11505_v15  ;;  %v11522_v15 = vadd.f32 %v9195_v3, %v11258_v4  ;;  %9509 = vmatpush3.msra.mxu1 %v8100_v50 }
 0x1b3   : > { %v11507_v36 = vpop.f32.mrf.mxu1 }
 0x1b4   : > { %13546 = vst [vmem:[#allocation62_spill] sm:$0xff] %v11507_v36  ;;  %13551 = vst [vmem:[#allocation67_spill] sm:$0xff] %v11522_v15  ;;  %v11524_v36 = vpop.f32.mrf.mxu0 }
 0x1b5   : > { %v11514_v18 = vpop.f32.mrf.mxu1  ;;  %13552 = vst [vmem:[#allocation68_spill] sm:$0xff] %v11524_v36 }
 0x1b6   : > { %13549 = vst [vmem:[#allocation65_spill] sm:$0xff] %v11514_v18  ;;  %v9198_v44 = vpop.f32.mrf.mxu0 }
 0x1b7   : > { %v11519_v1 = vpop.f32.mrf.mxu1  ;;  %v11531_v18 = vadd.f32 %v9198_v44, %v11268_v8 }
 0x1b8   : > { %13550 = vst [vmem:[#allocation66_spill] sm:$0xff] %v11519_v1  ;;  %v11533_v61 = vpop.f32.mrf.mxu0 }
 0x1b9   : > { %v11526_v59 = vpop.f32.mrf.mxu1  ;;  %13555 = vst [vmem:[#allocation71_spill] sm:$0xff] %v11531_v18  ;;  %13556 = vst [vmem:[#allocation72_spill] sm:$0xff] %v11533_v61 }
 0x1ba   : > { %13553 = vst [vmem:[#allocation69_spill] sm:$0xff] %v11526_v59  ;;  %v9201_v1 = vpop.f32.mrf.mxu0 }
 0x1bb   : > { %v11528_v6 = vpop.f32.mrf.mxu1  ;;  %v11540_v4 = vadd.f32 %v9201_v1, %v11276_v16  ;;  %v8135_v16 = vld [vmem:[%s13356_s3 + $0x38] sm:$0xff] }
 0x1bc   : > { %13554 = vst [vmem:[#allocation70_spill] sm:$0xff] %v11528_v6  ;;  %v11542_v50 = vpop.f32.mrf.mxu0  ;;  %9558 = vmatprep.subr.mxu0 %v8135_v16 }
 0x1bd   : > { %v11535_v35 = vpop.f32.mrf.mxu1  ;;  %13559 = vst [vmem:[#allocation75_spill] sm:$0xff] %v11540_v4  ;;  %13560 = vst [vmem:[#allocation76_spill] sm:$0xff] %v11542_v50  ;;  %9559 = vmatpush3.msra.mxu0 %v8135_v16  ;;  %v8134_v4 = vld [vmem:[%s13356_s3 + $0x30] sm:$0xff]  ;;  %v11571_v50 = vld [vmem:[%s13356_s3 + $0x48] sm:$0xff] }
 0x1be   : > { %13557 = vst [vmem:[#allocation73_spill] sm:$0xff] %v11535_v35  ;;  %v9256_v59 = vpop.f32.mrf.mxu0  ;;  %13562 = vst [vmem:[#allocation78_spill] sm:$0xff] %v11571_v50  ;;  %9560 = vmatprep.subr.mxu0 %v8134_v4  ;;  %9610 = vmatprep.subr.mxu1 %v11571_v50 }
 0x1bf   : > { %v11537_v2 = vpop.f32.mrf.mxu1  ;;  %9561 = vmatpush3.msra.mxu0 %v8134_v4 }
 0x1c0   : > { %13558 = vst [vmem:[#allocation74_spill] sm:$0xff] %v11537_v2  ;;  %v2873_v6 = vpop.f32.mrf.mxu0 }
 0x1c1   : > { %v11544_v3 = vpop.f32.mrf.mxu1 }
 0x1c2   : > { %13561 = vst [vmem:[#allocation77_spill] sm:$0xff] %v11544_v3  ;;  %v11550_v44 = vpop.f32.mrf.mxu0 }
 0x1c3   : > { %v11546_v15 = vpop.f32.mrf.mxu1 }
 0x1c4   : > { %v11552_v18 = vpop.f32.mrf.mxu0 }
 0x1c5   : > { %v11548_v8 = vpop.f32.mrf.mxu1 }
 0x1c6   : > { %v11556_v2 = vpop.f32.mrf.mxu0 }
 0x1c7   : > { %v11554_v35 = vpop.f32.mrf.mxu1 }
 0x1c8   : > { %v11563_v3 = vpop.f32.mrf.mxu0 }
 0x1c9   : > { %v11561_v1 = vpop.f32.mrf.mxu1 }
 0x1ca   : > { %v11573_v61 = vpop.f32.mrf.mxu0 }
 0x1cb   : > { %v11576_v36 = vpop.f32.mrf.mxu1 }
 0x1cc   : > { %v11578_v7 = vpop.f32.mrf.mxu0 }
 0x1cd   : > { %v11582_v63 = vpop.f32.mrf.mxu1 }
 0x1ce   : > { %v11580_v16 = vpop.f32.mrf.mxu0 }
 0x1cf   : > { %13563 = vst [vmem:[#allocation79_spill] sm:$0xff] %v11580_v16  ;;  %v11588_v48 = vpop.f32.mrf.mxu1 }
 0x1d0   : > { %v11584_v38 = vpop.f32.mrf.mxu0  ;;  %13566 = vst [vmem:[#allocation82_spill] sm:$0xff] %v11588_v48 }
 0x1d1   : > { %13564 = vst [vmem:[#allocation80_spill] sm:$0xff] %v11584_v38  ;;  %v11594_v50 = vpop.f32.mrf.mxu1 }
 0x1d2   : > { %v11586_v19 = vpop.f32.mrf.mxu0  ;;  %13569 = vst [vmem:[#allocation85_spill] sm:$0xff] %v11594_v50 }
 0x1d3   : > { %13565 = vst [vmem:[#allocation81_spill] sm:$0xff] %v11586_v19  ;;  %v11600_v60 = vpop.f32.mrf.mxu1 }
 0x1d4   : > { %v11590_v28 = vpop.f32.mrf.mxu0  ;;  %13572 = vst [vmem:[#allocation88_spill] sm:$0xff] %v11600_v60 }
 0x1d5   : > { %13567 = vst [vmem:[#allocation83_spill] sm:$0xff] %v11590_v28  ;;  %v11606_v38 = vpop.f32.mrf.mxu1 }
 0x1d6   : > { %v11592_v46 = vpop.f32.mrf.mxu0  ;;  %13575 = vst [vmem:[#allocation91_spill] sm:$0xff] %v11606_v38 }
 0x1d7   : > { %13568 = vst [vmem:[#allocation84_spill] sm:$0xff] %v11592_v46  ;;  %v11612_v28 = vpop.f32.mrf.mxu1 }
 0x1d8   : > { %v11596_v4 = vpop.f32.mrf.mxu0  ;;  %13578 = vst [vmem:[#allocation94_spill] sm:$0xff] %v11612_v28 }
 0x1d9   : > { %13570 = vst [vmem:[#allocation86_spill] sm:$0xff] %v11596_v4  ;;  %v11618_v4 = vpop.f32.mrf.mxu1 }
 0x1da   : > { %v11598_v40 = vpop.f32.mrf.mxu0 }
 0x1db   : > { %13571 = vst [vmem:[#allocation87_spill] sm:$0xff] %v11598_v40 }
 0x1dc   : > { %v11602_v16 = vpop.f32.mrf.mxu0 }
 0x1dd   : > { %13573 = vst [vmem:[#allocation89_spill] sm:$0xff] %v11602_v16  ;;  %v11624_v16 = vpop.f32.mrf.mxu1 }
 0x1de   : > { %v11604_v43 = vpop.f32.mrf.mxu0  ;;  %13583 = vst [vmem:[#allocation99_spill] sm:$0xff] %v11624_v16 }
 0x1df   : > { %13574 = vst [vmem:[#allocation90_spill] sm:$0xff] %v11604_v43 }
 0x1e0   : > { %v11608_v19 = vpop.f32.mrf.mxu0 }
 0x1e1   : > { %13576 = vst [vmem:[#allocation92_spill] sm:$0xff] %v11608_v19  ;;  %v11630_v19 = vpop.f32.mrf.mxu1 }
 0x1e2   : > { %v11610_v48 = vpop.f32.mrf.mxu0 }
 0x1e3   : > { %13577 = vst [vmem:[#allocation93_spill] sm:$0xff] %v11610_v48 }
 0x1e4   : > { %v11614_v46 = vpop.f32.mrf.mxu0 }
 0x1e5   : > { %13579 = vst [vmem:[#allocation95_spill] sm:$0xff] %v11614_v46  ;;  %v11638_v46 = vpop.f32.mrf.mxu1 }
 0x1e6   : > { %v11616_v50 = vpop.f32.mrf.mxu0  ;;  %13588 = vst [vmem:[#allocation104_spill] sm:$0xff] %v11638_v46 }
 0x1e7   : > { %13580 = vst [vmem:[#allocation96_spill] sm:$0xff] %v11616_v50  ;;  %v1861_v50 = vadd.f32 %v11106_v30, %v11109_v32 }
 0x1e8   : > { %v11620_v40 = vpop.f32.mrf.mxu0 }
 0x1e9   : > { %13581 = vst [vmem:[#allocation97_spill] sm:$0xff] %v11620_v40 }
 0x1ea   : > { %v11622_v60 = vpop.f32.mrf.mxu0 }
 0x1eb   : > { %13582 = vst [vmem:[#allocation98_spill] sm:$0xff] %v11622_v60  ;;  %v2251_v60 = vadd.f32 %v11283_v27, %v1861_v50  ;;  %v1865_v27 = vadd.f32 %v11130_v37, %v11133_v13  ;;  %v1867_v37 = vadd.f32 %v11145_v11, %v11148_v34  ;;  %v2646_v13 = vadd.f32 %v11407_v45, %v11410_v10 }
 0x1ec   : > { %v11626_v43 = vpop.f32.mrf.mxu0 }
 0x1ed   : > { %13584 = vst [vmem:[#allocation100_spill] sm:$0xff] %v11626_v43  ;;  %v2642_v43 = vadd.f32 %v11278_v42, %v11281_v12  ;;  %v2641_v30 = vadd.f32 %v11285_v22, %v2251_v60  ;;  %v2255_v12 = vadd.f32 %v11415_v55, %v1865_v27  ;;  %v3037_v11 = vadd.f32 %v11556_v2, %v2646_v13 }
 0x1ee   : > { %v11628_v38 = vpop.f32.mrf.mxu0 }
 0x1ef   : > { %13585 = vst [vmem:[#allocation101_spill] sm:$0xff] %v11628_v38  ;;  %v1863_v38 = vadd.f32 %v11118_v33, %v11121_v57  ;;  %v3033_v46 = vadd.f32 %v9256_v59, %v2642_v43  ;;  %v2644_v33 = vadd.f32 %v11359_v31, %v11398_v51  ;;  %v3032_v57 = vadd.f32 %v2873_v6, %v2641_v30  ;;  %v11676_v51 = vld [vmem:[%s13355_s2] ss:$0 sm:$0xff] }
 0x1f0   : > { %v11632_v48 = vpop.f32.mrf.mxu0  ;;  %v11689_v59 = vadd.f32 %v11021_v9, %v11019_v21 }
 0x1f1   : > { %13586 = vst [vmem:[#allocation102_spill] sm:$0xff] %v11632_v48  ;;  %v11649_v48 = vpop.f32.mrf.mxu1  ;;  %v2253_v32 = vadd.f32 %v11400_v39, %v1863_v38  ;;  %v3423_v22 = vadd.f32 %v11546_v15, %v3033_v46  ;;  %v3035_v43 = vadd.f32 %v11550_v44, %v2644_v33  ;;  %v3422_v39 = vadd.f32 %v11548_v8, %v3032_v57 }
 0x1f2   : > { %v11634_v28 = vpop.f32.mrf.mxu0  ;;  %v2645_v46 = vadd.f32 %v11417_v56, %v2255_v12  ;;  %v2257_v15 = vadd.f32 %v11428_v23, %v1867_v37  ;;  %v2648_v56 = vadd.f32 %v11420_v26, %v11425_v20 }
 0x1f3   : > { %13587 = vst [vmem:[#allocation103_spill] sm:$0xff] %v11634_v28  ;;  %v11662_v42 = vpop.f32.mrf.mxu1  ;;  %v2643_v60 = vadd.f32 %v11402_v62, %v2253_v32  ;;  %v3425_v10 = vadd.f32 %v11554_v35, %v3035_v43  ;;  %v11700_v32 = vadd.f32 %v11035_v5, %v11033_v25  ;;  %v11712_v25 = vadd.f32 %v11049_v24, %v11047_v29  ;;  %v13590_v29 = vld [vmem:[#allocation33_spill] sm:$0xff]  ;;  %v13593_v43 = vld [vmem:[#allocation82_spill] sm:$0xff] }
 0x1f4   : > { %v11640_v40 = vpop.f32.mrf.mxu0  ;;  %v3036_v23 = vadd.f32 %v11563_v3, %v2645_v46  ;;  %v2647_v21 = vadd.f32 %v11430_v14, %v2257_v15  ;;  %v3039_v20 = vadd.f32 %v11573_v61, %v2648_v56  ;;  %v1871_v5 = vadd.f32 %v11169_v47, %v11172_v0  ;;  %v13591_v0 = vld [vmem:[#allocation36_spill] sm:$0xff]  ;;  %v13601_v56 = vld [vmem:[#allocation85_spill] sm:$0xff] }
 0x1f5   : > { %v3034_v62 = vadd.f32 %v11552_v18, %v2643_v60  ;;  %v11683_v34 = vpop.f32.mrf.mxu1  ;;  %v1869_v18 = vadd.f32 %v11157_v52, %v11160_v17  ;;  %v3427_v52 = vadd.f32 %v11576_v36, %v3037_v11  ;;  %v11724_v24 = vadd.f32 %v13590_v29, %v11061_v54  ;;  %v13597_v46 = vld [vmem:[#allocation12_spill] sm:$0xff]  ;;  %v13598_v11 = vld [vmem:[#allocation35_spill] sm:$0xff] }
 0x1f6   : > { %v11643_v16 = vpop.f32.mrf.mxu0  ;;  %v3426_v14 = vadd.f32 %v11582_v63, %v3036_v23  ;;  %v3038_v61 = vadd.f32 %v11578_v7, %v2647_v21  ;;  %v2261_v60 = vadd.f32 %v13591_v0, %v1871_v5  ;;  %v11734_v7 = vld [vmem:[%s13356_s3 + $0x58] sm:$0xff]  ;;  %v3429_v37 = vadd.f32 %v13593_v43, %v3039_v20  ;;  %v13614_v43 = vld [vmem:[#allocation91_spill] sm:$0xff] }
 0x1f7   : > { %13589 = vst [vmem:[#allocation105_spill] sm:$0xff] %v11643_v16  ;;  %v3424_v8 = vadd.f32 %v11561_v1, %v3034_v62  ;;  %v2259_v9 = vadd.f32 %v11437_v53, %v1869_v18  ;;  %v11705_v17 = vpop.f32.mrf.mxu1  ;;  %v2650_v53 = vadd.f32 %v11432_v58, %v11435_v41  ;;  %v13592_v41 = vld [vmem:[#allocation79_spill] sm:$0xff]  ;;  %9662 = vmatprep.subr.mxu0 %v11734_v7  ;;  %v13611_v0 = vld [vmem:[#allocation14_spill] sm:$0xff] }
 0x1f8   : > { %v11651_v28 = vpop.f32.mrf.mxu0  ;;  %v3428_v23 = vadd.f32 %v13601_v56, %v3038_v61  ;;  %v13618_v56 = vld [vmem:[#allocation84_spill] sm:$0xff] }
 0x1f9   : > { %v2649_v47 = vadd.f32 %v11439_v49, %v2259_v9  ;;  %v3041_v58 = vadd.f32 %v13592_v41, %v2650_v53  ;;  %v11729_v63 = vpop.f32.mrf.mxu1  ;;  %v13604_v9 = vld [vmem:[#allocation37_spill] sm:$0xff]  ;;  %v13612_v41 = vld [vmem:[#allocation39_spill] sm:$0xff] }
 0x1fa   : > { %v11657_v50 = vpop.f32.mrf.mxu0  ;;  %v13607_v53 = vld [vmem:[#allocation81_spill] sm:$0xff] }
 0x1fc   : > { %v11664_v16 = vpop.f32.mrf.mxu0 }
 0x1fe   : > { %v9356_v31 = vpop.f32.mrf.mxu0 }
 0x1ff   : > { %v3813_v55 = vadd.f32 %v9356_v31, %v3423_v22  ;;  %v13594_v31 = vld [vmem:[#allocation34_spill] sm:$0xff] }
 0x200   : > { %v3653_v45 = vpop.f32.mrf.mxu0 }
 0x201   : > { %v3852_v38 = vadd.f32 %v11676_v51, %v3813_v55  ;;  %v3812_v6 = vadd.f32 %v3653_v45, %v3422_v39  ;;  %v13595_v39 = vld [vmem:[#allocation7_spill] sm:$0xff]  ;;  %v13596_v55 = vld [vmem:[#allocation13_spill] sm:$0xff]  ;;  %v13599_v45 = vld [vmem:[#allocation32_spill] sm:$0xff] }
 0x202   : > { %v9359_v2 = vpop.f32.mrf.mxu0  ;;  %v11742_v62 = vadd.f32 %v13595_v39, %v13594_v31  ;;  %v1873_v15 = vadd.f32 %v13597_v46, %v13596_v55  ;;  %v13615_v39 = vld [vmem:[#allocation83_spill] sm:$0xff] }
 0x203   : > { %v3884_v44 = vmax.f32 %v3852_v38, 0.0  ;;  %v3851_v35 = vadd.f32 %v11676_v51, %v3812_v6  ;;  %v3815_v30 = vadd.f32 %v9359_v2, %v3425_v10  ;;  %v2652_v10 = vadd.f32 %v13599_v45, %v13598_v11  ;;  %v13600_v38 = vld [vmem:[#allocation80_spill] sm:$0xff] }
 0x204   : > { %v3663_v26 = vpop.f32.mrf.mxu0  ;;  %v3040_v6 = vadd.f32 %v13600_v38, %v2649_v47  ;;  %v13610_v47 = vld [vmem:[#allocation15_spill] sm:$0xff] }
 0x205   : > { %3973 = vst.msk [vmem:[#allocation3 + $0x21] sm:$0xff] %vm3915_vm3, %v3884_v44  ;;  %v3883_v3 = vmax.f32 %v3851_v35, 0.0  ;;  %v3854_v1 = vadd.f32 %v11676_v51, %v3815_v30  ;;  %v3814_v27 = vadd.f32 %v3663_v26, %v3424_v8  ;;  %v13602_v35 = vld [vmem:[#allocation8_spill] sm:$0xff]  ;;  %v13603_v30 = vld [vmem:[#allocation9_spill] sm:$0xff] }
 0x206   : > { %v9362_v36 = vpop.f32.mrf.mxu0  ;;  %v11754_v21 = vadd.f32 %v13603_v30, %v13602_v35  ;;  %v13605_v26 = vld [vmem:[#allocation40_spill] sm:$0xff] }
 0x207   : > { %3972 = vst.msk [vmem:[#allocation3 + $0x19] sm:$0xff] %vm3915_vm3, %v3883_v3  ;;  %v3886_v33 = vmax.f32 %v3854_v1, 0.0  ;;  %v3853_v57 = vadd.f32 %v11676_v51, %v3814_v27  ;;  %v3817_v12 = vadd.f32 %v9362_v36, %v3427_v52  ;;  %v2651_v52 = vadd.f32 %v13604_v9, %v2261_v60  ;;  %v13606_v3 = vld [vmem:[#allocation88_spill] sm:$0xff]  ;;  %v11759_v27 = vpop.f32.mrf.mxu1 }
 0x208   : > { %v3673_v22 = vpop.f32.mrf.mxu0  ;;  %v2263_v20 = vadd.f32 %v13605_v26, %v1873_v15  ;;  %v3431_v1 = vadd.f32 %v13606_v3, %v3041_v58  ;;  %v1875_v60 = vadd.f32 %v13611_v0, %v13610_v47  ;;  %v13613_v58 = vld [vmem:[#allocation38_spill] sm:$0xff]  ;;  %v13620_v26 = vld [vmem:[#allocation17_spill] sm:$0xff] }
 0x209   : > { %3975 = vst.msk [vmem:[#allocation3 + $0x39] sm:$0xff] %vm3915_vm3, %v3886_v33  ;;  %v3885_v54 = vmax.f32 %v3853_v57, 0.0  ;;  %v3856_v13 = vadd.f32 %v11676_v51, %v3817_v12  ;;  %v3816_v49 = vadd.f32 %v3673_v22, %v3426_v14  ;;  %v3043_v14 = vadd.f32 %v13607_v53, %v2652_v10  ;;  %v13608_v57 = vld [vmem:[#allocation10_spill] sm:$0xff]  ;;  %v13609_v12 = vld [vmem:[#allocation11_spill] sm:$0xff]  ;;  %v13616_v10 = vld [vmem:[#allocation41_spill] sm:$0xff] }
 0x20a   : > { %v9365_v18 = vpop.f32.mrf.mxu0  ;;  %v11766_v29 = vadd.f32 %v13609_v12, %v13608_v57  ;;  %v2654_v22 = vadd.f32 %v13613_v58, %v13612_v41  ;;  %v3042_v55 = vadd.f32 %v13615_v39, %v2651_v52  ;;  %v2653_v38 = vadd.f32 %v13616_v10, %v2263_v20  ;;  %v13621_v20 = vld [vmem:[#allocation16_spill] sm:$0xff]  ;;  %v13623_v53 = vld [vmem:[#allocation43_spill] sm:$0xff] }
 0x20b   : > { %3974 = vst.msk [vmem:[#allocation3 + $0x31] sm:$0xff] %vm3915_vm3, %v3885_v54  ;;  %v3888_v2 = vmax.f32 %v3856_v13, 0.0  ;;  %v3855_v8 = vadd.f32 %v11676_v51, %v3816_v49  ;;  %v3819_v44 = vadd.f32 %v9365_v18, %v3429_v37  ;;  %v3430_v37 = vadd.f32 %v13614_v43, %v3040_v6  ;;  %v13617_v6 = vld [vmem:[#allocation44_spill] sm:$0xff]  ;;  %v13626_v43 = vld [vmem:[#allocation45_spill] sm:$0xff] }
 0x20c   : > { %v3683_v5 = vpop.f32.mrf.mxu0  ;;  %v11786_v45 = vld [vmem:[#allocation3 + $0x21] sm:$0xff]  ;;  %v2265_v18 = vadd.f32 %v13617_v6, %v1875_v60  ;;  %v1877_v3 = vadd.f32 %v13621_v20, %v13620_v26  ;;  %v3432_v60 = vadd.f32 %v11618_v4, %v3042_v55 }
 0x20d   : > { %3977 = vst.msk [vmem:[#allocation3 + $0x51] sm:$0xff] %vm3915_vm3, %v3888_v2  ;;  %v3887_v36 = vmax.f32 %v3855_v8, 0.0  ;;  %v3858_v61 = vadd.f32 %v11676_v51, %v3819_v44  ;;  %v3818_v33 = vadd.f32 %v3683_v5, %v3428_v23  ;;  %v3045_v23 = vadd.f32 %v13618_v56, %v2654_v22  ;;  %v11791_v2 = vpop.f32.mrf.mxu1  ;;  %v13619_v44 = vld [vmem:[#allocation94_spill] sm:$0xff]  ;;  %v13630_v56 = vld [vmem:[#allocation19_spill] sm:$0xff] }
 0x20e   : > { %v9368_v54 = vpop.f32.mrf.mxu0  ;;  %v11773_v13 = vld [vmem:[#allocation3 + $0x19] sm:$0xff]  ;;  %v3433_v35 = vadd.f32 %v13619_v44, %v3043_v14 }
 0x20f   : > { %v11775_v49 = vld [vmem:[#allocation3 + $0x18] sm:$0xff]  ;;  %v11777_v31 = vld [vmem:[#allocation3 + $0x20] sm:$0xff]  ;;  %3976 = vst.msk [vmem:[#allocation3 + $0x49] sm:$0xff] %vm3915_vm3, %v3887_v36  ;;  %v3890_v46 = vmax.f32 %v3858_v61, 0.0  ;;  %v3857_v15 = vadd.f32 %v11676_v51, %v3818_v33  ;;  %v3821_v11 = vadd.f32 %v9368_v54, %v3431_v1  ;;  %9409 = vmatprep.mubr.msk.f32.mxu1 %vm3915_vm3, %v11773_v13  ;;  %v13622_v1 = vld [vmem:[#allocation18_spill] sm:$0xff]  ;;  %v11825_v55 = vpop.f32.mrf.mxu1 }
 0x210   : > { %9461 = vmatprep.mubr.msk.f32.mxu0 %vm3915_vm3, %v11775_v49  ;;  %v3693_v8 = vpop.f32.mrf.mxu0  ;;  %9410 = vmatmul.mubr.msk.f32.gmra.mxu1 %vm3915_vm3, %v11786_v45  ;;  %v1489_v5 = vadd.f32 %v13622_v1, %v11689_v59  ;;  %v13624_v36 = vld [vmem:[#allocation42_spill] sm:$0xff]  ;;  %v11820_v22 = vld [vmem:[#allocation3 + $0x39] sm:$0xff] }
 0x211   : > { %9462 = vmatmul.mubr.msk.f32.gmra.mxu0 %vm3915_vm3, %v11777_v31  ;;  %3979 = vst.msk [vmem:[#allocation3 + $0x69] sm:$0xff] %vm3915_vm3, %v3890_v46  ;;  %v3889_v30 = vmax.f32 %v3857_v15, 0.0  ;;  %v3860_v9 = vadd.f32 %v11676_v51, %v3821_v11  ;;  %v3820_v52 = vadd.f32 %v3693_v8, %v3430_v37  ;;  %v2656_v61 = vadd.f32 %v13624_v36, %v13623_v53  ;;  %v13625_v33 = vld [vmem:[#allocation86_spill] sm:$0xff]  ;;  %v13627_v54 = vld [vmem:[#allocation48_spill] sm:$0xff]  ;;  %v13628_v46 = vld [vmem:[#allocation99_spill] sm:$0xff] }
 0x212   : > { %v3044_v57 = vadd.f32 %v13625_v33, %v2653_v38  ;;  %v9371_v12 = vpop.f32.mrf.mxu0  ;;  %v11807_v47 = vld [vmem:[#allocation3 + $0x31] sm:$0xff]  ;;  %v2655_v37 = vadd.f32 %v13626_v43, %v2265_v18  ;;  %v2267_v39 = vadd.f32 %v13627_v54, %v1877_v3  ;;  %v3435_v4 = vadd.f32 %v13628_v46, %v3045_v23  ;;  %v13631_v23 = vld [vmem:[#allocation20_spill] sm:$0xff]  ;;  %v13634_v53 = vld [vmem:[#allocation89_spill] sm:$0xff] }
 0x213   : > { %v11809_v14 = vld [vmem:[#allocation3 + $0x30] sm:$0xff]  ;;  %v11811_v0 = vld [vmem:[#allocation3 + $0x38] sm:$0xff]  ;;  %3978 = vst.msk [vmem:[#allocation3 + $0x61] sm:$0xff] %vm3915_vm3, %v3889_v30  ;;  %v3892_v41 = vmax.f32 %v3860_v9, 0.0  ;;  %v3859_v58 = vadd.f32 %v11676_v51, %v3820_v52  ;;  %v3823_v59 = vadd.f32 %v9371_v12, %v3433_v35  ;;  %9412 = vmatprep.mubr.msk.f32.mxu1 %vm3915_vm3, %v11807_v47  ;;  %v1879_v8 = vadd.f32 %v13630_v56, %v1489_v5  ;;  %v13635_v33 = vld [vmem:[#allocation49_spill] sm:$0xff] }
 0x214   : > { %9464 = vmatprep.mubr.msk.f32.mxu0 %vm3915_vm3, %v11809_v14  ;;  %v3703_v15 = vpop.f32.mrf.mxu0  ;;  %9413 = vmatmul.mubr.msk.f32.gmra.mxu1 %vm3915_vm3, %v11820_v22  ;;  %v13629_v11 = vld [vmem:[#allocation87_spill] sm:$0xff]  ;;  %v1491_v44 = vadd.f32 %v13631_v23, %v11700_v32  ;;  %v13633_v30 = vld [vmem:[#allocation46_spill] sm:$0xff]  ;;  %v3434_v52 = vadd.f32 %v11630_v19, %v3044_v57  ;;  %v3046_v36 = vadd.f32 %v13634_v53, %v2655_v37  ;;  %v13636_v12 = vld [vmem:[#allocation52_spill] sm:$0xff] }
 0x215   : > { %9465 = vmatmul.mubr.msk.f32.gmra.mxu0 %vm3915_vm3, %v11811_v0  ;;  %v3047_v10 = vadd.f32 %v13629_v11, %v2656_v61  ;;  %3981 = vst.msk [vmem:[#allocation3 + $0x81] sm:$0xff] %vm3915_vm3, %v3892_v41  ;;  %v3891_v38 = vmax.f32 %v3859_v58, 0.0  ;;  %v3862_v6 = vadd.f32 %v11676_v51, %v3823_v59  ;;  %v3822_v18 = vadd.f32 %v3703_v15, %v3432_v60  ;;  %v13632_v35 = vld [vmem:[#allocation47_spill] sm:$0xff]  ;;  %v13637_v41 = vld [vmem:[#allocation90_spill] sm:$0xff]  ;;  %v11858_v59 = vpop.f32.mrf.mxu1  ;;  %v13638_v37 = vld [vmem:[#allocation104_spill] sm:$0xff] }
 0x216   : > { %v2658_v9 = vadd.f32 %v13633_v30, %v13632_v35  ;;  %v9374_v26 = vpop.f32.mrf.mxu0  ;;  %v11840_v20 = vld [vmem:[#allocation3 + $0x49] sm:$0xff]  ;;  %v11853_v19 = vld [vmem:[#allocation3 + $0x51] sm:$0xff]  ;;  %v2657_v57 = vadd.f32 %v13635_v33, %v2267_v39  ;;  %v2269_v60 = vadd.f32 %v13636_v12, %v1879_v8  ;;  %v13643_v23 = vld [vmem:[#allocation92_spill] sm:$0xff]  ;;  %v3436_v53 = vadd.f32 %v11649_v48, %v3046_v36 }
 0x217   : > { %v11842_v3 = vld [vmem:[#allocation3 + $0x48] sm:$0xff]  ;;  %v11844_v1 = vld [vmem:[#allocation3 + $0x50] sm:$0xff]  ;;  %3980 = vst.msk [vmem:[#allocation3 + $0x79] sm:$0xff] %vm3915_vm3, %v3891_v38  ;;  %v3894_v5 = vmax.f32 %v3862_v6, 0.0  ;;  %v3861_v61 = vadd.f32 %v11676_v51, %v3822_v18  ;;  %v3825_v32 = vadd.f32 %v9374_v26, %v3435_v4  ;;  %9415 = vmatprep.mubr.msk.f32.mxu1 %vm3915_vm3, %v11840_v20  ;;  %v3437_v54 = vadd.f32 %v13638_v37, %v3047_v10  ;;  %v13647_v33 = vld [vmem:[#allocation56_spill] sm:$0xff]  ;;  %v11891_v36 = vpop.f32.mrf.mxu1 }
 0x218   : > { %9467 = vmatprep.mubr.msk.f32.mxu0 %vm3915_vm3, %v11842_v3  ;;  %v3049_v58 = vadd.f32 %v13637_v41, %v2658_v9  ;;  %v3713_v43 = vpop.f32.mrf.mxu0  ;;  %9416 = vmatmul.mubr.msk.f32.gmra.mxu1 %vm3915_vm3, %v11853_v19  ;;  %v13639_v15 = vld [vmem:[#allocation21_spill] sm:$0xff]  ;;  %v13640_v38 = vld [vmem:[#allocation22_spill] sm:$0xff]  ;;  %v13641_v18 = vld [vmem:[#allocation51_spill] sm:$0xff]  ;;  %v3048_v35 = vadd.f32 %v13643_v23, %v2657_v57 }
 0x219   : > { %9468 = vmatmul.mubr.msk.f32.gmra.mxu0 %vm3915_vm3, %v11844_v1  ;;  %3983 = vst.msk [vmem:[#allocation3 + $0x99] sm:$0xff] %vm3915_vm3, %v3894_v5  ;;  %v3893_v46 = vmax.f32 %v3861_v61, 0.0  ;;  %v3864_v39 = vadd.f32 %v11676_v51, %v3825_v32  ;;  %v3824_v4 = vadd.f32 %v3713_v43, %v3434_v52  ;;  %v1881_v11 = vadd.f32 %v13639_v15, %v1491_v44  ;;  %v13642_v56 = vld [vmem:[#allocation50_spill] sm:$0xff]  ;;  %v13646_v61 = vld [vmem:[#allocation53_spill] sm:$0xff] }
 0x21a   : > { %v1493_v6 = vadd.f32 %v13640_v38, %v11712_v25  ;;  %v2660_v8 = vadd.f32 %v13642_v56, %v13641_v18  ;;  %v9377_v30 = vpop.f32.mrf.mxu0  ;;  %v11873_v9 = vld [vmem:[#allocation3 + $0x61] sm:$0xff]  ;;  %v11886_v5 = vld [vmem:[#allocation3 + $0x69] sm:$0xff]  ;;  %v2659_v32 = vadd.f32 %v13646_v61, %v2269_v60  ;;  %v3439_v48 = vadd.f32 %v11662_v42, %v3049_v58 }
 0x21b   : > { %v11875_v10 = vld [vmem:[#allocation3 + $0x60] sm:$0xff]  ;;  %v11877_v26 = vld [vmem:[#allocation3 + $0x68] sm:$0xff]  ;;  %3982 = vst.msk [vmem:[#allocation3 + $0x91] sm:$0xff] %vm3915_vm3, %v3893_v46  ;;  %v3896_v44 = vmax.f32 %v3864_v39, 0.0  ;;  %v3863_v52 = vadd.f32 %v11676_v51, %v3824_v4  ;;  %v3827_v25 = vadd.f32 %v9377_v30, %v3437_v54  ;;  %9418 = vmatprep.mubr.msk.f32.mxu1 %vm3915_vm3, %v11873_v9  ;;  %v2271_v57 = vadd.f32 %v13647_v33, %v1881_v11  ;;  %v13649_v46 = vld [vmem:[#allocation23_spill] sm:$0xff] }
 0x21c   : > { %13644 = vst [vmem:[#allocation33_spill] sm:$0xff] %v11875_v10  ;;  %13645 = vst [vmem:[#allocation36_spill] sm:$0xff] %v11877_v26  ;;  %9470 = vmatprep.mubr.msk.f32.mxu0 %vm3915_vm3, %v11875_v10  ;;  %v3723_v12 = vpop.f32.mrf.mxu0  ;;  %9419 = vmatmul.mubr.msk.f32.gmra.mxu1 %vm3915_vm3, %v11886_v5  ;;  %v13648_v41 = vld [vmem:[#allocation93_spill] sm:$0xff]  ;;  %v1883_v39 = vadd.f32 %v13649_v46, %v1493_v6  ;;  %v13650_v42 = vld [vmem:[#allocation24_spill] sm:$0xff]  ;;  %v3438_v38 = vadd.f32 %v11683_v34, %v3048_v35 }
 0x21d   : > { %9471 = vmatmul.mubr.msk.f32.gmra.mxu0 %vm3915_vm3, %v11877_v26  ;;  %v3051_v43 = vadd.f32 %v13648_v41, %v2660_v8  ;;  %3985 = vst.msk [vmem:[#allocation3 + $0xb1] sm:$0xff] %vm3915_vm3, %v3896_v44  ;;  %v3895_v37 = vmax.f32 %v3863_v52, 0.0  ;;  %v3866_v60 = vadd.f32 %v11676_v51, %v3827_v25  ;;  %v3826_v54 = vadd.f32 %v3723_v12, %v3436_v53  ;;  %v13651_v4 = vld [vmem:[#allocation55_spill] sm:$0xff]  ;;  %v13652_v15 = vld [vmem:[#allocation54_spill] sm:$0xff]  ;;  %v11919_v34 = vld [vmem:[#allocation3 + $0x81] sm:$0xff]  ;;  %v11924_v12 = vpop.f32.mrf.mxu1 }
 0x21e   : > { %v1495_v58 = vadd.f32 %v13650_v42, %v11724_v24  ;;  %v2662_v11 = vadd.f32 %v13652_v15, %v13651_v4  ;;  %v9380_v18 = vpop.f32.mrf.mxu0  ;;  %v11906_v56 = vld [vmem:[#allocation3 + $0x79] sm:$0xff]  ;;  %v13656_v35 = vld [vmem:[#allocation57_spill] sm:$0xff]  ;;  %v13662_v15 = vld [vmem:[#allocation58_spill] sm:$0xff] }
 0x21f   : > { %v11908_v8 = vld [vmem:[#allocation3 + $0x78] sm:$0xff]  ;;  %v11910_v23 = vld [vmem:[#allocation3 + $0x80] sm:$0xff]  ;;  %3984 = vst.msk [vmem:[#allocation3 + $0xa9] sm:$0xff] %vm3915_vm3, %v3895_v37  ;;  %v3898_v6 = vmax.f32 %v3866_v60, 0.0  ;;  %v3865_v53 = vadd.f32 %v11676_v51, %v3826_v54  ;;  %v3829_v24 = vadd.f32 %v9380_v18, %v3439_v48  ;;  %9421 = vmatprep.mubr.msk.f32.mxu1 %vm3915_vm3, %v11906_v56  ;;  %v2661_v52 = vadd.f32 %v13656_v35, %v2271_v57 }
 0x220   : > { %13653 = vst [vmem:[#allocation79_spill] sm:$0xff] %v11908_v8  ;;  %13654 = vst [vmem:[#allocation82_spill] sm:$0xff] %v11910_v23  ;;  %v13655_v30 = vld [vmem:[#allocation95_spill] sm:$0xff]  ;;  %9473 = vmatprep.mubr.msk.f32.mxu0 %vm3915_vm3, %v11908_v8  ;;  %v13657_v25 = vld [vmem:[#allocation60_spill] sm:$0xff]  ;;  %v3733_v41 = vpop.f32.mrf.mxu0  ;;  %9422 = vmatmul.mubr.msk.f32.gmra.mxu1 %vm3915_vm3, %v11919_v34  ;;  %v3441_v48 = vadd.f32 %v11705_v17, %v3051_v43 }
 0x221   : > { %v3050_v44 = vadd.f32 %v13655_v30, %v2659_v32  ;;  %v2273_v61 = vadd.f32 %v13657_v25, %v1883_v39  ;;  %v13658_v33 = vld [vmem:[#allocation96_spill] sm:$0xff]  ;;  %9474 = vmatmul.mubr.msk.f32.gmra.mxu0 %vm3915_vm3, %v11910_v23  ;;  %3987 = vst.msk [vmem:[#allocation3 + $0xc9] sm:$0xff] %vm3915_vm3, %v3898_v6  ;;  %v3897_v37 = vmax.f32 %v3865_v53, 0.0  ;;  %v3868_v57 = vadd.f32 %v11676_v51, %v3829_v24  ;;  %v13659_v54 = vld [vmem:[#allocation25_spill] sm:$0xff]  ;;  %v13660_v39 = vld [vmem:[#allocation26_spill] sm:$0xff] }
 0x222   : > { %v3053_v32 = vadd.f32 %v13658_v33, %v2662_v11  ;;  %v3828_v60 = vadd.f32 %v3733_v41, %v3438_v38  ;;  %v1885_v46 = vadd.f32 %v13659_v54, %v1495_v58  ;;  %v1497_v42 = vadd.f32 %v13660_v39, %v11742_v62  ;;  %v13661_v4 = vld [vmem:[#allocation59_spill] sm:$0xff]  ;;  %v13663_v18 = vld [vmem:[#allocation97_spill] sm:$0xff]  ;;  %v9383_v35 = vpop.f32.mrf.mxu0  ;;  %v13668_v33 = vld [vmem:[#allocation64_spill] sm:$0xff] }
 0x223   : > { %v2664_v11 = vadd.f32 %v13662_v15, %v13661_v4  ;;  %v3052_v30 = vadd.f32 %v13663_v18, %v2661_v52  ;;  %v11939_v25 = vld [vmem:[#allocation3 + $0x91] sm:$0xff]  ;;  %v3440_v6 = vadd.f32 %v11729_v63, %v3050_v44  ;;  %3986 = vst.msk [vmem:[#allocation3 + $0xc1] sm:$0xff] %vm3915_vm3, %v3897_v37  ;;  %v3900_v58 = vmax.f32 %v3868_v57, 0.0  ;;  %v11952_v53 = vld [vmem:[#allocation3 + $0x99] sm:$0xff]  ;;  %v13667_v24 = vld [vmem:[#allocation61_spill] sm:$0xff]  ;;  %v11957_v44 = vpop.f32.mrf.mxu1 }
 0x224   : > { %v11941_v17 = vld [vmem:[#allocation3 + $0x90] sm:$0xff]  ;;  %v11943_v43 = vld [vmem:[#allocation3 + $0x98] sm:$0xff]  ;;  %v3867_v38 = vadd.f32 %v11676_v51, %v3828_v60  ;;  %v3831_v62 = vadd.f32 %v9383_v35, %v3441_v48  ;;  %9424 = vmatprep.mubr.msk.f32.mxu1 %vm3915_vm3, %v11939_v25  ;;  %13666 = vst [vmem:[#allocation13_spill] sm:$0xff] %v11952_v53  ;;  %v2663_v52 = vadd.f32 %v13667_v24, %v2273_v61  ;;  %v3743_v37 = vpop.f32.mrf.mxu0 }
 0x225   : > { %13664 = vst [vmem:[#allocation34_spill] sm:$0xff] %v11941_v17  ;;  %13665 = vst [vmem:[#allocation7_spill] sm:$0xff] %v11943_v43  ;;  %9476 = vmatprep.mubr.msk.f32.mxu0 %vm3915_vm3, %v11941_v17  ;;  %v2275_v41 = vadd.f32 %v13668_v33, %v1885_v46  ;;  %v3443_v63 = vadd.f32 %v11759_v27, %v3053_v32  ;;  %9425 = vmatmul.mubr.msk.f32.gmra.mxu1 %vm3915_vm3, %v11952_v53  ;;  %v13669_v48 = vld [vmem:[#allocation98_spill] sm:$0xff]  ;;  %v13670_v46 = vld [vmem:[#allocation27_spill] sm:$0xff] }
 0x226   : > { %9477 = vmatmul.mubr.msk.f32.gmra.mxu0 %vm3915_vm3, %v11943_v43  ;;  %v3055_v57 = vadd.f32 %v13669_v48, %v2664_v11  ;;  %3989 = vst.msk [vmem:[#allocation3 + $0xe1] sm:$0xff] %vm3915_vm3, %v3900_v58  ;;  %v3899_v60 = vmax.f32 %v3867_v38, 0.0  ;;  %v3870_v61 = vadd.f32 %v11676_v51, %v3831_v62  ;;  %v3830_v54 = vadd.f32 %v3743_v37, %v3440_v6  ;;  %v13671_v27 = vld [vmem:[#allocation28_spill] sm:$0xff]  ;;  %v13672_v4 = vld [vmem:[#allocation63_spill] sm:$0xff]  ;;  %v13673_v15 = vld [vmem:[#allocation62_spill] sm:$0xff]  ;;  %v9386_v24 = vpop.f32.mrf.mxu0 }
 0x227   : > { %v1887_v39 = vadd.f32 %v13670_v46, %v1497_v42  ;;  %v1499_v32 = vadd.f32 %v13671_v27, %v11754_v21  ;;  %v2666_v18 = vadd.f32 %v13673_v15, %v13672_v4  ;;  %v3442_v35 = vadd.f32 %v11791_v2, %v3052_v30  ;;  %v11972_v33 = vld [vmem:[#allocation3 + $0xa9] sm:$0xff]  ;;  %v13677_v38 = vld [vmem:[#allocation100_spill] sm:$0xff]  ;;  %v11985_v2 = vld [vmem:[#allocation3 + $0xb1] sm:$0xff]  ;;  %v11990_v4 = vpop.f32.mrf.mxu1 }
 0x228   : > { %13674 = vst [vmem:[#allocation12_spill] sm:$0xff] %v11972_v33  ;;  %v11974_v11 = vld [vmem:[#allocation3 + $0xa8] sm:$0xff]  ;;  %v11976_v58 = vld [vmem:[#allocation3 + $0xb0] sm:$0xff]  ;;  %v3054_v62 = vadd.f32 %v13677_v38, %v2663_v52  ;;  %3988 = vst.msk [vmem:[#allocation3 + $0xd9] sm:$0xff] %vm3915_vm3, %v3899_v60  ;;  %v3902_v42 = vmax.f32 %v3870_v61, 0.0  ;;  %v3869_v6 = vadd.f32 %v11676_v51, %v3830_v54  ;;  %v3833_v21 = vadd.f32 %v9386_v24, %v3443_v63  ;;  %v3753_v60 = vpop.f32.mrf.mxu0 }
 0x229   : > { %13675 = vst [vmem:[#allocation35_spill] sm:$0xff] %v11974_v11  ;;  %13676 = vst [vmem:[#allocation32_spill] sm:$0xff] %v11976_v58  ;;  %9427 = vmatprep.mubr.msk.f32.mxu1 %vm3915_vm3, %v11972_v33  ;;  %9479 = vmatprep.mubr.msk.f32.mxu0 %vm3915_vm3, %v11974_v11  ;;  %v13679_v30 = vld [vmem:[#allocation65_spill] sm:$0xff]  ;;  %v13680_v48 = vld [vmem:[#allocation68_spill] sm:$0xff]  ;;  %v3445_v63 = vadd.f32 %v11825_v55, %v3055_v57  ;;  %v3832_v54 = vadd.f32 %v3753_v60, %v3442_v35 }
 0x22a   : > { %13678 = vst [vmem:[#allocation80_spill] sm:$0xff] %v11985_v2  ;;  %v2665_v37 = vadd.f32 %v13679_v30, %v2275_v41  ;;  %v2277_v46 = vadd.f32 %v13680_v48, %v1887_v39  ;;  %v13681_v27 = vld [vmem:[#allocation101_spill] sm:$0xff]  ;;  %9428 = vmatmul.mubr.msk.f32.gmra.mxu1 %vm3915_vm3, %v11985_v2  ;;  %9480 = vmatmul.mubr.msk.f32.gmra.mxu0 %vm3915_vm3, %v11976_v58  ;;  %3991 = vst.msk [vmem:[#allocation3 + $0xf9] sm:$0xff] %vm3915_vm3, %v3902_v42  ;;  %v3901_v61 = vmax.f32 %v3869_v6, 0.0  ;;  %v13684_v38 = vld [vmem:[#allocation67_spill] sm:$0xff]  ;;  %v9389_v33 = vpop.f32.mrf.mxu0 }
 0x22b   : > { %v3057_v52 = vadd.f32 %v13681_v27, %v2666_v18  ;;  %v3872_v41 = vadd.f32 %v11676_v51, %v3833_v21  ;;  %v13682_v39 = vld [vmem:[#allocation29_spill] sm:$0xff]  ;;  %v13683_v18 = vld [vmem:[#allocation30_spill] sm:$0xff]  ;;  %v3444_v42 = vadd.f32 %v11858_v59, %v3054_v62  ;;  %v3871_v35 = vadd.f32 %v11676_v51, %v3832_v54  ;;  %v13691_v60 = vld [vmem:[#allocation72_spill] sm:$0xff]  ;;  %v9348_v62 = vpop.f32.mrf.mxu1 }
 0x22c   : > { %v1889_v15 = vadd.f32 %v13682_v39, %v1499_v32  ;;  %v1501_v24 = vadd.f32 %v13683_v18, %v11766_v29  ;;  %v13685_v30 = vld [vmem:[#allocation66_spill] sm:$0xff]  ;;  %v12005_v53 = vld [vmem:[#allocation3 + $0xc1] sm:$0xff]  ;;  %3990 = vst.msk [vmem:[#allocation3 + $0xf1] sm:$0xff] %vm3915_vm3, %v3901_v61  ;;  %v3835_v29 = vadd.f32 %v9389_v33, %v3445_v63  ;;  %v3763_v61 = vpop.f32.mrf.mxu0  ;;  %v13692_v33 = vld [vmem:[#allocation103_spill] sm:$0xff] }
 0x22d   : > { %v2668_v48 = vadd.f32 %v13685_v30, %v13684_v38  ;;  %v13686_v27 = vld [vmem:[#allocation102_spill] sm:$0xff]  ;;  %v12007_v55 = vld [vmem:[#allocation3 + $0xc0] sm:$0xff]  ;;  %v3904_v32 = vmax.f32 %v3872_v41, 0.0  ;;  %9430 = vmatprep.mubr.msk.f32.mxu1 %vm3915_vm3, %v12005_v53  ;;  %v3447_v59 = vadd.f32 %v11891_v36, %v3057_v52  ;;  %v3903_v41 = vmax.f32 %v3871_v35, 0.0  ;;  %v13693_v18 = vld [vmem:[#allocation31_spill] sm:$0xff] }
 0x22e   : > { %v3056_v2 = vadd.f32 %v13686_v27, %v2665_v37  ;;  %13687 = vst [vmem:[#allocation85_spill] sm:$0xff] %v12007_v55  ;;  %v12009_v57 = vld [vmem:[#allocation3 + $0xc8] sm:$0xff]  ;;  %9482 = vmatprep.mubr.msk.f32.mxu0 %vm3915_vm3, %v12007_v55  ;;  %v2279_v39 = vadd.f32 %v13691_v60, %v1889_v15  ;;  %v3874_v54 = vadd.f32 %v11676_v51, %v3835_v29  ;;  %v13694_v38 = vld [vmem:[#allocation71_spill] sm:$0xff]  ;;  %v9392_v27 = vpop.f32.mrf.mxu0  ;;  %v13699_v29 = vld [vmem:[#allocation76_spill] sm:$0xff] }
 0x22f   : > { %13688 = vst [vmem:[#allocation8_spill] sm:$0xff] %v12009_v57  ;;  %v12018_v6 = vld [vmem:[#allocation3 + $0xc9] sm:$0xff]  ;;  %9483 = vmatmul.mubr.msk.f32.gmra.mxu0 %vm3915_vm3, %v12009_v57  ;;  %v3059_v63 = vadd.f32 %v13692_v33, %v2668_v48  ;;  %3993 = vst.msk [vmem:[#allocation3 + $0x111] sm:$0xff] %vm3915_vm3, %v3904_v32  ;;  %v1891_v15 = vadd.f32 %v13693_v18, %v1501_v24  ;;  %v12036_v60 = vld [vmem:[#allocation3 + $0xd8] sm:$0xff]  ;;  %v3837_v24 = vadd.f32 %v9392_v27, %v3447_v59 }
 0x230   : > { %13689 = vst [vmem:[#allocation9_spill] sm:$0xff] %v12018_v6  ;;  %v13690_v21 = vld [vmem:[#allocation69_spill] sm:$0xff]  ;;  %9431 = vmatmul.mubr.msk.f32.gmra.mxu1 %vm3915_vm3, %v12018_v6  ;;  %v13695_v36 = vld [vmem:[#allocation70_spill] sm:$0xff]  ;;  %v3446_v30 = vadd.f32 %v11924_v12, %v3056_v2  ;;  %13696 = vst [vmem:[#allocation37_spill] sm:$0xff] %v12036_v60  ;;  %v3906_v32 = vmax.f32 %v3874_v54, 0.0  ;;  %9485 = vmatprep.mubr.msk.f32.mxu0 %vm3915_vm3, %v12036_v60 }
 0x231   : > { %v2667_v37 = vadd.f32 %v13690_v21, %v2277_v46  ;;  %v3834_v46 = vadd.f32 %v3763_v61, %v3444_v42  ;;  %v2670_v52 = vadd.f32 %v13695_v36, %v13694_v38  ;;  %v12034_v21 = vld [vmem:[#allocation3 + $0xd9] sm:$0xff]  ;;  %3992 = vst.msk [vmem:[#allocation3 + $0x109] sm:$0xff] %vm3915_vm3, %v3903_v41  ;;  %v12047_v12 = vld [vmem:[#allocation3 + $0xe1] sm:$0xff]  ;;  %v2281_v61 = vadd.f32 %v13699_v29, %v1891_v15  ;;  %v3773_v41 = vpop.f32.mrf.mxu0  ;;  %v13702_v15 = vld [vmem:[#allocation74_spill] sm:$0xff] }
 0x232   : > { %v12038_v6 = vld [vmem:[#allocation3 + $0xe0] sm:$0xff]  ;;  %9433 = vmatprep.mubr.msk.f32.mxu1 %vm3915_vm3, %v12034_v21  ;;  %v3449_v59 = vadd.f32 %v11957_v44, %v3059_v63  ;;  %3995 = vst.msk [vmem:[#allocation3 + $0x129] sm:$0xff] %vm3915_vm3, %v3906_v32  ;;  %v13701_v18 = vld [vmem:[#allocation75_spill] sm:$0xff] }
 0x233   : > { %13697 = vst [vmem:[#allocation40_spill] sm:$0xff] %v12038_v6  ;;  %v3058_v48 = vadd.f32 %v11640_v40, %v2667_v37  ;;  %v3873_v42 = vadd.f32 %v11676_v51, %v3834_v46  ;;  %v13698_v2 = vld [vmem:[#allocation73_spill] sm:$0xff]  ;;  %v3403_v37 = vpop.f32.mrf.mxu1  ;;  %9486 = vmatmul.mubr.msk.f32.gmra.mxu0 %vm3915_vm3, %v12038_v6  ;;  %v3876_v46 = vadd.f32 %v11676_v51, %v3837_v24  ;;  %v12062_v27 = vld [vmem:[#allocation3 + $0xf1] sm:$0xff] }
 0x234   : > { %v2669_v35 = vadd.f32 %v13698_v2, %v2279_v39  ;;  %v13700_v33 = vld [vmem:[#allocation105_spill] sm:$0xff]  ;;  %9434 = vmatmul.mubr.msk.f32.gmra.mxu1 %vm3915_vm3, %v12047_v12  ;;  %v3836_v39 = vadd.f32 %v3773_v41, %v3446_v30  ;;  %v2672_v38 = vadd.f32 %v13702_v15, %v13701_v18  ;;  %v12064_v2 = vld [vmem:[#allocation3 + $0xf0] sm:$0xff]  ;;  %v12066_v29 = vld [vmem:[#allocation3 + $0xf8] sm:$0xff] }
 0x235   : > { %v3061_v40 = vadd.f32 %v13700_v33, %v2670_v52  ;;  %v3905_v54 = vmax.f32 %v3873_v42, 0.0  ;;  %v9395_v52 = vpop.f32.mrf.mxu0  ;;  %13703 = vst [vmem:[#allocation88_spill] sm:$0xff] %v12064_v2  ;;  %13704 = vst [vmem:[#allocation81_spill] sm:$0xff] %v12066_v29  ;;  %v3448_v44 = vadd.f32 %v11990_v4, %v3058_v48  ;;  %v3908_v63 = vmax.f32 %v3876_v46, 0.0  ;;  %9436 = vmatprep.mubr.msk.f32.mxu1 %vm3915_vm3, %v12062_v27  ;;  %v13705_v42 = vld [vmem:[#allocation77_spill] sm:$0xff]  ;;  %v9351_v33 = vpop.f32.mrf.mxu1 }
 0x236   : > { %v3060_v36 = vadd.f32 %v11651_v28, %v2669_v35  ;;  %v3875_v32 = vadd.f32 %v11676_v51, %v3836_v39  ;;  %v3839_v30 = vadd.f32 %v9395_v52, %v3449_v59  ;;  %9488 = vmatprep.mubr.msk.f32.mxu0 %vm3915_vm3, %v12064_v2  ;;  %v12075_v28 = vld [vmem:[#allocation3 + $0xf9] sm:$0xff]  ;;  %v2671_v24 = vadd.f32 %v13705_v42, %v2281_v61 }
 0x237   : > { %3994 = vst.msk [vmem:[#allocation3 + $0x121] sm:$0xff] %vm3915_vm3, %v3905_v54  ;;  %v3451_v35 = vadd.f32 %v9348_v62, %v3061_v40  ;;  %v3783_v41 = vpop.f32.mrf.mxu0  ;;  %9489 = vmatmul.mubr.msk.f32.gmra.mxu0 %vm3915_vm3, %v12066_v29  ;;  %v3063_v4 = vadd.f32 %v11657_v50, %v2672_v38  ;;  %3997 = vst.msk [vmem:[#allocation3 + $0x141] sm:$0xff] %vm3915_vm3, %v3908_v63 }
 0x238   : > { %9437 = vmatmul.mubr.msk.f32.gmra.mxu1 %vm3915_vm3, %v12075_v28  ;;  %v3907_v48 = vmax.f32 %v3875_v32, 0.0  ;;  %v3878_v59 = vadd.f32 %v11676_v51, %v3839_v30  ;;  %v3838_v54 = vadd.f32 %v3783_v41, %v3448_v44  ;;  %v3450_v46 = vadd.f32 %v3403_v37, %v3060_v36  ;;  %v12085_v61 = vld [vmem:[#allocation3 + $0x109] sm:$0xff]  ;;  %v12098_v37 = vld [vmem:[#allocation3 + $0x111] sm:$0xff]  ;;  %v3413_v36 = vpop.f32.mrf.mxu1 }
 0x239   : > { %v9398_v39 = vpop.f32.mrf.mxu0  ;;  %v12087_v62 = vld [vmem:[#allocation3 + $0x108] sm:$0xff]  ;;  %v12089_v40 = vld [vmem:[#allocation3 + $0x110] sm:$0xff]  ;;  %v3062_v18 = vadd.f32 %v11664_v16, %v2671_v24  ;;  %9439 = vmatprep.mubr.msk.f32.mxu1 %vm3915_vm3, %v12085_v61  ;;  %v3453_v16 = vadd.f32 %v9351_v33, %v3063_v4 }
 0x23a   : > { %13706 = vst [vmem:[#allocation10_spill] sm:$0xff] %v12087_v62  ;;  %13707 = vst [vmem:[#allocation11_spill] sm:$0xff] %v12089_v40  ;;  %v3910_v15 = vmax.f32 %v3878_v59, 0.0  ;;  %v3877_v50 = vadd.f32 %v11676_v51, %v3838_v54  ;;  %v3841_v38 = vadd.f32 %v9398_v39, %v3451_v35  ;;  %9491 = vmatprep.mubr.msk.f32.mxu0 %vm3915_vm3, %v12087_v62  ;;  %v12118_v4 = vld [vmem:[#allocation3 + $0x129] sm:$0xff] }
 0x23b   : > { %3996 = vst.msk [vmem:[#allocation3 + $0x139] sm:$0xff] %vm3915_vm3, %v3907_v48  ;;  %v3793_v52 = vpop.f32.mrf.mxu0  ;;  %9492 = vmatmul.mubr.msk.f32.gmra.mxu0 %vm3915_vm3, %v12089_v40  ;;  %v3452_v41 = vadd.f32 %v3413_v36, %v3062_v18 }
 0x23c   : > { %9440 = vmatmul.mubr.msk.f32.gmra.mxu1 %vm3915_vm3, %v12098_v37  ;;  %3999 = vst.msk [vmem:[#allocation3 + $0x159] sm:$0xff] %vm3915_vm3, %v3910_v15  ;;  %v3909_v44 = vmax.f32 %v3877_v50, 0.0  ;;  %v3880_v63 = vadd.f32 %v11676_v51, %v3841_v38  ;;  %v3840_v32 = vadd.f32 %v3793_v52, %v3450_v46 }
 0x23d   : > { %v9401_v30 = vpop.f32.mrf.mxu0 }
 0x23e   : > { %v12106_v42 = vld [vmem:[#allocation3 + $0x121] sm:$0xff]  ;;  %3998 = vst.msk [vmem:[#allocation3 + $0x151] sm:$0xff] %vm3915_vm3, %v3909_v44  ;;  %v3912_v48 = vmax.f32 %v3880_v63, 0.0  ;;  %v3879_v59 = vadd.f32 %v11676_v51, %v3840_v32  ;;  %v3843_v33 = vadd.f32 %v9401_v30, %v3453_v16 }
 0x23f   : > { %v12108_v24 = vld [vmem:[#allocation3 + $0x120] sm:$0xff]  ;;  %v12110_v35 = vld [vmem:[#allocation3 + $0x128] sm:$0xff]  ;;  %9442 = vmatprep.mubr.msk.f32.mxu1 %vm3915_vm3, %v12106_v42  ;;  %v3803_v54 = vpop.f32.mrf.mxu0 }
 0x240   : > { %13708 = vst [vmem:[#allocation15_spill] sm:$0xff] %v12108_v24  ;;  %13709 = vst [vmem:[#allocation14_spill] sm:$0xff] %v12110_v35  ;;  %9494 = vmatprep.mubr.msk.f32.mxu0 %vm3915_vm3, %v12108_v24  ;;  %9443 = vmatmul.mubr.msk.f32.gmra.mxu1 %vm3915_vm3, %v12118_v4  ;;  %v3911_v46 = vmax.f32 %v3879_v59, 0.0  ;;  %v3882_v39 = vadd.f32 %v11676_v51, %v3843_v33  ;;  %v3842_v18 = vadd.f32 %v3803_v54, %v3452_v41  ;;  %v12138_v16 = vld [vmem:[#allocation3 + $0x141] sm:$0xff] }
 0x241   : > { %9495 = vmatmul.mubr.msk.f32.gmra.mxu0 %vm3915_vm3, %v12110_v35  ;;  %4001 = vst.msk [vmem:[#allocation3 + $0x171] sm:$0xff] %vm3915_vm3, %v3912_v48  ;;  %v4715_v41 = vld [vmem:[#allocation3 + $0x2] sm:$0xff] }
 0x242   : > { %v12126_v15 = vld [vmem:[#allocation3 + $0x139] sm:$0xff]  ;;  %4000 = vst.msk [vmem:[#allocation3 + $0x169] sm:$0xff] %vm3915_vm3, %v3911_v46  ;;  %v3914_v36 = vmax.f32 %v3882_v39, 0.0  ;;  %v3881_v52 = vadd.f32 %v11676_v51, %v3842_v18  ;;  %v4716_v46 = vld [vmem:[#allocation3 + $0xa] sm:$0xff] }
 0x243   : > { %v12128_v50 = vld [vmem:[#allocation3 + $0x138] sm:$0xff]  ;;  %v12130_v38 = vld [vmem:[#allocation3 + $0x140] sm:$0xff]  ;;  %9445 = vmatprep.mubr.msk.f32.mxu1 %vm3915_vm3, %v12126_v15  ;;  %v8168_v39 = vld [vmem:[%s13356_s3 + $0x40] sm:$0xff] }
 0x244   : > { %13710 = vst [vmem:[#allocation39_spill] sm:$0xff] %v12128_v50  ;;  %13711 = vst [vmem:[#allocation38_spill] sm:$0xff] %v12130_v38  ;;  %9497 = vmatprep.mubr.msk.f32.mxu0 %vm3915_vm3, %v12128_v50  ;;  %9446 = vmatmul.mubr.msk.f32.gmra.mxu1 %vm3915_vm3, %v12138_v16  ;;  %v3913_v44 = vmax.f32 %v3881_v52, 0.0  ;;  %v12156_v30 = vld [vmem:[#allocation3 + $0x159] sm:$0xff] }
 0x245   : > { %9498 = vmatmul.mubr.msk.f32.gmra.mxu0 %vm3915_vm3, %v12130_v38  ;;  %4003 = vst.msk [vmem:[#allocation3 + $0x189] sm:$0xff] %vm3915_vm3, %v3914_v36  ;;  %v12145_v63 = vld [vmem:[#allocation3 + $0x151] sm:$0xff]  ;;  %v9460_v36 = vpop.f32.mrf.mxu0  ;;  %v12187_v52 = vld [vmem:[#allocation3 + $0x1a] sm:$0xff] }
 0x246   : > { %v12147_v51 = vld [vmem:[#allocation3 + $0x150] sm:$0xff]  ;;  %v12149_v32 = vld [vmem:[#allocation3 + $0x158] sm:$0xff]  ;;  %4002 = vst.msk [vmem:[#allocation3 + $0x181] sm:$0xff] %vm3915_vm3, %v3913_v44  ;;  %9448 = vmatprep.mubr.msk.f32.mxu1 %vm3915_vm3, %v12145_v63 }
 0x247   : > { %13712 = vst [vmem:[#allocation91_spill] sm:$0xff] %v12147_v51  ;;  %13713 = vst [vmem:[#allocation83_spill] sm:$0xff] %v12149_v32  ;;  %9500 = vmatprep.mubr.msk.f32.mxu0 %vm3915_vm3, %v12147_v51 }
 0x248   : > { %9449 = vmatmul.mubr.msk.f32.gmra.mxu1 %vm3915_vm3, %v12156_v30  ;;  %v12172_v54 = vld [vmem:[#allocation3 + $0x171] sm:$0xff] }
 0x249   : > { %9501 = vmatmul.mubr.msk.f32.gmra.mxu0 %vm3915_vm3, %v12149_v32  ;;  %v12162_v48 = vld [vmem:[#allocation3 + $0x169] sm:$0xff]  ;;  %13715 = vst [vmem:[#allocation44_spill] sm:$0xff] %v12172_v54 }
 0x24a   : > { %v12164_v59 = vld [vmem:[#allocation3 + $0x168] sm:$0xff]  ;;  %v12166_v33 = vld [vmem:[#allocation3 + $0x170] sm:$0xff]  ;;  %9451 = vmatprep.mubr.msk.f32.mxu1 %vm3915_vm3, %v12162_v48 }
 0x24b   : > { %13714 = vst [vmem:[#allocation41_spill] sm:$0xff] %v12164_v59  ;;  %9503 = vmatprep.mubr.msk.f32.mxu0 %vm3915_vm3, %v12164_v59 }
 0x24c   : > { %9452 = vmatmul.mubr.msk.f32.gmra.mxu1 %vm3915_vm3, %v12172_v54  ;;  %v13717_v54 = vld [vmem:[#allocation78_spill] sm:$0xff] }
 0x24d   : > { %9504 = vmatmul.mubr.msk.f32.gmra.mxu0 %vm3915_vm3, %v12166_v33  ;;  %9510 = vmatprep.mubr.msk.f32.mxu1 %vm3915_vm3, %v4715_v41  ;;  %v9408_v18 = vpop.f32.mrf.mxu1  ;;  %v12205_v41 = vld [vmem:[%s13356_s3 + $0x68] sm:$0xff] }
 0x24e   : > { %9562 = vmatprep.mubr.msk.f32.mxu0 %vm3915_vm3, %v11775_v49  ;;  %v12189_v44 = vadd.f32 %v9460_v36, %v9408_v18  ;;  %v12196_v49 = vld [vmem:[#allocation3 + $0x22] sm:$0xff]  ;;  %v12236_v18 = vld [vmem:[#allocation3 + $0x52] sm:$0xff] }
 0x24f   : > { %v12242_v36 = vld [vmem:[#allocation3 + $0x62] sm:$0xff] }
 0x250   : > { %9511 = vmatmul.mubr.msk.f32.vlgmr.msra.gmra.mxu1 %vm3915_vm3, %v4716_v46  ;;  %13716 = vst [vmem:[#allocation84_spill] sm:$0xff] %v12189_v44  ;;  %v12223_v46 = vld [vmem:[%s13356_s3 + $0x78] sm:$0xff]  ;;  %v12254_v44 = vld [vmem:[#allocation3 + $0x7a] sm:$0xff] }
 0x251   : > { %9563 = vmatmul.mubr.msk.f32.vlgmr.msra.gmra.mxu0 %vm3915_vm3, %v11777_v31  ;;  %9611 = vmatpush3.msra.mxu1 %v13717_v54  ;;  %v8202_v31 = vld [vmem:[%s13356_s3 + $0x50] sm:$0xff]  ;;  %v12211_v54 = vld [vmem:[#allocation3 + $0x32] sm:$0xff] }
 0x252   : > { %9513 = vmatprep.mubr.msk.f32.mxu1 %vm3915_vm3, %v12187_v52  ;;  %9565 = vmatprep.mubr.msk.f32.mxu0 %vm3915_vm3, %v11809_v14 }
 0x253   : > { %9612 = vmatprep.subr.mxu1 %v8168_v39  ;;  %9663 = vmatpush3.msra.mxu0 %v11734_v7  ;;  %v12218_v7 = vld [vmem:[#allocation3 + $0x3a] sm:$0xff] }
 0x254   : > { %9613 = vmatpush3.msra.mxu1 %v8168_v39  ;;  %9664 = vmatprep.subr.mxu0 %v8202_v31  ;;  %v12229_v39 = vld [vmem:[#allocation3 + $0x4a] sm:$0xff] }
 0x255   : > { %9514 = vmatmul.mubr.msk.f32.gmra.mxu1 %vm3915_vm3, %v12196_v49  ;;  %9566 = vmatmul.mubr.msk.f32.gmra.mxu0 %vm3915_vm3, %v11811_v0 }
 0x256   : > { %9516 = vmatprep.mubr.msk.f32.mxu1 %vm3915_vm3, %v12211_v54  ;;  %9568 = vmatprep.mubr.msk.f32.mxu0 %vm3915_vm3, %v11842_v3 }
 0x257   : > { %9714 = vmatprep.subr.mxu1 %v12205_v41  ;;  %9665 = vmatpush3.msra.mxu0 %v8202_v31  ;;  %v12248_v31 = vld [vmem:[#allocation3 + $0x6a] sm:$0xff] }
 0x258   : > { %9766 = vmatprep.subr.mxu0 %v12223_v46 }
 0x259   : > { %9517 = vmatmul.mubr.msk.f32.gmra.mxu1 %vm3915_vm3, %v12218_v7  ;;  %9569 = vmatmul.mubr.msk.f32.gmra.mxu0 %vm3915_vm3, %v11844_v1 }
 0x25a   : > { %9519 = vmatprep.mubr.msk.f32.mxu1 %vm3915_vm3, %v12229_v39  ;;  %9571 = vmatprep.mubr.msk.f32.mxu0 %vm3915_vm3, %v11875_v10  ;;  %v12376_v10 = vld [vmem:[#allocation3 + $0x180] sm:$0xff] }
 0x25b   : > { %13718 = vst [vmem:[#allocation94_spill] sm:$0xff] %v12376_v10 }
 0x25d   : > { %9520 = vmatmul.mubr.msk.f32.gmra.mxu1 %vm3915_vm3, %v12236_v18  ;;  %9572 = vmatmul.mubr.msk.f32.gmra.mxu0 %vm3915_vm3, %v11877_v26  ;;  %v12260_v26 = vld [vmem:[#allocation3 + $0x82] sm:$0xff] }
 0x25e   : > { %9522 = vmatprep.mubr.msk.f32.mxu1 %vm3915_vm3, %v12242_v36  ;;  %9574 = vmatprep.mubr.msk.f32.mxu0 %vm3915_vm3, %v11908_v8  ;;  %v12266_v8 = vld [vmem:[#allocation3 + $0x92] sm:$0xff] }
 0x261   : > { %9523 = vmatmul.mubr.msk.f32.gmra.mxu1 %vm3915_vm3, %v12248_v31  ;;  %9575 = vmatmul.mubr.msk.f32.gmra.mxu0 %vm3915_vm3, %v11910_v23  ;;  %v12272_v23 = vld [vmem:[#allocation3 + $0x9a] sm:$0xff] }
 0x262   : > { %9525 = vmatprep.mubr.msk.f32.mxu1 %vm3915_vm3, %v12254_v44  ;;  %9577 = vmatprep.mubr.msk.f32.mxu0 %vm3915_vm3, %v11941_v17  ;;  %v12278_v17 = vld [vmem:[#allocation3 + $0xaa] sm:$0xff] }
 0x265   : > { %9526 = vmatmul.mubr.msk.f32.gmra.mxu1 %vm3915_vm3, %v12260_v26  ;;  %9578 = vmatmul.mubr.msk.f32.gmra.mxu0 %vm3915_vm3, %v11943_v43  ;;  %v12284_v43 = vld [vmem:[#allocation3 + $0xb2] sm:$0xff] }
 0x266   : > { %9528 = vmatprep.mubr.msk.f32.mxu1 %vm3915_vm3, %v12266_v8  ;;  %9580 = vmatprep.mubr.msk.f32.mxu0 %vm3915_vm3, %v11974_v11  ;;  %v12290_v11 = vld [vmem:[#allocation3 + $0xc2] sm:$0xff] }
 0x269   : > { %9529 = vmatmul.mubr.msk.f32.gmra.mxu1 %vm3915_vm3, %v12272_v23  ;;  %9581 = vmatmul.mubr.msk.f32.gmra.mxu0 %vm3915_vm3, %v11976_v58  ;;  %v12296_v58 = vld [vmem:[#allocation3 + $0xca] sm:$0xff] }
 0x26a   : > { %9531 = vmatprep.mubr.msk.f32.mxu1 %vm3915_vm3, %v12278_v17  ;;  %9583 = vmatprep.mubr.msk.f32.mxu0 %vm3915_vm3, %v12007_v55  ;;  %v12302_v55 = vld [vmem:[#allocation3 + $0xda] sm:$0xff] }
 0x26d   : > { %9532 = vmatmul.mubr.msk.f32.gmra.mxu1 %vm3915_vm3, %v12284_v43  ;;  %9584 = vmatmul.mubr.msk.f32.gmra.mxu0 %vm3915_vm3, %v12009_v57  ;;  %v12308_v57 = vld [vmem:[#allocation3 + $0xe2] sm:$0xff] }
 0x26e   : > { %9534 = vmatprep.mubr.msk.f32.mxu1 %vm3915_vm3, %v12290_v11  ;;  %9586 = vmatprep.mubr.msk.f32.mxu0 %vm3915_vm3, %v12036_v60  ;;  %v12314_v60 = vld [vmem:[#allocation3 + $0xf2] sm:$0xff] }
 0x271   : > { %9535 = vmatmul.mubr.msk.f32.gmra.mxu1 %vm3915_vm3, %v12296_v58  ;;  %9587 = vmatmul.mubr.msk.f32.gmra.mxu0 %vm3915_vm3, %v12038_v6  ;;  %v12320_v6 = vld [vmem:[#allocation3 + $0xfa] sm:$0xff] }
 0x272   : > { %9537 = vmatprep.mubr.msk.f32.mxu1 %vm3915_vm3, %v12302_v55  ;;  %9589 = vmatprep.mubr.msk.f32.mxu0 %vm3915_vm3, %v12064_v2  ;;  %v12326_v2 = vld [vmem:[#allocation3 + $0x10a] sm:$0xff] }
 0x275   : > { %9538 = vmatmul.mubr.msk.f32.gmra.mxu1 %vm3915_vm3, %v12308_v57  ;;  %9590 = vmatmul.mubr.msk.f32.gmra.mxu0 %vm3915_vm3, %v12066_v29  ;;  %v12332_v29 = vld [vmem:[#allocation3 + $0x112] sm:$0xff] }
 0x276   : > { %9540 = vmatprep.mubr.msk.f32.mxu1 %vm3915_vm3, %v12314_v60  ;;  %9592 = vmatprep.mubr.msk.f32.mxu0 %vm3915_vm3, %v12087_v62  ;;  %v12338_v62 = vld [vmem:[#allocation3 + $0x122] sm:$0xff] }
 0x279   : > { %9541 = vmatmul.mubr.msk.f32.gmra.mxu1 %vm3915_vm3, %v12320_v6  ;;  %9593 = vmatmul.mubr.msk.f32.gmra.mxu0 %vm3915_vm3, %v12089_v40  ;;  %v12344_v40 = vld [vmem:[#allocation3 + $0x12a] sm:$0xff] }
 0x27a   : > { %9543 = vmatprep.mubr.msk.f32.mxu1 %vm3915_vm3, %v12326_v2  ;;  %9595 = vmatprep.mubr.msk.f32.mxu0 %vm3915_vm3, %v12108_v24  ;;  %v12350_v24 = vld [vmem:[#allocation3 + $0x13a] sm:$0xff] }
 0x27d   : > { %9544 = vmatmul.mubr.msk.f32.gmra.mxu1 %vm3915_vm3, %v12332_v29  ;;  %9596 = vmatmul.mubr.msk.f32.gmra.mxu0 %vm3915_vm3, %v12110_v35  ;;  %v12356_v35 = vld [vmem:[#allocation3 + $0x142] sm:$0xff] }
 0x27e   : > { %9546 = vmatprep.mubr.msk.f32.mxu1 %vm3915_vm3, %v12338_v62  ;;  %9598 = vmatprep.mubr.msk.f32.mxu0 %vm3915_vm3, %v12128_v50  ;;  %v12362_v50 = vld [vmem:[#allocation3 + $0x152] sm:$0xff] }
 0x281   : > { %9547 = vmatmul.mubr.msk.f32.gmra.mxu1 %vm3915_vm3, %v12344_v40  ;;  %9599 = vmatmul.mubr.msk.f32.gmra.mxu0 %vm3915_vm3, %v12130_v38  ;;  %v12368_v38 = vld [vmem:[#allocation3 + $0x15a] sm:$0xff] }
 0x282   : > { %9549 = vmatprep.mubr.msk.f32.mxu1 %vm3915_vm3, %v12350_v24  ;;  %9601 = vmatprep.mubr.msk.f32.mxu0 %vm3915_vm3, %v12147_v51  ;;  %v12374_v51 = vld [vmem:[#allocation3 + $0x16a] sm:$0xff] }
 0x285   : > { %9550 = vmatmul.mubr.msk.f32.gmra.mxu1 %vm3915_vm3, %v12356_v35  ;;  %9602 = vmatmul.mubr.msk.f32.gmra.mxu0 %vm3915_vm3, %v12149_v32  ;;  %v12382_v32 = vld [vmem:[#allocation3 + $0x172] sm:$0xff] }
 0x286   : > { %9552 = vmatprep.mubr.msk.f32.mxu1 %vm3915_vm3, %v12362_v50  ;;  %9604 = vmatprep.mubr.msk.f32.mxu0 %vm3915_vm3, %v12164_v59  ;;  %v12384_v59 = vld [vmem:[#allocation3 + $0x188] sm:$0xff] }
 0x289   : > { %9553 = vmatmul.mubr.msk.f32.gmra.mxu1 %vm3915_vm3, %v12368_v38  ;;  %9605 = vmatmul.mubr.msk.f32.gmra.mxu0 %vm3915_vm3, %v12166_v33 }
 0x28a   : > { %9555 = vmatprep.mubr.msk.f32.mxu1 %vm3915_vm3, %v12374_v51  ;;  %9607 = vmatprep.mubr.msk.f32.mxu0 %vm3915_vm3, %v12376_v10  ;;  %v8236_v10 = vld [vmem:[%s13356_s3 + $0x60] sm:$0xff] }
 0x28d   : > { %9556 = vmatmul.mubr.msk.f32.gmra.mxu1 %vm3915_vm3, %v12382_v32  ;;  %9608 = vmatmul.mubr.msk.f32.gmra.mxu0 %vm3915_vm3, %v12384_v59 }
 0x28e   : > { %9614 = vmatprep.mubr.msk.f32.mxu1 %vm3915_vm3, %v11773_v13  ;;  %9666 = vmatprep.mubr.msk.f32.mxu0 %vm3915_vm3, %v12187_v52  ;;  %v8270_v13 = vld [vmem:[%s13356_s3 + $0x70] sm:$0xff] }
 0x28f   : > { %v13720_v52 = vld [vmem:[#allocation13_spill] sm:$0xff] }
 0x291   : > { %9615 = vmatmul.mubr.msk.f32.vlgmr.msra.gmra.mxu1 %vm3915_vm3, %v11786_v45  ;;  %9667 = vmatmul.mubr.msk.f32.vlgmr.msra.gmra.mxu0 %vm3915_vm3, %v12196_v49  ;;  %v12413_v45 = vld [vmem:[%s13356_s3 + $0x88] sm:$0xff] }
 0x292   : > { %9715 = vmatpush3.msra.mxu1 %v12205_v41  ;;  %9617 = vmatprep.mubr.msk.f32.mxu1 %vm3915_vm3, %v11807_v47  ;;  %v13721_v49 = vld [vmem:[#allocation12_spill] sm:$0xff] }
 0x293   : > { %9669 = vmatprep.mubr.msk.f32.mxu0 %vm3915_vm3, %v12211_v54  ;;  %9716 = vmatprep.subr.mxu1 %v8236_v10  ;;  %v13722_v41 = vld [vmem:[#allocation80_spill] sm:$0xff] }
 0x294   : > { %9717 = vmatpush3.msra.mxu1 %v8236_v10  ;;  %9767 = vmatpush3.msra.mxu0 %v12223_v46  ;;  %v13719_v10 = vmov 0.0   ;;  %v13723_v46 = vld [vmem:[#allocation9_spill] sm:$0xff] }
 0x295   : > { %9618 = vmatmul.mubr.msk.f32.gmra.mxu1 %vm3915_vm3, %v11820_v22  ;;  %9670 = vmatmul.mubr.msk.f32.gmra.mxu0 %vm3915_vm3, %v12218_v7 }
 0x296   : > { %9620 = vmatprep.mubr.msk.f32.mxu1 %vm3915_vm3, %v11840_v20  ;;  %9672 = vmatprep.mubr.msk.f32.mxu0 %vm3915_vm3, %v12229_v39 }
 0x297   : > { %9768 = vmatprep.subr.mxu0 %v8270_v13  ;;  %9818 = vmatprep.subr.mxu1 %v12413_v45 }
 0x298   : > { %9769 = vmatpush3.msra.mxu0 %v8270_v13 }
 0x299   : > { %9621 = vmatmul.mubr.msk.f32.gmra.mxu1 %vm3915_vm3, %v11853_v19  ;;  %9673 = vmatmul.mubr.msk.f32.gmra.mxu0 %vm3915_vm3, %v12236_v18 }
 0x29a   : > { %9623 = vmatprep.mubr.msk.f32.mxu1 %vm3915_vm3, %v11873_v9  ;;  %9675 = vmatprep.mubr.msk.f32.mxu0 %vm3915_vm3, %v12242_v36 }
 0x29b   : > { %9870 = vmatprep.subr.mxu0 %v13719_v10 }
 0x29d   : > { %9624 = vmatmul.mubr.msk.f32.gmra.mxu1 %vm3915_vm3, %v11886_v5  ;;  %9676 = vmatmul.mubr.msk.f32.gmra.mxu0 %vm3915_vm3, %v12248_v31 }
 0x29e   : > { %9626 = vmatprep.mubr.msk.f32.mxu1 %vm3915_vm3, %v11906_v56  ;;  %9678 = vmatprep.mubr.msk.f32.mxu0 %vm3915_vm3, %v12254_v44 }
 0x2a1   : > { %9627 = vmatmul.mubr.msk.f32.gmra.mxu1 %vm3915_vm3, %v11919_v34  ;;  %9679 = vmatmul.mubr.msk.f32.gmra.mxu0 %vm3915_vm3, %v12260_v26 }
 0x2a2   : > { %9629 = vmatprep.mubr.msk.f32.mxu1 %vm3915_vm3, %v11939_v25  ;;  %9681 = vmatprep.mubr.msk.f32.mxu0 %vm3915_vm3, %v12266_v8 }
 0x2a5   : > { %9630 = vmatmul.mubr.msk.f32.gmra.mxu1 %vm3915_vm3, %v13720_v52  ;;  %9682 = vmatmul.mubr.msk.f32.gmra.mxu0 %vm3915_vm3, %v12272_v23 }
 0x2a6   : > { %9632 = vmatprep.mubr.msk.f32.mxu1 %vm3915_vm3, %v13721_v49  ;;  %9684 = vmatprep.mubr.msk.f32.mxu0 %vm3915_vm3, %v12278_v17 }
 0x2a9   : > { %9633 = vmatmul.mubr.msk.f32.gmra.mxu1 %vm3915_vm3, %v13722_v41  ;;  %9685 = vmatmul.mubr.msk.f32.gmra.mxu0 %vm3915_vm3, %v12284_v43  ;;  %v13724_v43 = vld [vmem:[#allocation44_spill] sm:$0xff] }
 0x2aa   : > { %9635 = vmatprep.mubr.msk.f32.mxu1 %vm3915_vm3, %v12005_v53  ;;  %9687 = vmatprep.mubr.msk.f32.mxu0 %vm3915_vm3, %v12290_v11 }
 0x2ad   : > { %9636 = vmatmul.mubr.msk.f32.gmra.mxu1 %vm3915_vm3, %v13723_v46  ;;  %9688 = vmatmul.mubr.msk.f32.gmra.mxu0 %vm3915_vm3, %v12296_v58  ;;  %v12525_v58 = vld [vmem:[#allocation3 + $0x181] sm:$0xff] }
 0x2ae   : > { %9638 = vmatprep.mubr.msk.f32.mxu1 %vm3915_vm3, %v12034_v21  ;;  %9690 = vmatprep.mubr.msk.f32.mxu0 %vm3915_vm3, %v12302_v55 }
 0x2b1   : > { %9639 = vmatmul.mubr.msk.f32.gmra.mxu1 %vm3915_vm3, %v12047_v12  ;;  %9691 = vmatmul.mubr.msk.f32.gmra.mxu0 %vm3915_vm3, %v12308_v57  ;;  %v12527_v57 = vld [vmem:[#allocation3 + $0x182] sm:$0xff] }
 0x2b2   : > { %9641 = vmatprep.mubr.msk.f32.mxu1 %vm3915_vm3, %v12062_v27  ;;  %9693 = vmatprep.mubr.msk.f32.mxu0 %vm3915_vm3, %v12314_v60  ;;  %v12535_v60 = vld [vmem:[#allocation3 + $0x18a] sm:$0xff] }
 0x2b5   : > { %9642 = vmatmul.mubr.msk.f32.gmra.mxu1 %vm3915_vm3, %v12075_v28  ;;  %9694 = vmatmul.mubr.msk.f32.gmra.mxu0 %vm3915_vm3, %v12320_v6  ;;  %v12533_v6 = vld [vmem:[#allocation3 + $0x189] sm:$0xff] }
 0x2b6   : > { %9644 = vmatprep.mubr.msk.f32.mxu1 %vm3915_vm3, %v12085_v61  ;;  %9696 = vmatprep.mubr.msk.f32.mxu0 %vm3915_vm3, %v12326_v2  ;;  %v8304_v2 = vld [vmem:[%s13356_s3 + $0x80] sm:$0xff] }
 0x2b9   : > { %9645 = vmatmul.mubr.msk.f32.gmra.mxu1 %vm3915_vm3, %v12098_v37  ;;  %9697 = vmatmul.mubr.msk.f32.gmra.mxu0 %vm3915_vm3, %v12332_v29  ;;  %v12555_v29 = vpop.f32.mrf.mxu1 }
 0x2ba   : > { %9647 = vmatprep.mubr.msk.f32.mxu1 %vm3915_vm3, %v12106_v42  ;;  %9699 = vmatprep.mubr.msk.f32.mxu0 %vm3915_vm3, %v12338_v62 }
 0x2bd   : > { %9648 = vmatmul.mubr.msk.f32.gmra.mxu1 %vm3915_vm3, %v12118_v4  ;;  %9700 = vmatmul.mubr.msk.f32.gmra.mxu0 %vm3915_vm3, %v12344_v40 }
 0x2be   : > { %9650 = vmatprep.mubr.msk.f32.mxu1 %vm3915_vm3, %v12126_v15  ;;  %9702 = vmatprep.mubr.msk.f32.mxu0 %vm3915_vm3, %v12350_v24 }
 0x2c1   : > { %9651 = vmatmul.mubr.msk.f32.gmra.mxu1 %vm3915_vm3, %v12138_v16  ;;  %9703 = vmatmul.mubr.msk.f32.gmra.mxu0 %vm3915_vm3, %v12356_v35 }
 0x2c2   : > { %9653 = vmatprep.mubr.msk.f32.mxu1 %vm3915_vm3, %v12145_v63  ;;  %9705 = vmatprep.mubr.msk.f32.mxu0 %vm3915_vm3, %v12362_v50  ;;  %v13726_v50 = vld [vmem:[#allocation36_spill] sm:$0xff] }
 0x2c5   : > { %9654 = vmatmul.mubr.msk.f32.gmra.mxu1 %vm3915_vm3, %v12156_v30  ;;  %9706 = vmatmul.mubr.msk.f32.gmra.mxu0 %vm3915_vm3, %v12368_v38 }
 0x2c6   : > { %9656 = vmatprep.mubr.msk.f32.mxu1 %vm3915_vm3, %v12162_v48  ;;  %9708 = vmatprep.mubr.msk.f32.mxu0 %vm3915_vm3, %v12374_v51 }
 0x2c9   : > { %9657 = vmatmul.mubr.msk.f32.gmra.mxu1 %vm3915_vm3, %v13724_v43  ;;  %9709 = vmatmul.mubr.msk.f32.gmra.mxu0 %vm3915_vm3, %v12382_v32 }
 0x2ca   : > { %9659 = vmatprep.mubr.msk.f32.mxu1 %vm3915_vm3, %v12525_v58  ;;  %9711 = vmatprep.mubr.msk.f32.mxu0 %vm3915_vm3, %v12527_v57 }
 0x2cd   : > { %9660 = vmatmul.mubr.msk.f32.gmra.mxu1 %vm3915_vm3, %v12533_v6  ;;  %9712 = vmatmul.mubr.msk.f32.gmra.mxu0 %vm3915_vm3, %v12535_v60 }
 0x2ce   : > { %9718 = vmatprep.mubr.msk.f32.mxu1 %vm3915_vm3, %v11809_v14  ;;  %9770 = vmatprep.mubr.msk.f32.mxu0 %vm3915_vm3, %v11807_v47  ;;  %v12557_v14 = vpop.f32.mrf.mxu0 }
 0x2d0   : > { %v9411_v47 = vpop.f32.mrf.mxu1 }
 0x2d1   : > { %9719 = vmatmul.mubr.msk.f32.vlgmr.msra.gmra.mxu1 %vm3915_vm3, %v11811_v0  ;;  %9771 = vmatmul.mubr.msk.f32.vlgmr.msra.gmra.mxu0 %vm3915_vm3, %v11820_v22  ;;  %v9463_v62 = vpop.f32.mrf.mxu0  ;;  %v13725_v22 = vld [vmem:[#allocation33_spill] sm:$0xff] }
 0x2d2   : > { %9819 = vmatpush3.msra.mxu1 %v12413_v45  ;;  %9721 = vmatprep.mubr.msk.f32.mxu1 %vm3915_vm3, %v11842_v3  ;;  %v12565_v0 = vadd.f32 %v9463_v62, %v9411_v47  ;;  %v4245_v3 = vpop.f32.mrf.mxu1  ;;  %v13728_v45 = vld [vmem:[#allocation82_spill] sm:$0xff] }
 0x2d3   : > { %9773 = vmatprep.mubr.msk.f32.mxu0 %vm3915_vm3, %v11840_v20  ;;  %9820 = vmatprep.subr.mxu1 %v8304_v2  ;;  %v4566_v20 = vpop.f32.mrf.mxu0 }
 0x2d4   : > { %9821 = vmatpush3.msra.mxu1 %v8304_v2  ;;  %v12571_v40 = vadd.f32 %v4566_v20, %v4245_v3  ;;  %v9414_v24 = vpop.f32.mrf.mxu1  ;;  %v13729_v2 = vld [vmem:[#allocation34_spill] sm:$0xff]  ;;  %v13730_v20 = vld [vmem:[#allocation7_spill] sm:$0xff] }
 0x2d5   : > { %9722 = vmatmul.mubr.msk.f32.gmra.mxu1 %vm3915_vm3, %v11844_v1  ;;  %9774 = vmatmul.mubr.msk.f32.gmra.mxu0 %vm3915_vm3, %v11853_v19  ;;  %v9466_v35 = vpop.f32.mrf.mxu0  ;;  %v13727_v19 = vld [vmem:[#allocation79_spill] sm:$0xff] }
 0x2d6   : > { %9724 = vmatprep.mubr.msk.f32.mxu1 %vm3915_vm3, %v13725_v22  ;;  %9776 = vmatprep.mubr.msk.f32.mxu0 %vm3915_vm3, %v11873_v9  ;;  %v12577_v1 = vadd.f32 %v9466_v35, %v9414_v24  ;;  %v4255_v9 = vpop.f32.mrf.mxu1  ;;  %v13731_v24 = vld [vmem:[#allocation35_spill] sm:$0xff] }
 0x2d7   : > { %v4576_v38 = vpop.f32.mrf.mxu0 }
 0x2d8   : > { %v12583_v51 = vadd.f32 %v4576_v38, %v4255_v9  ;;  %v9417_v32 = vpop.f32.mrf.mxu1  ;;  %v13732_v38 = vld [vmem:[#allocation32_spill] sm:$0xff] }
 0x2d9   : > { %9725 = vmatmul.mubr.msk.f32.gmra.mxu1 %vm3915_vm3, %v13726_v50  ;;  %9777 = vmatmul.mubr.msk.f32.gmra.mxu0 %vm3915_vm3, %v11886_v5  ;;  %v9469_v13 = vpop.f32.mrf.mxu0 }
 0x2da   : > { %9727 = vmatprep.mubr.msk.f32.mxu1 %vm3915_vm3, %v13727_v19  ;;  %9779 = vmatprep.mubr.msk.f32.mxu0 %vm3915_vm3, %v11906_v56  ;;  %v12589_v5 = vadd.f32 %v9469_v13, %v9417_v32  ;;  %v4265_v56 = vpop.f32.mrf.mxu1  ;;  %v13733_v32 = vld [vmem:[#allocation85_spill] sm:$0xff] }
 0x2db   : > { %v4586_v47 = vpop.f32.mrf.mxu0 }
 0x2dc   : > { %v12595_v62 = vadd.f32 %v4586_v47, %v4265_v56  ;;  %v9420_v22 = vpop.f32.mrf.mxu1  ;;  %v13734_v47 = vld [vmem:[#allocation8_spill] sm:$0xff] }
 0x2dd   : > { %9728 = vmatmul.mubr.msk.f32.gmra.mxu1 %vm3915_vm3, %v13728_v45  ;;  %9780 = vmatmul.mubr.msk.f32.gmra.mxu0 %vm3915_vm3, %v11919_v34  ;;  %v9472_v3 = vpop.f32.mrf.mxu0 }
 0x2de   : > { %9730 = vmatprep.mubr.msk.f32.mxu1 %vm3915_vm3, %v13729_v2  ;;  %9782 = vmatprep.mubr.msk.f32.mxu0 %vm3915_vm3, %v11939_v25  ;;  %v12601_v34 = vadd.f32 %v9472_v3, %v9420_v22  ;;  %v4275_v25 = vpop.f32.mrf.mxu1  ;;  %v13735_v22 = vld [vmem:[#allocation37_spill] sm:$0xff] }
 0x2df   : > { %v4596_v35 = vpop.f32.mrf.mxu0 }
 0x2e0   : > { %v12607_v50 = vadd.f32 %v4596_v35, %v4275_v25  ;;  %v9423_v19 = vpop.f32.mrf.mxu1  ;;  %v13736_v35 = vld [vmem:[#allocation40_spill] sm:$0xff] }
 0x2e1   : > { %9731 = vmatmul.mubr.msk.f32.gmra.mxu1 %vm3915_vm3, %v13730_v20  ;;  %9783 = vmatmul.mubr.msk.f32.gmra.mxu0 %vm3915_vm3, %v13720_v52  ;;  %v9475_v9 = vpop.f32.mrf.mxu0 }
 0x2e2   : > { %9733 = vmatprep.mubr.msk.f32.mxu1 %vm3915_vm3, %v13731_v24  ;;  %9785 = vmatprep.mubr.msk.f32.mxu0 %vm3915_vm3, %v13721_v49  ;;  %v12613_v52 = vadd.f32 %v9475_v9, %v9423_v19  ;;  %v4285_v49 = vpop.f32.mrf.mxu1  ;;  %v13737_v19 = vld [vmem:[#allocation88_spill] sm:$0xff] }
 0x2e3   : > { %v4606_v13 = vpop.f32.mrf.mxu0 }
 0x2e4   : > { %v12619_v45 = vadd.f32 %v4606_v13, %v4285_v49  ;;  %v13738_v13 = vld [vmem:[#allocation81_spill] sm:$0xff] }
 0x2e5   : > { %9734 = vmatmul.mubr.msk.f32.gmra.mxu1 %vm3915_vm3, %v13732_v38  ;;  %9786 = vmatmul.mubr.msk.f32.gmra.mxu0 %vm3915_vm3, %v13722_v41  ;;  %v9426_v2 = vpop.f32.mrf.mxu1 }
 0x2e6   : > { %9736 = vmatprep.mubr.msk.f32.mxu1 %vm3915_vm3, %v13733_v32  ;;  %9788 = vmatprep.mubr.msk.f32.mxu0 %vm3915_vm3, %v12005_v53  ;;  %v9478_v56 = vpop.f32.mrf.mxu0 }
 0x2e7   : > { %v12625_v41 = vadd.f32 %v9478_v56, %v9426_v2  ;;  %v4295_v53 = vpop.f32.mrf.mxu1  ;;  %v13739_v2 = vld [vmem:[#allocation10_spill] sm:$0xff] }
 0x2e8   : > { %v4616_v3 = vpop.f32.mrf.mxu0 }
 0x2e9   : > { %9737 = vmatmul.mubr.msk.f32.gmra.mxu1 %vm3915_vm3, %v13734_v47  ;;  %9789 = vmatmul.mubr.msk.f32.gmra.mxu0 %vm3915_vm3, %v13723_v46  ;;  %v12631_v20 = vadd.f32 %v4616_v3, %v4295_v53  ;;  %v13740_v53 = vld [vmem:[#allocation11_spill] sm:$0xff] }
 0x2ea   : > { %9739 = vmatprep.mubr.msk.f32.mxu1 %vm3915_vm3, %v13735_v22  ;;  %9791 = vmatprep.mubr.msk.f32.mxu0 %vm3915_vm3, %v12034_v21  ;;  %v9429_v24 = vpop.f32.mrf.mxu1  ;;  %v9481_v25 = vpop.f32.mrf.mxu0  ;;  %v13741_v3 = vld [vmem:[#allocation15_spill] sm:$0xff] }
 0x2eb   : > { %v12637_v46 = vadd.f32 %v9481_v25, %v9429_v24 }
 0x2ec   : > { %v4305_v21 = vpop.f32.mrf.mxu1  ;;  %v4626_v9 = vpop.f32.mrf.mxu0 }
 0x2ed   : > { %9740 = vmatmul.mubr.msk.f32.gmra.mxu1 %vm3915_vm3, %v13736_v35  ;;  %9792 = vmatmul.mubr.msk.f32.gmra.mxu0 %vm3915_vm3, %v12047_v12  ;;  %v12643_v38 = vadd.f32 %v4626_v9, %v4305_v21  ;;  %v13742_v21 = vld [vmem:[#allocation14_spill] sm:$0xff]  ;;  %v13743_v9 = vld [vmem:[#allocation39_spill] sm:$0xff] }
 0x2ee   : > { %9742 = vmatprep.mubr.msk.f32.mxu1 %vm3915_vm3, %v13737_v19  ;;  %9794 = vmatprep.mubr.msk.f32.mxu0 %vm3915_vm3, %v12062_v27 }
 0x2ef   : > { %v9484_v49 = vpop.f32.mrf.mxu0 }
 0x2f0   : > { %v9432_v32 = vpop.f32.mrf.mxu1 }
 0x2f1   : > { %9743 = vmatmul.mubr.msk.f32.gmra.mxu1 %vm3915_vm3, %v13738_v13  ;;  %9795 = vmatmul.mubr.msk.f32.gmra.mxu0 %vm3915_vm3, %v12075_v28  ;;  %v12649_v12 = vadd.f32 %v9484_v49, %v9432_v32  ;;  %v12657_v56 = vpop.f32.mrf.mxu0 }
 0x2f2   : > { %9745 = vmatprep.mubr.msk.f32.mxu1 %vm3915_vm3, %v13739_v2  ;;  %9797 = vmatprep.mubr.msk.f32.mxu0 %vm3915_vm3, %v12085_v61  ;;  %v12655_v27 = vpop.f32.mrf.mxu1 }
 0x2f3   : > { %v9487_v22 = vpop.f32.mrf.mxu0 }
 0x2f4   : > { %v9435_v47 = vpop.f32.mrf.mxu1 }
 0x2f5   : > { %9746 = vmatmul.mubr.msk.f32.gmra.mxu1 %vm3915_vm3, %v13740_v53  ;;  %9798 = vmatmul.mubr.msk.f32.gmra.mxu0 %vm3915_vm3, %v12098_v37  ;;  %v12663_v28 = vadd.f32 %v9487_v22, %v9435_v47  ;;  %v4646_v24 = vpop.f32.mrf.mxu0  ;;  %v13744_v47 = vld [vmem:[#allocation38_spill] sm:$0xff]  ;;  %v13745_v22 = vld [vmem:[#allocation91_spill] sm:$0xff] }
 0x2f6   : > { %9748 = vmatprep.mubr.msk.f32.mxu1 %vm3915_vm3, %v13741_v3  ;;  %9800 = vmatprep.mubr.msk.f32.mxu0 %vm3915_vm3, %v12106_v42  ;;  %v4325_v61 = vpop.f32.mrf.mxu1 }
 0x2f7   : > { %v12669_v25 = vadd.f32 %v4646_v24, %v4325_v61  ;;  %v9490_v19 = vpop.f32.mrf.mxu0 }
 0x2f8   : > { %v9438_v35 = vpop.f32.mrf.mxu1 }
 0x2f9   : > { %9749 = vmatmul.mubr.msk.f32.gmra.mxu1 %vm3915_vm3, %v13742_v21  ;;  %9801 = vmatmul.mubr.msk.f32.gmra.mxu0 %vm3915_vm3, %v12118_v4  ;;  %v12675_v37 = vadd.f32 %v9490_v19, %v9438_v35  ;;  %v4656_v32 = vpop.f32.mrf.mxu0  ;;  %v13746_v35 = vld [vmem:[#allocation83_spill] sm:$0xff]  ;;  %v13747_v19 = vld [vmem:[#allocation41_spill] sm:$0xff] }
 0x2fa   : > { %9751 = vmatprep.mubr.msk.f32.mxu1 %vm3915_vm3, %v13743_v9  ;;  %9803 = vmatprep.mubr.msk.f32.mxu0 %vm3915_vm3, %v12126_v15  ;;  %v4335_v42 = vpop.f32.mrf.mxu1 }
 0x2fb   : > { %v12681_v49 = vadd.f32 %v4656_v32, %v4335_v42  ;;  %v9493_v2 = vpop.f32.mrf.mxu0 }
 0x2fc   : > { %v9441_v13 = vpop.f32.mrf.mxu1 }
 0x2fd   : > { %9752 = vmatmul.mubr.msk.f32.gmra.mxu1 %vm3915_vm3, %v13744_v47  ;;  %9804 = vmatmul.mubr.msk.f32.gmra.mxu0 %vm3915_vm3, %v12138_v16  ;;  %v12687_v4 = vadd.f32 %v9493_v2, %v9441_v13  ;;  %v4666_v53 = vpop.f32.mrf.mxu0  ;;  %v13748_v13 = vld [vmem:[#allocation94_spill] sm:$0xff]  ;;  %v6298_v47 = vld [vmem:[#allocation3 + $0x198] sm:$0xff] }
 0x2fe   : > { %9754 = vmatprep.mubr.msk.f32.mxu1 %vm3915_vm3, %v13745_v22  ;;  %9806 = vmatprep.mubr.msk.f32.mxu0 %vm3915_vm3, %v12145_v63  ;;  %v4345_v15 = vpop.f32.mrf.mxu1  ;;  %v6686_v22 = vld [vmem:[#allocation3 + $0x199] sm:$0xff] }
 0x2ff   : > { %v12693_v3 = vadd.f32 %v4666_v53, %v4345_v15 }
 0x300   : > { %v9444_v61 = vpop.f32.mrf.mxu1 }
 0x301   : > { %v9496_v24 = vpop.f32.mrf.mxu0  ;;  %9755 = vmatmul.mubr.msk.f32.gmra.mxu1 %vm3915_vm3, %v13746_v35  ;;  %9807 = vmatmul.mubr.msk.f32.gmra.mxu0 %vm3915_vm3, %v12156_v30 }
 0x302   : > { %v12699_v16 = vadd.f32 %v9496_v24, %v9444_v61  ;;  %9757 = vmatprep.mubr.msk.f32.mxu1 %vm3915_vm3, %v13747_v19  ;;  %9809 = vmatprep.mubr.msk.f32.mxu0 %vm3915_vm3, %v12162_v48  ;;  %v4355_v63 = vpop.f32.mrf.mxu1 }
 0x303   : > { %v4676_v21 = vpop.f32.mrf.mxu0 }
 0x304   : > { %v12705_v9 = vadd.f32 %v4676_v21, %v4355_v63  ;;  %v9447_v42 = vpop.f32.mrf.mxu1 }
 0x305   : > { %v9499_v32 = vpop.f32.mrf.mxu0  ;;  %9758 = vmatmul.mubr.msk.f32.gmra.mxu1 %vm3915_vm3, %v12166_v33  ;;  %9810 = vmatmul.mubr.msk.f32.gmra.mxu0 %vm3915_vm3, %v13724_v43  ;;  %v6299_v43 = vld [vmem:[#allocation3 + $0x1a0] sm:$0xff] }
 0x306   : > { %v12711_v30 = vadd.f32 %v9499_v32, %v9447_v42  ;;  %9760 = vmatprep.mubr.msk.f32.mxu1 %vm3915_vm3, %v13748_v13  ;;  %9812 = vmatprep.mubr.msk.f32.mxu0 %vm3915_vm3, %v12525_v58  ;;  %v4365_v48 = vpop.f32.mrf.mxu1  ;;  %v6687_v58 = vld [vmem:[#allocation3 + $0x1a1] sm:$0xff] }
 0x307   : > { %v4686_v2 = vpop.f32.mrf.mxu0 }
 0x308   : > { %v12717_v15 = vadd.f32 %v4686_v2, %v4365_v48  ;;  %v9450_v53 = vpop.f32.mrf.mxu1  ;;  %v4557_v2 = vadd.f32 %v12557_v14, %v12555_v29 }
 0x309   : > { %v9502_v61 = vpop.f32.mrf.mxu0  ;;  %9761 = vmatmul.mubr.msk.f32.gmra.mxu1 %vm3915_vm3, %v12384_v59  ;;  %9813 = vmatmul.mubr.msk.f32.gmra.mxu0 %vm3915_vm3, %v12533_v6 }
 0x30a   : > { %v12723_v33 = vadd.f32 %v9502_v61, %v9450_v53  ;;  %9763 = vmatprep.mubr.msk.f32.mxu1 %vm3915_vm3, %v6298_v47  ;;  %9815 = vmatprep.mubr.msk.f32.mxu0 %vm3915_vm3, %v6686_v22  ;;  %v4375_v24 = vpop.f32.mrf.mxu1  ;;  %v13749_v47 = vld [vmem:[#allocation84_spill] sm:$0xff] }
 0x30b   : > { %v4696_v35 = vpop.f32.mrf.mxu0 }
 0x30c   : > { %v12727_v19 = vadd.f32 %v4696_v35, %v4375_v24  ;;  %v9453_v63 = vpop.f32.mrf.mxu1 }
 0x30d   : > { %v9505_v21 = vpop.f32.mrf.mxu0  ;;  %9764 = vmatmul.mubr.msk.f32.gmra.mxu1 %vm3915_vm3, %v6299_v43  ;;  %9816 = vmatmul.mubr.msk.f32.gmra.mxu0 %vm3915_vm3, %v6687_v58 }
 0x30e   : > { %v12731_v59 = vadd.f32 %v9505_v21, %v9453_v63  ;;  %9822 = vmatprep.mubr.msk.f32.mxu1 %vm3915_vm3, %v12211_v54  ;;  %v4385_v6 = vpop.f32.mrf.mxu1  ;;  %9878 = vmatprep.mubr.msk.f32.mxu0 %vm9985_vm5, %v13719_v10 }
 0x30f   : > { %v4706_v42 = vpop.f32.mrf.mxu0 }
 0x310   : > { %v12735_v32 = vadd.f32 %v4706_v42, %v4385_v6  ;;  %v9512_v13 = vpop.f32.mrf.mxu1 }
 0x311   : > { %v9564_v48 = vpop.f32.mrf.mxu0  ;;  %9823 = vmatmul.mubr.msk.f32.vlgmr.msra.gmra.mxu1 %vm3915_vm3, %v12218_v7  ;;  %v5072_v22 = vadd.f32 %v9512_v13, %v13749_v47 }
 0x312   : > { %9825 = vmatprep.mubr.msk.f32.mxu1 %vm3915_vm3, %v12229_v39  ;;  %v4912_v53 = vpop.f32.mrf.mxu1 }
 0x313   : > { %v5300_v61 = vpop.f32.mrf.mxu0  ;;  %v12744_v54 = vadd.f32 %v9564_v48, %v5072_v22  ;;  %v5071_v43 = vadd.f32 %v4912_v53, %v4557_v2 }
 0x315   : > { %v9515_v58 = vpop.f32.mrf.mxu1  ;;  %v9567_v24 = vpop.f32.mrf.mxu0  ;;  %9826 = vmatmul.mubr.msk.f32.gmra.mxu1 %vm3915_vm3, %v12236_v18  ;;  %v12748_v35 = vadd.f32 %v5300_v61, %v5071_v43 }
 0x316   : > { %v5074_v7 = vadd.f32 %v9515_v58, %v12565_v0  ;;  %9828 = vmatprep.mubr.msk.f32.mxu1 %vm3915_vm3, %v12242_v36 }
 0x317   : > { %v4922_v29 = vpop.f32.mrf.mxu1  ;;  %v5310_v14 = vpop.f32.mrf.mxu0 }
 0x318   : > { %v12753_v39 = vadd.f32 %v9567_v24, %v5074_v7  ;;  %v5073_v63 = vadd.f32 %v4922_v29, %v12571_v40  ;;  %v7055_v7 = vld [vmem:[#allocation3 + $0xb2] sm:$0xff] }
 0x319   : > { %v9518_v21 = vpop.f32.mrf.mxu1  ;;  %v9570_v6 = vpop.f32.mrf.mxu0  ;;  %9829 = vmatmul.mubr.msk.f32.gmra.mxu1 %vm3915_vm3, %v12248_v31 }
 0x31a   : > { %v12758_v42 = vadd.f32 %v5310_v14, %v5073_v63  ;;  %v5076_v18 = vadd.f32 %v9518_v21, %v12577_v1  ;;  %9831 = vmatprep.mubr.msk.f32.mxu1 %vm3915_vm3, %v12254_v44 }
 0x31b   : > { %v4932_v0 = vpop.f32.mrf.mxu1  ;;  %v5320_v36 = vpop.f32.mrf.mxu0 }
 0x31c   : > { %v12763_v13 = vadd.f32 %v9570_v6, %v5076_v18  ;;  %v5075_v48 = vadd.f32 %v4932_v0, %v12583_v51  ;;  %v7057_v6 = vld [vmem:[#allocation3 + $0xca] sm:$0xff] }
 0x31d   : > { %v9521_v2 = vpop.f32.mrf.mxu1  ;;  %v9573_v40 = vpop.f32.mrf.mxu0  ;;  %9832 = vmatmul.mubr.msk.f32.gmra.mxu1 %vm3915_vm3, %v12260_v26 }
 0x31e   : > { %v12768_v47 = vadd.f32 %v5320_v36, %v5075_v48  ;;  %v5078_v31 = vadd.f32 %v9521_v2, %v12589_v5  ;;  %9834 = vmatprep.mubr.msk.f32.mxu1 %vm3915_vm3, %v12266_v8 }
 0x31f   : > { %v4942_v1 = vpop.f32.mrf.mxu1  ;;  %v5330_v44 = vpop.f32.mrf.mxu0 }
 0x320   : > { %v12773_v22 = vadd.f32 %v9573_v40, %v5078_v31  ;;  %v5077_v53 = vadd.f32 %v4942_v1, %v12595_v62  ;;  %v7059_v40 = vld [vmem:[#allocation3 + $0xe2] sm:$0xff]  ;;  %v7060_v1 = vld [vmem:[#allocation3 + $0xf2] sm:$0xff] }
 0x321   : > { %v9524_v61 = vpop.f32.mrf.mxu1  ;;  %v9576_v51 = vpop.f32.mrf.mxu0  ;;  %9835 = vmatmul.mubr.msk.f32.gmra.mxu1 %vm3915_vm3, %v12272_v23 }
 0x322   : > { %v12778_v43 = vadd.f32 %v5330_v44, %v5077_v53  ;;  %v5080_v26 = vadd.f32 %v9524_v61, %v12601_v34  ;;  %9837 = vmatprep.mubr.msk.f32.mxu1 %vm3915_vm3, %v12278_v17 }
 0x323   : > { %v4952_v5 = vpop.f32.mrf.mxu1  ;;  %v5340_v8 = vpop.f32.mrf.mxu0 }
 0x324   : > { %v12783_v58 = vadd.f32 %v9576_v51, %v5080_v26  ;;  %v5079_v24 = vadd.f32 %v4952_v5, %v12607_v50  ;;  %v7061_v26 = vld [vmem:[#allocation3 + $0xfa] sm:$0xff] }
 0x325   : > { %v9527_v62 = vpop.f32.mrf.mxu1  ;;  %v9579_v29 = vpop.f32.mrf.mxu0  ;;  %9838 = vmatmul.mubr.msk.f32.gmra.mxu1 %vm3915_vm3, %v7055_v7 }
 0x326   : > { %v12787_v14 = vadd.f32 %v5340_v8, %v5079_v24  ;;  %v5082_v23 = vadd.f32 %v9527_v62, %v12613_v52  ;;  %9840 = vmatprep.mubr.msk.f32.mxu1 %vm3915_vm3, %v12290_v11  ;;  %v7062_v8 = vld [vmem:[#allocation3 + $0x10a] sm:$0xff]  ;;  %v4637_v24 = vadd.f32 %v12657_v56, %v12655_v27 }
 0x327   : > { %v4962_v34 = vpop.f32.mrf.mxu1  ;;  %v5350_v17 = vpop.f32.mrf.mxu0 }
 0x328   : > { %v12792_v63 = vadd.f32 %v9579_v29, %v5082_v23  ;;  %v5081_v21 = vadd.f32 %v4962_v34, %v12619_v45  ;;  %v7063_v34 = vld [vmem:[#allocation3 + $0x112] sm:$0xff] }
 0x329   : > { %v9530_v50 = vpop.f32.mrf.mxu1  ;;  %v9582_v18 = vpop.f32.mrf.mxu0  ;;  %9841 = vmatmul.mubr.msk.f32.gmra.mxu1 %vm3915_vm3, %v7057_v6  ;;  %v7064_v6 = vld [vmem:[#allocation3 + $0x122] sm:$0xff] }
 0x32a   : > { %v12796_v0 = vadd.f32 %v5350_v17, %v5081_v21  ;;  %v5084_v36 = vadd.f32 %v9530_v50, %v12625_v41  ;;  %9843 = vmatprep.mubr.msk.f32.mxu1 %vm3915_vm3, %v12302_v55 }
 0x32b   : > { %v4972_v52 = vpop.f32.mrf.mxu1  ;;  %v5360_v11 = vpop.f32.mrf.mxu0 }
 0x32c   : > { %v12801_v48 = vadd.f32 %v9582_v18, %v5084_v36  ;;  %v5083_v2 = vadd.f32 %v4972_v52, %v12631_v20  ;;  %v7065_v52 = vld [vmem:[#allocation3 + $0x12a] sm:$0xff] }
 0x32d   : > { %v9533_v45 = vpop.f32.mrf.mxu1  ;;  %v9585_v31 = vpop.f32.mrf.mxu0  ;;  %9844 = vmatmul.mubr.msk.f32.gmra.mxu1 %vm3915_vm3, %v7059_v40  ;;  %v7066_v40 = vld [vmem:[#allocation3 + $0x13a] sm:$0xff] }
 0x32e   : > { %v12805_v44 = vadd.f32 %v5360_v11, %v5083_v2  ;;  %v5086_v53 = vadd.f32 %v9533_v45, %v12637_v46  ;;  %9846 = vmatprep.mubr.msk.f32.mxu1 %vm3915_vm3, %v7060_v1 }
 0x32f   : > { %v4982_v41 = vpop.f32.mrf.mxu1  ;;  %v5370_v55 = vpop.f32.mrf.mxu0 }
 0x330   : > { %v12809_v61 = vadd.f32 %v9585_v31, %v5086_v53  ;;  %v5085_v51 = vadd.f32 %v4982_v41, %v12643_v38 }
 0x331   : > { %v9536_v20 = vpop.f32.mrf.mxu1  ;;  %v9588_v5 = vpop.f32.mrf.mxu0  ;;  %9847 = vmatmul.mubr.msk.f32.gmra.mxu1 %vm3915_vm3, %v7061_v26  ;;  %v7068_v26 = vld [vmem:[#allocation3 + $0x152] sm:$0xff] }
 0x332   : > { %v12815_v7 = vadd.f32 %v5370_v55, %v5085_v51  ;;  %v5088_v46 = vadd.f32 %v9536_v20, %v12649_v12  ;;  %9849 = vmatprep.mubr.msk.f32.mxu1 %vm3915_vm3, %v7062_v8  ;;  %v7067_v55 = vld [vmem:[#allocation3 + $0x142] sm:$0xff] }
 0x333   : > { %v4992_v62 = vpop.f32.mrf.mxu1  ;;  %v5380_v29 = vpop.f32.mrf.mxu0 }
 0x334   : > { %v12819_v23 = vadd.f32 %v9588_v5, %v5088_v46  ;;  %v5087_v38 = vadd.f32 %v4992_v62, %v4637_v24  ;;  %v7069_v62 = vld [vmem:[#allocation3 + $0x15a] sm:$0xff] }
 0x335   : > { %v9539_v17 = vpop.f32.mrf.mxu1  ;;  %v9591_v21 = vpop.f32.mrf.mxu0  ;;  %9850 = vmatmul.mubr.msk.f32.gmra.mxu1 %vm3915_vm3, %v7063_v34 }
 0x336   : > { %v12822_v50 = vadd.f32 %v5380_v29, %v5087_v38  ;;  %v5090_v27 = vadd.f32 %v9539_v17, %v12663_v28  ;;  %9852 = vmatprep.mubr.msk.f32.mxu1 %vm3915_vm3, %v7064_v6  ;;  %v7070_v38 = vld [vmem:[#allocation3 + $0x16a] sm:$0xff] }
 0x337   : > { %v5002_v12 = vpop.f32.mrf.mxu1  ;;  %v5390_v56 = vpop.f32.mrf.mxu0 }
 0x338   : > { %v12826_v18 = vadd.f32 %v9591_v21, %v5090_v27  ;;  %v5089_v36 = vadd.f32 %v5002_v12, %v12669_v25  ;;  %v7071_v12 = vld [vmem:[#allocation3 + $0x172] sm:$0xff] }
 0x339   : > { %v9542_v11 = vpop.f32.mrf.mxu1  ;;  %v9594_v2 = vpop.f32.mrf.mxu0  ;;  %9853 = vmatmul.mubr.msk.f32.gmra.mxu1 %vm3915_vm3, %v7065_v52 }
 0x33a   : > { %v12830_v45 = vadd.f32 %v5390_v56, %v5089_v36  ;;  %v5092_v31 = vadd.f32 %v9542_v11, %v12675_v37  ;;  %9855 = vmatprep.mubr.msk.f32.mxu1 %vm3915_vm3, %v7066_v40 }
 0x33b   : > { %v5012_v28 = vpop.f32.mrf.mxu1  ;;  %v5400_v1 = vpop.f32.mrf.mxu0 }
 0x33c   : > { %v12834_v53 = vadd.f32 %v9594_v2, %v5092_v31  ;;  %v5091_v41 = vadd.f32 %v5012_v28, %v12681_v49  ;;  %v7074_v2 = vld [vmem:[#allocation3 + $0x19a] sm:$0xff] }
 0x33d   : > { %v9545_v25 = vpop.f32.mrf.mxu1  ;;  %v9597_v51 = vpop.f32.mrf.mxu0  ;;  %9856 = vmatmul.mubr.msk.f32.gmra.mxu1 %vm3915_vm3, %v7067_v55 }
 0x33e   : > { %v12838_v20 = vadd.f32 %v5400_v1, %v5091_v41  ;;  %v5094_v5 = vadd.f32 %v9545_v25, %v12687_v4  ;;  %9858 = vmatprep.mubr.msk.f32.mxu1 %vm3915_vm3, %v7068_v26 }
 0x33f   : > { %v5022_v37 = vpop.f32.mrf.mxu1  ;;  %v5410_v8 = vpop.f32.mrf.mxu0 }
 0x340   : > { %v12842_v24 = vadd.f32 %v9597_v51, %v5094_v5  ;;  %v5093_v46 = vadd.f32 %v5022_v37, %v12693_v3 }
 0x341   : > { %v9548_v49 = vpop.f32.mrf.mxu1  ;;  %v9600_v29 = vpop.f32.mrf.mxu0  ;;  %9859 = vmatmul.mubr.msk.f32.gmra.mxu1 %vm3915_vm3, %v7069_v62 }
 0x342   : > { %v12846_v34 = vadd.f32 %v5410_v8, %v5093_v46  ;;  %v5096_v17 = vadd.f32 %v9548_v49, %v12699_v16  ;;  %9861 = vmatprep.mubr.msk.f32.mxu1 %vm3915_vm3, %v7070_v38 }
 0x343   : > { %v5032_v4 = vpop.f32.mrf.mxu1  ;;  %v5420_v21 = vpop.f32.mrf.mxu0 }
 0x344   : > { %v12850_v6 = vadd.f32 %v9600_v29, %v5096_v17  ;;  %v5095_v27 = vadd.f32 %v5032_v4, %v12705_v9 }
 0x345   : > { %v9551_v3 = vpop.f32.mrf.mxu1  ;;  %v9603_v56 = vpop.f32.mrf.mxu0  ;;  %9862 = vmatmul.mubr.msk.f32.gmra.mxu1 %vm3915_vm3, %v7071_v12 }
 0x346   : > { %v12854_v36 = vadd.f32 %v5420_v21, %v5095_v27  ;;  %v5098_v52 = vadd.f32 %v9551_v3, %v12711_v30  ;;  %9864 = vmatprep.mubr.msk.f32.mxu1 %vm3915_vm3, %v12527_v57  ;;  %v7075_v30 = vld [vmem:[#allocation3 + $0x1a2] sm:$0xff] }
 0x347   : > { %v5042_v16 = vpop.f32.mrf.mxu1  ;;  %v5430_v11 = vpop.f32.mrf.mxu0 }
 0x348   : > { %v12859_v40 = vadd.f32 %v9603_v56, %v5098_v52  ;;  %v5097_v31 = vadd.f32 %v5042_v16, %v12717_v15 }
 0x349   : > { %v9554_v9 = vpop.f32.mrf.mxu1  ;;  %v9606_v28 = vpop.f32.mrf.mxu0  ;;  %9865 = vmatmul.mubr.msk.f32.gmra.mxu1 %vm3915_vm3, %v12535_v60 }
 0x34a   : > { %v12864_v1 = vadd.f32 %v5430_v11, %v5097_v31  ;;  %v5100_v41 = vadd.f32 %v9554_v9, %v12723_v33  ;;  %9867 = vmatprep.mubr.msk.f32.mxu1 %vm3915_vm3, %v7074_v2 }
 0x34b   : > { %v5052_v57 = vpop.f32.mrf.mxu1  ;;  %v5440_v55 = vpop.f32.mrf.mxu0 }
 0x34c   : > { %v12868_v25 = vadd.f32 %v9606_v28, %v5100_v41  ;;  %v5099_v51 = vadd.f32 %v5052_v57, %v12727_v19 }
 0x34d   : > { %v9557_v26 = vpop.f32.mrf.mxu1  ;;  %v9609_v15 = vpop.f32.mrf.mxu0  ;;  %9868 = vmatmul.mubr.msk.f32.gmra.mxu1 %vm3915_vm3, %v7075_v30 }
 0x34e   : > { %v12872_v5 = vadd.f32 %v5440_v55, %v5099_v51  ;;  %v5102_v60 = vadd.f32 %v9557_v26, %v12731_v59 }
 0x34f   : > { %v5062_v37 = vpop.f32.mrf.mxu1  ;;  %v5450_v8 = vpop.f32.mrf.mxu0 }
 0x350   : > { %v12875_v33 = vadd.f32 %v9609_v15, %v5102_v60  ;;  %v5101_v46 = vadd.f32 %v5062_v37, %v12735_v32 }
 0x351   : > { %v9616_v62 = vpop.f32.mrf.mxu1  ;;  %v9668_v49 = vpop.f32.mrf.mxu0 }
 0x352   : > { %v12878_v29 = vadd.f32 %v5450_v8, %v5101_v46  ;;  %v5848_v19 = vadd.f32 %v9616_v62, %v12744_v54 }
 0x353   : > { %v5688_v38 = vpop.f32.mrf.mxu1  ;;  %v12881_v17 = vpop.f32.mrf.mxu0 }
 0x354   : > { %v12883_v4 = vadd.f32 %v9668_v49, %v5848_v19  ;;  %v12886_v21 = vadd.f32 %v5688_v38, %v12748_v35 }
 0x355   : > { %v9619_v59 = vpop.f32.mrf.mxu1  ;;  %v9671_v27 = vpop.f32.mrf.mxu0 }
 0x356   : > { %v5850_v12 = vadd.f32 %v9619_v59, %v12753_v39 }
 0x357   : > { %v5698_v3 = vpop.f32.mrf.mxu1  ;;  %v12889_v32 = vpop.f32.mrf.mxu0 }
 0x358   : > { %v12891_v56 = vadd.f32 %v9671_v27, %v5850_v12  ;;  %v12894_v52 = vadd.f32 %v5698_v3, %v12758_v42 }
 0x359   : > { %v9622_v54 = vpop.f32.mrf.mxu1  ;;  %v9674_v16 = vpop.f32.mrf.mxu0 }
 0x35a   : > { %v5852_v11 = vadd.f32 %v9622_v54, %v12763_v13 }
 0x35b   : > { %v5708_v2 = vpop.f32.mrf.mxu1  ;;  %v12897_v31 = vpop.f32.mrf.mxu0 }
 0x35c   : > { %v12899_v35 = vadd.f32 %v9674_v16, %v5852_v11  ;;  %v12902_v9 = vadd.f32 %v5708_v2, %v12768_v47 }
 0x35d   : > { %v9625_v39 = vpop.f32.mrf.mxu1  ;;  %v9677_v28 = vpop.f32.mrf.mxu0 }
 0x35e   : > { %v5854_v41 = vadd.f32 %v9625_v39, %v12773_v22 }
 0x35f   : > { %v5718_v30 = vpop.f32.mrf.mxu1  ;;  %v12905_v57 = vpop.f32.mrf.mxu0 }
 0x360   : > { %v12907_v42 = vadd.f32 %v9677_v28, %v5854_v41  ;;  %v12910_v55 = vadd.f32 %v5718_v30, %v12778_v43 }
 0x361   : > { %v9628_v13 = vpop.f32.mrf.mxu1  ;;  %v9680_v51 = vpop.f32.mrf.mxu0 }
 0x362   : > { %v5856_v26 = vadd.f32 %v9628_v13, %v12783_v58 }
 0x363   : > { %v5728_v15 = vpop.f32.mrf.mxu1  ;;  %v12913_v60 = vpop.f32.mrf.mxu0 }
 0x364   : > { %v12915_v47 = vadd.f32 %v9680_v51, %v5856_v26  ;;  %v12918_v37 = vadd.f32 %v5728_v15, %v12787_v14 }
 0x365   : > { %v9631_v22 = vpop.f32.mrf.mxu1  ;;  %v9683_v8 = vpop.f32.mrf.mxu0 }
 0x366   : > { %v5858_v46 = vadd.f32 %v9631_v22, %v12792_v63 }
 0x367   : > { %v5738_v62 = vpop.f32.mrf.mxu1  ;;  %v12921_v49 = vpop.f32.mrf.mxu0 }
 0x368   : > { %v12923_v43 = vadd.f32 %v9683_v8, %v5858_v46  ;;  %v12926_v19 = vadd.f32 %v5738_v62, %v12796_v0 }
 0x369   : > { %v9634_v58 = vpop.f32.mrf.mxu1  ;;  %v9686_v38 = vpop.f32.mrf.mxu0 }
 0x36a   : > { %v5860_v59 = vadd.f32 %v9634_v58, %v12801_v48  ;;  %v7577_v48 = vld [vmem:[%s13358_s5 + $0x18] sm:$0xff] }
 0x36b   : > { %v5748_v27 = vpop.f32.mrf.mxu1  ;;  %v12929_v12 = vpop.f32.mrf.mxu0  ;;  %9871 = vmatpush3.msra.mxu0 %v7577_v48 }
 0x36c   : > { %v12931_v14 = vadd.f32 %v9686_v38, %v5860_v59  ;;  %v12934_v3 = vadd.f32 %v5748_v27, %v12805_v44  ;;  %9872 = vmatprep.subr.mxu0 %v13719_v10 }
 0x36d   : > { %v9637_v63 = vpop.f32.mrf.mxu1  ;;  %v9689_v54 = vpop.f32.mrf.mxu0 }
 0x36e   : > { %v5862_v16 = vadd.f32 %v9637_v63, %v12809_v61 }
 0x36f   : > { %v5758_v11 = vpop.f32.mrf.mxu1  ;;  %v12937_v2 = vpop.f32.mrf.mxu0 }
 0x370   : > { %v12939_v0 = vadd.f32 %v9689_v54, %v5862_v16  ;;  %v12942_v39 = vadd.f32 %v5758_v11, %v12815_v7 }
 0x371   : > { %v9640_v28 = vpop.f32.mrf.mxu1  ;;  %v9692_v41 = vpop.f32.mrf.mxu0 }
 0x372   : > { %v5864_v44 = vadd.f32 %v9640_v28, %v12819_v23 }
 0x373   : > { %v5768_v61 = vpop.f32.mrf.mxu1  ;;  %v12949_v30 = vpop.f32.mrf.mxu0 }
 0x374   : > { %v12951_v13 = vadd.f32 %v9692_v41, %v5864_v44  ;;  %v12954_v51 = vadd.f32 %v5768_v61, %v12822_v50 }
 0x375   : > { %v9643_v7 = vpop.f32.mrf.mxu1  ;;  %v9695_v26 = vpop.f32.mrf.mxu0 }
 0x376   : > { %v5866_v15 = vadd.f32 %v9643_v7, %v12826_v18 }
 0x377   : > { %v5778_v22 = vpop.f32.mrf.mxu1  ;;  %v12957_v8 = vpop.f32.mrf.mxu0 }
 0x378   : > { %13750 = vst [vmem:[#allocation17_spill] sm:$0xff] %v12957_v8  ;;  %v12959_v46 = vadd.f32 %v9695_v26, %v5866_v15  ;;  %v12962_v23 = vadd.f32 %v5778_v22, %v12830_v45 }
 0x379   : > { %v9646_v62 = vpop.f32.mrf.mxu1  ;;  %v9698_v58 = vpop.f32.mrf.mxu0 }
 0x37a   : > { %v5868_v38 = vadd.f32 %v9646_v62, %v12834_v53  ;;  %v7576_v53 = vld [vmem:[%s13358_s5 + $0x10] sm:$0xff] }
 0x37b   : > { %v5788_v59 = vpop.f32.mrf.mxu1  ;;  %v12965_v27 = vpop.f32.mrf.mxu0  ;;  %9873 = vmatpush3.msra.mxu0 %v7576_v53 }
 0x37c   : > { %13751 = vst [vmem:[#allocation16_spill] sm:$0xff] %v12965_v27  ;;  %v12967_v50 = vadd.f32 %v9698_v58, %v5868_v38  ;;  %v12970_v63 = vadd.f32 %v5788_v59, %v12838_v20  ;;  %9874 = vmatprep.subr.mxu0 %v13719_v10 }
 0x37d   : > { %v9649_v18 = vpop.f32.mrf.mxu1  ;;  %v9701_v54 = vpop.f32.mrf.mxu0 }
 0x37e   : > { %13752 = vst [vmem:[#allocation18_spill] sm:$0xff] %v12970_v63  ;;  %v5870_v16 = vadd.f32 %v9649_v18, %v12842_v24 }
 0x37f   : > { %v5798_v11 = vpop.f32.mrf.mxu1  ;;  %v12973_v48 = vpop.f32.mrf.mxu0 }
 0x380   : > { %13753 = vst [vmem:[#allocation43_spill] sm:$0xff] %v12973_v48  ;;  %v12975_v45 = vadd.f32 %v9701_v54, %v5870_v16  ;;  %v12978_v28 = vadd.f32 %v5798_v11, %v12846_v34 }
 0x381   : > { %v9652_v41 = vpop.f32.mrf.mxu1  ;;  %v9704_v44 = vpop.f32.mrf.mxu0 }
 0x382   : > { %13754 = vst [vmem:[#allocation42_spill] sm:$0xff] %v12978_v28  ;;  %v5872_v20 = vadd.f32 %v9652_v41, %v12850_v6 }
 0x383   : > { %v5808_v24 = vpop.f32.mrf.mxu1  ;;  %v12985_v61 = vpop.f32.mrf.mxu0 }
 0x384   : > { %13755 = vst [vmem:[#allocation86_spill] sm:$0xff] %v12985_v61  ;;  %v12987_v7 = vadd.f32 %v9704_v44, %v5872_v20  ;;  %v12990_v26 = vadd.f32 %v5808_v24, %v12854_v36 }
 0x385   : > { %v9655_v34 = vpop.f32.mrf.mxu1  ;;  %v9707_v15 = vpop.f32.mrf.mxu0 }
 0x386   : > { %13756 = vst [vmem:[#allocation45_spill] sm:$0xff] %v12990_v26  ;;  %v5874_v22 = vadd.f32 %v9655_v34, %v12859_v40 }
 0x387   : > { %v5818_v62 = vpop.f32.mrf.mxu1  ;;  %v12993_v58 = vpop.f32.mrf.mxu0 }
 0x388   : > { %13757 = vst [vmem:[#allocation48_spill] sm:$0xff] %v12993_v58  ;;  %v12995_v38 = vadd.f32 %v9707_v15, %v5874_v22  ;;  %v12998_v6 = vadd.f32 %v5818_v62, %v12864_v1 }
 0x389   : > { %v9658_v59 = vpop.f32.mrf.mxu1  ;;  %v9710_v18 = vpop.f32.mrf.mxu0 }
 0x38a   : > { %13758 = vst [vmem:[#allocation99_spill] sm:$0xff] %v12998_v6  ;;  %v5876_v54 = vadd.f32 %v9658_v59, %v12868_v25  ;;  %v7575_v25 = vld [vmem:[%s13358_s5 + $0x8] sm:$0xff] }
 0x38b   : > { %v5828_v16 = vpop.f32.mrf.mxu1  ;;  %v13001_v11 = vpop.f32.mrf.mxu0  ;;  %9875 = vmatpush3.msra.mxu0 %v7575_v25 }
 0x38c   : > { %13759 = vst [vmem:[#allocation87_spill] sm:$0xff] %v13001_v11  ;;  %v13003_v36 = vadd.f32 %v9710_v18, %v5876_v54  ;;  %v13006_v53 = vadd.f32 %v5828_v16, %v12872_v5  ;;  %9876 = vmatprep.subr.mxu0 %v13719_v10 }
 0x38d   : > { %v9661_v40 = vpop.f32.mrf.mxu1  ;;  %v9713_v41 = vpop.f32.mrf.mxu0 }
 0x38e   : > { %13760 = vst [vmem:[#allocation19_spill] sm:$0xff] %v13006_v53  ;;  %v5878_v44 = vadd.f32 %v9661_v40, %v12875_v33 }
 0x38f   : > { %v5838_v20 = vpop.f32.mrf.mxu1  ;;  %v13009_v24 = vpop.f32.mrf.mxu0 }
 0x390   : > { %13761 = vst [vmem:[#allocation20_spill] sm:$0xff] %v13009_v24  ;;  %v13011_v1 = vadd.f32 %v9713_v41, %v5878_v44  ;;  %v13014_v34 = vadd.f32 %v5838_v20, %v12878_v29 }
 0x391   : > { %v9720_v15 = vpop.f32.mrf.mxu1  ;;  %v13019_v22 = vpop.f32.mrf.mxu0 }
 0x392   : > { %13762 = vst [vmem:[#allocation47_spill] sm:$0xff] %v13014_v34  ;;  %v13022_v5 = vadd.f32 %v9720_v15, %v12883_v4 }
 0x393   : > { %v13025_v33 = vpop.f32.mrf.mxu1  ;;  %v13027_v62 = vpop.f32.mrf.mxu0 }
 0x395   : > { %v9723_v59 = vpop.f32.mrf.mxu1  ;;  %v13034_v54 = vpop.f32.mrf.mxu0 }
 0x396   : > { %v13030_v29 = vadd.f32 %v9723_v59, %v12891_v56 }
 0x397   : > { %v13032_v18 = vpop.f32.mrf.mxu1  ;;  %v13041_v41 = vpop.f32.mrf.mxu0 }
 0x399   : > { %v9726_v16 = vpop.f32.mrf.mxu1  ;;  %v13048_v56 = vpop.f32.mrf.mxu0 }
 0x39a   : > { %v13037_v40 = vadd.f32 %v9726_v16, %v12899_v35 }
 0x39b   : > { %v13039_v4 = vpop.f32.mrf.mxu1  ;;  %v13055_v35 = vpop.f32.mrf.mxu0 }
 0x39d   : > { %v9729_v44 = vpop.f32.mrf.mxu1 }
 0x39e   : > { %v13044_v20 = vadd.f32 %v9729_v44, %v12907_v42  ;;  %v7574_v42 = vld [vmem:[%s13358_s5] sm:$0xff] }
 0x39f   : > { %v13046_v25 = vpop.f32.mrf.mxu1  ;;  %9877 = vmatpush3.msra.mxu0 %v7574_v42 }
 0x3a1   : > { %v9732_v15 = vpop.f32.mrf.mxu1 }
 0x3a2   : > { %v13051_v59 = vadd.f32 %v9732_v15, %v12915_v47  ;;  %v13066_v47 = vpop.f32.mrf.mxu0 }
 0x3a3   : > { %v13053_v24 = vpop.f32.mrf.mxu1 }
 0x3a5   : > { %v9735_v16 = vpop.f32.mrf.mxu1 }
 0x3a6   : > { %v13058_v34 = vadd.f32 %v9735_v16, %v12923_v43  ;;  %v13073_v43 = vpop.f32.mrf.mxu0 }
 0x3a7   : > { %v13060_v11 = vpop.f32.mrf.mxu1 }
 0x3a8   : > { %v13080_v42 = vpop.f32.mrf.mxu0 }
 0x3a9   : > { %v9738_v44 = vpop.f32.mrf.mxu1 }
 0x3aa   : > { %v13069_v15 = vadd.f32 %v9738_v44, %v12931_v14  ;;  %v13087_v14 = vpop.f32.mrf.mxu0 }
 0x3ab   : > { %v13071_v53 = vpop.f32.mrf.mxu1 }
 0x3ad   : > { %v9741_v16 = vpop.f32.mrf.mxu1 }
 0x3ae   : > { %v13076_v58 = vadd.f32 %v9741_v16, %v12939_v0  ;;  %v13094_v0 = vpop.f32.mrf.mxu0 }
 0x3af   : > { %v13078_v6 = vpop.f32.mrf.mxu1 }
 0x3b1   : > { %v9744_v61 = vpop.f32.mrf.mxu1 }
 0x3b2   : > { %v13083_v10 = vadd.f32 %v9744_v61, %v12951_v13  ;;  %v13101_v13 = vpop.f32.mrf.mxu0 }
 0x3b3   : > { %v13085_v26 = vpop.f32.mrf.mxu1 }
 0x3b4   : > { %13763 = vst [vmem:[#allocation46_spill] sm:$0xff] %v13083_v10 }
 0x3b5   : > { %v9747_v44 = vpop.f32.mrf.mxu1 }
 0x3b6   : > { %v13090_v48 = vadd.f32 %v9747_v44, %v12959_v46  ;;  %v13108_v46 = vpop.f32.mrf.mxu0 }
 0x3b7   : > { %v13092_v28 = vpop.f32.mrf.mxu1 }
 0x3b8   : > { %13764 = vst [vmem:[#allocation89_spill] sm:$0xff] %v13090_v48  ;;  %13765 = vst [vmem:[#allocation49_spill] sm:$0xff] %v13092_v28 }
 0x3b9   : > { %v9750_v16 = vpop.f32.mrf.mxu1 }
 0x3ba   : > { %v13097_v27 = vadd.f32 %v9750_v16, %v12967_v50  ;;  %v13115_v50 = vpop.f32.mrf.mxu0 }
 0x3bb   : > { %v13099_v63 = vpop.f32.mrf.mxu1 }
 0x3bc   : > { %13766 = vst [vmem:[#allocation52_spill] sm:$0xff] %v13097_v27  ;;  %13767 = vst [vmem:[#allocation90_spill] sm:$0xff] %v13099_v63 }
 0x3bd   : > { %v9753_v61 = vpop.f32.mrf.mxu1 }
 0x3be   : > { %v13104_v10 = vadd.f32 %v9753_v61, %v12975_v45  ;;  %v13122_v45 = vpop.f32.mrf.mxu0 }
 0x3bf   : > { %v13106_v8 = vpop.f32.mrf.mxu1 }
 0x3c0   : > { %13768 = vst [vmem:[#allocation104_spill] sm:$0xff] %v13104_v10  ;;  %13769 = vst [vmem:[#allocation21_spill] sm:$0xff] %v13106_v8 }
 0x3c1   : > { %v9756_v44 = vpop.f32.mrf.mxu1 }
 0x3c2   : > { %v13111_v48 = vadd.f32 %v9756_v44, %v12987_v7  ;;  %v6235_v7 = vadd.f32 %v12881_v17, %v12886_v21  ;;  %v13131_v44 = vpop.f32.mrf.mxu0  ;;  %v13148_v17 = vld [vmem:[%s13357_s4] ss:$0 sm:$0xff] }
 0x3c3   : > { %v13113_v28 = vpop.f32.mrf.mxu1 }
 0x3c4   : > { %13770 = vst [vmem:[#allocation22_spill] sm:$0xff] %v13111_v48  ;;  %13771 = vst [vmem:[#allocation51_spill] sm:$0xff] %v13113_v28  ;;  %v6624_v28 = vadd.f32 %v13025_v33, %v6235_v7  ;;  %v6239_v33 = vadd.f32 %v12897_v31, %v12902_v9  ;;  %v6241_v31 = vadd.f32 %v12905_v57, %v12910_v55 }
 0x3c5   : > { %v9759_v16 = vpop.f32.mrf.mxu1 }
 0x3c6   : > { %v13118_v27 = vadd.f32 %v9759_v16, %v12995_v38  ;;  %v7012_v21 = vadd.f32 %v13027_v62, %v6624_v28  ;;  %v6628_v7 = vadd.f32 %v13039_v4, %v6239_v33 }
 0x3c7   : > { %v13120_v63 = vpop.f32.mrf.mxu1 }
 0x3c8   : > { %13772 = vst [vmem:[#allocation50_spill] sm:$0xff] %v13118_v27  ;;  %v6237_v27 = vadd.f32 %v12889_v32, %v12894_v52  ;;  %v7015_v52 = vadd.f32 %v13034_v54, %v13030_v29  ;;  %v7017_v29 = vadd.f32 %v13048_v56, %v13037_v40  ;;  %v6243_v40 = vadd.f32 %v12913_v60, %v12918_v37 }
 0x3c9   : > { %v9762_v61 = vpop.f32.mrf.mxu1 }
 0x3ca   : > { %v13125_v10 = vadd.f32 %v9762_v61, %v13003_v36  ;;  %v7013_v36 = vadd.f32 %v13019_v22, %v13022_v5  ;;  %v13143_v61 = vpop.f32.mrf.mxu0 }
 0x3cb   : > { %v13127_v8 = vpop.f32.mrf.mxu1 }
 0x3cc   : > { %13773 = vst [vmem:[#allocation92_spill] sm:$0xff] %v13125_v10 }
 0x3cd   : > { %v9765_v48 = vpop.f32.mrf.mxu1 }
 0x3ce   : > { %v13135_v38 = vadd.f32 %v9765_v48, %v13011_v1  ;;  %v6626_v48 = vadd.f32 %v13032_v18, %v6237_v27 }
 0x3cf   : > { %v13137_v16 = vpop.f32.mrf.mxu1 }
 0x3d0   : > { %13774 = vst [vmem:[#allocation53_spill] sm:$0xff] %v13135_v38  ;;  %13775 = vst [vmem:[#allocation56_spill] sm:$0xff] %v13137_v16  ;;  %v13158_v38 = vpop.f32.mrf.mxu0  ;;  %v7014_v28 = vadd.f32 %v13041_v41, %v6626_v48  ;;  %v6630_v41 = vadd.f32 %v13046_v25, %v6241_v31 }
 0x3d1   : > { %v9824_v10 = vpop.f32.mrf.mxu1 }
 0x3d2   : > { %v7401_v1 = vadd.f32 %v9824_v10, %v7013_v36  ;;  %v7016_v36 = vadd.f32 %v13055_v35, %v6628_v7  ;;  %v7019_v35 = vadd.f32 %v13066_v47, %v13044_v20  ;;  %v7021_v20 = vadd.f32 %v13080_v42, %v13051_v59 }
 0x3d3   : > { %v7241_v32 = vpop.f32.mrf.mxu1 }
 0x3d4   : > { %v7440_v22 = vadd.f32 %v13148_v17, %v7401_v1  ;;  %v7400_v5 = vadd.f32 %v7241_v32, %v7012_v21  ;;  %v13169_v21 = vpop.f32.mrf.mxu0 }
 0x3d5   : > { %v9827_v16 = vpop.f32.mrf.mxu1 }
 0x3d6   : > { %v7472_v62 = vmax.f32 %v7440_v22, 0.0  ;;  %v7439_v27 = vadd.f32 %v13148_v17, %v7400_v5  ;;  %v7403_v18 = vadd.f32 %v9827_v16, %v7015_v52  ;;  %v6632_v5 = vadd.f32 %v13053_v24, %v6243_v40  ;;  %v13180_v7 = vpop.f32.mrf.mxu0 }
 0x3d7   : > { %v7251_v9 = vpop.f32.mrf.mxu1 }
 0x3d8   : > { %v7471_v54 = vmax.f32 %v7439_v27, 0.0  ;;  %v7442_v4 = vadd.f32 %v13148_v17, %v7403_v18  ;;  %v7402_v10 = vadd.f32 %v7251_v9, %v7014_v28  ;;  %v7505_v16 = vsel %vm7503_vm6, %v7472_v62, 0.0 }
 0x3d9   : > { %v9830_v48 = vpop.f32.mrf.mxu1  ;;  %v7018_v62 = vadd.f32 %v13073_v43, %v6630_v41  ;;  %v6245_v18 = vadd.f32 %v12921_v49, %v12926_v19 }
 0x3da   : > { %v7504_v57 = vsel %vm7503_vm6, %v7471_v54, 0.0  ;;  %v7441_v55 = vadd.f32 %v13148_v17, %v7402_v10  ;;  %v7405_v1 = vadd.f32 %v9830_v48, %v7017_v29  ;;  %v7474_v33 = vmax.f32 %v7442_v4, 0.0  ;;  %v13192_v10 = vpop.f32.mrf.mxu0 }
 0x3db   : > { %v7506_v56 = vadd.f32 %v7505_v16, %v7504_v57  ;;  %v7261_v32 = vpop.f32.mrf.mxu1  ;;  %v7020_v4 = vadd.f32 %v13087_v14, %v6632_v5  ;;  %v6634_v49 = vadd.f32 %v13060_v11, %v6245_v18  ;;  %v6247_v48 = vadd.f32 %v12929_v12, %v12934_v3 }
 0x3dc   : > { %v7473_v25 = vmax.f32 %v7441_v55, 0.0  ;;  %v7444_v52 = vadd.f32 %v13148_v17, %v7405_v1  ;;  %v7404_v22 = vadd.f32 %v7261_v32, %v7016_v36  ;;  %v7509_v47 = vsel %vm7503_vm6, %v7474_v33, 0.0  ;;  %v13204_v32 = vpop.f32.mrf.mxu0 }
 0x3dd   : > { %v9833_v28 = vpop.f32.mrf.mxu1  ;;  %v7023_v16 = vadd.f32 %v13094_v0, %v13058_v34  ;;  %v6636_v33 = vadd.f32 %v13071_v53, %v6247_v48  ;;  %v7022_v12 = vadd.f32 %v13101_v13, %v6634_v49  ;;  %v13777_v48 = vld [vmem:[#allocation46_spill] sm:$0xff] }
 0x3de   : > { %v7507_v27 = vsel %vm7503_vm6, %v7473_v25, 0.0  ;;  %v7443_v60 = vadd.f32 %v13148_v17, %v7404_v22  ;;  %v7407_v37 = vadd.f32 %v9833_v28, %v7019_v35  ;;  %v7476_v9 = vmax.f32 %v7444_v52, 0.0  ;;  %v13216_v18 = vpop.f32.mrf.mxu0 }
 0x3df   : > { %v7508_v31 = vadd.f32 %v7507_v27, %v7506_v56  ;;  %v7271_v24 = vpop.f32.mrf.mxu1  ;;  %v6249_v52 = vadd.f32 %v12937_v2, %v12942_v39  ;;  %v7025_v22 = vadd.f32 %v13108_v46, %v13069_v15 }
 0x3e0   : > { %v7475_v29 = vmax.f32 %v7443_v60, 0.0  ;;  %v7446_v54 = vadd.f32 %v13148_v17, %v7407_v37  ;;  %v7406_v43 = vadd.f32 %v7271_v24, %v7018_v62  ;;  %v7513_v1 = vsel %vm7503_vm6, %v7476_v9, 0.0 }
 0x3e1   : > { %v7510_v36 = vadd.f32 %v7509_v47, %v7508_v31  ;;  %v9836_v41 = vpop.f32.mrf.mxu1  ;;  %v7024_v37 = vadd.f32 %v13115_v50, %v6636_v33  ;;  %v6638_v2 = vadd.f32 %v13078_v6, %v6249_v52  ;;  %v6251_v31 = vadd.f32 %v12949_v30, %v12954_v51 }
 0x3e2   : > { %v7511_v19 = vsel %vm7503_vm6, %v7475_v29, 0.0  ;;  %v7445_v59 = vadd.f32 %v13148_v17, %v7406_v43  ;;  %v7409_v42 = vadd.f32 %v9836_v41, %v7021_v20  ;;  %v7478_v55 = vmax.f32 %v7446_v54, 0.0  ;;  %v13228_v41 = vpop.f32.mrf.mxu0 }
 0x3e3   : > { %v7512_v57 = vadd.f32 %v7511_v19, %v7510_v36  ;;  %v7281_v14 = vpop.f32.mrf.mxu1  ;;  %v7027_v24 = vadd.f32 %v13122_v45, %v13076_v58  ;;  %v6640_v36 = vadd.f32 %v13085_v26, %v6251_v31  ;;  %v7026_v30 = vadd.f32 %v13131_v44, %v6638_v2 }
 0x3e4   : > { %v7477_v40 = vmax.f32 %v7445_v59, 0.0  ;;  %v7448_v56 = vadd.f32 %v13148_v17, %v7409_v42  ;;  %v7408_v11 = vadd.f32 %v7281_v14, %v7020_v4  ;;  %v7517_v5 = vsel %vm7503_vm6, %v7478_v55, 0.0  ;;  %v13776_v59 = vld [vmem:[#allocation17_spill] sm:$0xff] }
 0x3e5   : > { %v7514_v35 = vadd.f32 %v7513_v1, %v7512_v57  ;;  %v9839_v25 = vpop.f32.mrf.mxu1  ;;  %v6253_v42 = vadd.f32 %v13776_v59, %v12962_v23  ;;  %v13786_v59 = vld [vmem:[#allocation21_spill] sm:$0xff] }
 0x3e6   : > { %v7515_v3 = vsel %vm7503_vm6, %v7477_v40, 0.0  ;;  %v7447_v34 = vadd.f32 %v13148_v17, %v7408_v11  ;;  %v7411_v0 = vadd.f32 %v9839_v25, %v7023_v16  ;;  %v7480_v62 = vmax.f32 %v7448_v56, 0.0  ;;  %v9808_v11 = vpop.f32.mrf.mxu0  ;;  %v13778_v25 = vld [vmem:[#allocation49_spill] sm:$0xff] }
 0x3e7   : > { %v7516_v53 = vadd.f32 %v7515_v3, %v7514_v35  ;;  %v7291_v28 = vpop.f32.mrf.mxu1  ;;  %v7029_v16 = vadd.f32 %v13143_v61, %v13777_v48  ;;  %v7028_v56 = vadd.f32 %v13158_v38, %v6640_v36 }
 0x3e8   : > { %v7479_v27 = vmax.f32 %v7447_v34, 0.0  ;;  %v7450_v60 = vadd.f32 %v13148_v17, %v7411_v0  ;;  %v7410_v13 = vadd.f32 %v7291_v28, %v7022_v12  ;;  %v7521_v54 = vsel %vm7503_vm6, %v7480_v62, 0.0  ;;  %v13779_v34 = vld [vmem:[#allocation18_spill] sm:$0xff]  ;;  %v13780_v0 = vld [vmem:[#allocation16_spill] sm:$0xff] }
 0x3e9   : > { %v7518_v20 = vadd.f32 %v7517_v5, %v7516_v53  ;;  %v9842_v47 = vpop.f32.mrf.mxu1  ;;  %v6642_v12 = vadd.f32 %v13778_v25, %v6253_v42  ;;  %v6255_v52 = vadd.f32 %v13780_v0, %v13779_v34 }
 0x3ea   : > { %v7519_v39 = vsel %vm7503_vm6, %v7479_v27, 0.0  ;;  %v7449_v15 = vadd.f32 %v13148_v17, %v7410_v13  ;;  %v7413_v46 = vadd.f32 %v9842_v47, %v7025_v22  ;;  %v7482_v29 = vmax.f32 %v7450_v60, 0.0  ;;  %v13781_v22 = vld [vmem:[#allocation89_spill] sm:$0xff]  ;;  %v6973_v47 = vpop.f32.mrf.mxu0 }
 0x3eb   : > { %v7520_v9 = vadd.f32 %v7519_v39, %v7518_v20  ;;  %v7301_v50 = vpop.f32.mrf.mxu1  ;;  %v7031_v5 = vadd.f32 %v13169_v21, %v13781_v22 }
 0x3ec   : > { %v7481_v43 = vmax.f32 %v7449_v15, 0.0  ;;  %v7452_v4 = vadd.f32 %v13148_v17, %v7413_v46  ;;  %v7412_v6 = vadd.f32 %v7301_v50, %v7024_v37  ;;  %v7525_v57 = vsel %vm7503_vm6, %v7482_v29, 0.0  ;;  %v13782_v37 = vld [vmem:[#allocation90_spill] sm:$0xff]  ;;  %v13785_v50 = vld [vmem:[#allocation52_spill] sm:$0xff] }
 0x3ed   : > { %v7522_v49 = vadd.f32 %v7521_v54, %v7520_v9  ;;  %v9845_v19 = vpop.f32.mrf.mxu1  ;;  %v6644_v20 = vadd.f32 %v13782_v37, %v6255_v52  ;;  %v7030_v15 = vadd.f32 %v13180_v7, %v6642_v12  ;;  %v13784_v9 = vld [vmem:[#allocation43_spill] sm:$0xff]  ;;  %v7033_v54 = vadd.f32 %v13192_v10, %v13785_v50 }
 0x3ee   : > { %v7523_v51 = vsel %vm7503_vm6, %v7481_v43, 0.0  ;;  %v7451_v58 = vadd.f32 %v13148_v17, %v7412_v6  ;;  %v7415_v45 = vadd.f32 %v9845_v19, %v7027_v24  ;;  %v7484_v14 = vmax.f32 %v7452_v4, 0.0  ;;  %v13783_v24 = vld [vmem:[#allocation42_spill] sm:$0xff]  ;;  %v13790_v12 = vld [vmem:[#allocation51_spill] sm:$0xff] }
 0x3ef   : > { %v7524_v26 = vadd.f32 %v7523_v51, %v7522_v49  ;;  %v7311_v55 = vpop.f32.mrf.mxu1  ;;  %v6257_v29 = vadd.f32 %v13784_v9, %v13783_v24  ;;  %v9811_v51 = vpop.f32.mrf.mxu0  ;;  %v13795_v50 = vld [vmem:[#allocation87_spill] sm:$0xff] }
 0x3f0   : > { %v7483_v1 = vmax.f32 %v7451_v58, 0.0  ;;  %v7454_v40 = vadd.f32 %v13148_v17, %v7415_v45  ;;  %v7414_v44 = vadd.f32 %v7311_v55, %v7026_v30  ;;  %v7529_v38 = vsel %vm7503_vm6, %v7484_v14, 0.0  ;;  %v13789_v14 = vld [vmem:[#allocation104_spill] sm:$0xff] }
 0x3f1   : > { %v7526_v33 = vadd.f32 %v7525_v57, %v7524_v26  ;;  %v9848_v35 = vpop.f32.mrf.mxu1  ;;  %v7032_v30 = vadd.f32 %v13204_v32, %v6644_v20  ;;  %v6646_v42 = vadd.f32 %v13786_v59, %v6257_v29  ;;  %v13787_v57 = vld [vmem:[#allocation45_spill] sm:$0xff]  ;;  %v13788_v26 = vld [vmem:[#allocation86_spill] sm:$0xff]  ;;  %v13794_v29 = vld [vmem:[#allocation19_spill] sm:$0xff] }
 0x3f2   : > { %v7527_v23 = vsel %vm7503_vm6, %v7483_v1, 0.0  ;;  %v7453_v61 = vadd.f32 %v13148_v17, %v7414_v44  ;;  %v7417_v3 = vadd.f32 %v9848_v35, %v7029_v16  ;;  %v7486_v28 = vmax.f32 %v7454_v40, 0.0 }
 0x3f3   : > { %v7528_v53 = vadd.f32 %v7527_v23, %v7526_v33  ;;  %v7321_v62 = vpop.f32.mrf.mxu1  ;;  %v6259_v55 = vadd.f32 %v13788_v26, %v13787_v57  ;;  %v7035_v1 = vadd.f32 %v13216_v18, %v13789_v14  ;;  %v7034_v0 = vadd.f32 %v13228_v41, %v6646_v42  ;;  %v13798_v57 = vld [vmem:[#allocation20_spill] sm:$0xff] }
 0x3f4   : > { %v7485_v27 = vmax.f32 %v7453_v61, 0.0  ;;  %v7456_v60 = vadd.f32 %v13148_v17, %v7417_v3  ;;  %v7416_v13 = vadd.f32 %v7321_v62, %v7028_v56  ;;  %v7533_v43 = vsel %vm7503_vm6, %v7486_v28, 0.0  ;;  %v6983_v61 = vpop.f32.mrf.mxu0  ;;  %v13793_v62 = vld [vmem:[#allocation22_spill] sm:$0xff] }
 0x3f5   : > { %v7530_v2 = vadd.f32 %v7529_v38, %v7528_v53  ;;  %v9851_v39 = vpop.f32.mrf.mxu1  ;;  %v6648_v23 = vadd.f32 %v13790_v12, %v6259_v55  ;;  %v13792_v53 = vld [vmem:[#allocation48_spill] sm:$0xff]  ;;  %v7037_v38 = vadd.f32 %v9808_v11, %v13793_v62 }
 0x3f6   : > { %v7531_v46 = vsel %vm7503_vm6, %v7485_v27, 0.0  ;;  %v7455_v21 = vadd.f32 %v13148_v17, %v7416_v13  ;;  %v7419_v31 = vadd.f32 %v9851_v39, %v7031_v5  ;;  %v7488_v36 = vmax.f32 %v7456_v60, 0.0  ;;  %v13791_v5 = vld [vmem:[#allocation99_spill] sm:$0xff]  ;;  %v13799_v55 = vld [vmem:[#allocation92_spill] sm:$0xff] }
 0x3f7   : > { %v7532_v4 = vadd.f32 %v7531_v46, %v7530_v2  ;;  %v7331_v6 = vpop.f32.mrf.mxu1  ;;  %v6261_v28 = vadd.f32 %v13792_v53, %v13791_v5  ;;  %v7036_v41 = vadd.f32 %v6973_v47, %v6648_v23 }
 0x3f8   : > { %v7487_v49 = vmax.f32 %v7455_v21, 0.0  ;;  %v7458_v19 = vadd.f32 %v13148_v17, %v7419_v31  ;;  %v7418_v7 = vadd.f32 %v7331_v6, %v7030_v15  ;;  %v7537_v32 = vsel %vm7503_vm6, %v7488_v36, 0.0  ;;  %v9814_v15 = vpop.f32.mrf.mxu0 }
 0x3f9   : > { %v7534_v58 = vadd.f32 %v7533_v43, %v7532_v4  ;;  %v9854_v45 = vpop.f32.mrf.mxu1  ;;  %v6650_v31 = vadd.f32 %v13120_v63, %v6261_v28  ;;  %v13796_v43 = vld [vmem:[#allocation50_spill] sm:$0xff]  ;;  %v7041_v14 = vadd.f32 %v9814_v15, %v13799_v55 }
 0x3fa   : > { %v7535_v48 = vsel %vm7503_vm6, %v7487_v49, 0.0  ;;  %v7457_v10 = vadd.f32 %v13148_v17, %v7418_v7  ;;  %v7421_v16 = vadd.f32 %v9854_v45, %v7033_v54  ;;  %v7490_v44 = vmax.f32 %v7458_v19, 0.0 }
 0x3fb   : > { %v7536_v40 = vadd.f32 %v7535_v48, %v7534_v58  ;;  %v7341_v56 = vpop.f32.mrf.mxu1  ;;  %v6263_v54 = vadd.f32 %v13795_v50, %v13794_v29  ;;  %v7039_v4 = vadd.f32 %v9811_v51, %v13796_v43  ;;  %v6993_v58 = vpop.f32.mrf.mxu0  ;;  %v7038_v42 = vadd.f32 %v6983_v61, %v6650_v31  ;;  %v13800_v61 = vld [vmem:[#allocation56_spill] sm:$0xff] }
 0x3fc   : > { %v7489_v33 = vmax.f32 %v7457_v10, 0.0  ;;  %v7460_v35 = vadd.f32 %v13148_v17, %v7421_v16  ;;  %v7420_v25 = vadd.f32 %v7341_v56, %v7032_v30  ;;  %v7541_v27 = vsel %vm7503_vm6, %v7490_v44, 0.0  ;;  %v13797_v16 = vld [vmem:[#allocation47_spill] sm:$0xff] }
 0x3fd   : > { %v7538_v3 = vadd.f32 %v7537_v32, %v7536_v40  ;;  %v9857_v34 = vpop.f32.mrf.mxu1  ;;  %v6652_v63 = vadd.f32 %v13127_v8, %v6263_v54  ;;  %v6265_v26 = vadd.f32 %v13798_v57, %v13797_v16 }
 0x3fe   : > { %v7539_v52 = vsel %vm7503_vm6, %v7489_v33, 0.0  ;;  %v7459_v18 = vadd.f32 %v13148_v17, %v7420_v25  ;;  %v7423_v22 = vadd.f32 %v9857_v34, %v7035_v1  ;;  %v7492_v37 = vmax.f32 %v7460_v35, 0.0  ;;  %v9817_v1 = vpop.f32.mrf.mxu0 }
 0x3ff   : > { %v7540_v60 = vadd.f32 %v7539_v52, %v7538_v3  ;;  %v7351_v13 = vpop.f32.mrf.mxu1  ;;  %v7040_v25 = vadd.f32 %v6993_v58, %v6652_v63  ;;  %v6654_v3 = vadd.f32 %v13800_v61, %v6265_v26 }
 0x400   : > { %v7491_v20 = vmax.f32 %v7459_v18, 0.0  ;;  %v7462_v2 = vadd.f32 %v13148_v17, %v7423_v22  ;;  %v7422_v39 = vadd.f32 %v7351_v13, %v7034_v0  ;;  %v7545_v47 = vsel %vm7503_vm6, %v7492_v37, 0.0  ;;  %v13801_v18 = vld [vmem:[#allocation53_spill] sm:$0xff]  ;;  %v7003_v5 = vpop.f32.mrf.mxu0 }
 0x401   : > { %v7542_v46 = vadd.f32 %v7541_v27, %v7540_v60  ;;  %v9860_v21 = vpop.f32.mrf.mxu1  ;;  %v7043_v22 = vadd.f32 %v9817_v1, %v13801_v18 }
 0x402   : > { %v7543_v24 = vsel %vm7503_vm6, %v7491_v20, 0.0  ;;  %v7461_v9 = vadd.f32 %v13148_v17, %v7422_v39  ;;  %v7425_v11 = vadd.f32 %v9860_v21, %v7037_v38  ;;  %v7494_v36 = vmax.f32 %v7462_v2, 0.0 }
 0x403   : > { %v7544_v6 = vadd.f32 %v7543_v24, %v7542_v46  ;;  %v7361_v49 = vpop.f32.mrf.mxu1  ;;  %v7042_v2 = vadd.f32 %v7003_v5, %v6654_v3 }
 0x404   : > { %v7493_v19 = vmax.f32 %v7461_v9, 0.0  ;;  %v7464_v7 = vadd.f32 %v13148_v17, %v7425_v11  ;;  %v7424_v30 = vadd.f32 %v7361_v49, %v7036_v41  ;;  %v7549_v40 = vsel %vm7503_vm6, %v7494_v36, 0.0 }
 0x405   : > { %v7546_v45 = vadd.f32 %v7545_v47, %v7544_v6  ;;  %v9863_v59 = vpop.f32.mrf.mxu1 }
 0x406   : > { %v7547_v48 = vsel %vm7503_vm6, %v7493_v19, 0.0  ;;  %v7463_v10 = vadd.f32 %v13148_v17, %v7424_v30  ;;  %v7427_v51 = vadd.f32 %v9863_v59, %v7039_v4  ;;  %v7496_v8 = vmax.f32 %v7464_v7, 0.0 }
 0x407   : > { %v7548_v44 = vadd.f32 %v7547_v48, %v7546_v45  ;;  %v7371_v56 = vpop.f32.mrf.mxu1 }
 0x408   : > { %v7495_v32 = vmax.f32 %v7463_v10, 0.0  ;;  %v7466_v33 = vadd.f32 %v13148_v17, %v7427_v51  ;;  %v7426_v35 = vadd.f32 %v7371_v56, %v7038_v42  ;;  %v7553_v38 = vsel %vm7503_vm6, %v7496_v8, 0.0  ;;  %v7578_v51 = vld [vmem:[%s13359_s6] sm:$0x1] }
 0x409   : > { %v7550_v12 = vadd.f32 %v7549_v40, %v7548_v44  ;;  %v9866_v23 = vpop.f32.mrf.mxu1 }
 0x40a   : > { %v7551_v34 = vsel %vm7503_vm6, %v7495_v32, 0.0  ;;  %v7465_v0 = vadd.f32 %v13148_v17, %v7426_v35  ;;  %v7429_v52 = vadd.f32 %v9866_v23, %v7041_v14  ;;  %v7498_v28 = vmax.f32 %v7466_v33, 0.0 }
 0x40b   : > { %v7552_v53 = vadd.f32 %v7551_v34, %v7550_v12  ;;  %v7381_v62 = vpop.f32.mrf.mxu1 }
 0x40c   : > { %v7497_v27 = vmax.f32 %v7465_v0, 0.0  ;;  %v7468_v60 = vadd.f32 %v13148_v17, %v7429_v52  ;;  %v7428_v13 = vadd.f32 %v7381_v62, %v7040_v25  ;;  %v7557_v46 = vsel %vm7503_vm6, %v7498_v28, 0.0 }
 0x40d   : > { %v7554_v37 = vadd.f32 %v7553_v38, %v7552_v53  ;;  %v9869_v20 = vpop.f32.mrf.mxu1 }
 0x40e   : > { %v7555_v39 = vsel %vm7503_vm6, %v7497_v27, 0.0  ;;  %v7467_v41 = vadd.f32 %v13148_v17, %v7428_v13  ;;  %v7431_v15 = vadd.f32 %v9869_v20, %v7043_v22  ;;  %v7500_v24 = vmax.f32 %v7468_v60, 0.0 }
 0x40f   : > { %v7556_v21 = vadd.f32 %v7555_v39, %v7554_v37  ;;  %v7391_v31 = vpop.f32.mrf.mxu1 }
 0x410   : > { %v7499_v9 = vmax.f32 %v7467_v41, 0.0  ;;  %v7470_v11 = vadd.f32 %v13148_v17, %v7431_v15  ;;  %v7430_v29 = vadd.f32 %v7391_v31, %v7042_v2  ;;  %v7561_v6 = vsel %vm7503_vm6, %v7500_v24, 0.0 }
 0x411   : > { %v7558_v50 = vadd.f32 %v7557_v46, %v7556_v21 }
 0x412   : > { %v7559_v54 = vsel %vm7503_vm6, %v7499_v9, 0.0  ;;  %v7469_v43 = vadd.f32 %v13148_v17, %v7430_v29  ;;  %v7502_v36 = vmax.f32 %v7470_v11, 0.0 }
 0x413   : > { %v7560_v4 = vadd.f32 %v7559_v54, %v7558_v50 }
 0x414   : > { %v7501_v49 = vmax.f32 %v7469_v43, 0.0  ;;  %v7565_v30 = vsel %vm7503_vm6, %v7502_v36, 0.0 }
 0x415   : > { %v7562_v47 = vadd.f32 %v7561_v6, %v7560_v4 }
 0x416   : > { %v7563_v19 = vsel %vm7503_vm6, %v7501_v49, 0.0 }
 0x417   : > { %v7564_v7 = vadd.f32 %v7563_v19, %v7562_v47 }
 0x419   : > { %v7566_v63 = vadd.f32 %v7565_v30, %v7564_v7 }
 0x41b   : > { %v7567_v58 = vrot.slane %v7566_v63, 4 }
 0x41d   : > { %v7568_v45 = vadd.f32 %v7567_v58, %v7566_v63 }
 0x41f   : > { %v7569_v59 = vrot.slane %v7568_v45, 2 }
 0x421   : > { %v7570_v42 = vadd.f32 %v7569_v59, %v7568_v45 }
 0x423   : > { %v7571_v48 = vrot.slane %v7570_v42, 1 }
 0x425   : > { %v7572_v17 = vadd.f32 %v7571_v48, %v7570_v42 }
 0x427   : > { %v7573_v10 = vmul.f32 0.00390625, %v7572_v17 }
 0x429   : > { %9879 = vmatmul.mubr.msk.f32.vlgmr.msra.gmra.mxu0 %vm7503_vm6, %v7573_v10 }
 0x4e9   : > { %v7648_v16 = vpop.f32.mrf.mxu0 }
 0x4ea   : > { %v7649_v57 = vadd.f32 %v7648_v16, %v7578_v51 }
 0x4eb   : > { %v9880_v26 = vpop.f32.mrf.mxu0 }
 0x4ec   : > { %7653 = vst.msk [vmem:[%s270_s18] sm:$0x1] %vm7652_vm7, %v7649_v57 }
 0x4ed   : > { %9935 = shalt.err (!%p9932_p3)
}
 0x4ee   : > { %s9936_s13 = scalar_lea.hbm %s13318_s22, 16  ;;  %s9940_s16 = scalar_lea.hbm %s13360_s7, 32 }
 0x4ef   : > { %p9937_p4 = scmp.ne.s32.totalorder %s13318_s22, %s9936_s13  ;;  %p9941_p9 = scmp.lt.s32.totalorder %s13318_s22, %s13360_s7 }
 0x4f0   : > { %p9942_p10 = scmp.lt.s32.totalorder %s9940_s16, %s9936_s13 }
 0x4f1   : > { %p9938_p7 = pnand %p9937_p4, %p10065_p5 }
 0x4f2   : > { %p9943_p11 = por %p9942_p10, %p9941_p9 }
 0x4f3   : > { %p9939_p8 = pneg %p9938_p7 }
 0x4f5   : > { %p9944_p12 = pnand %p9943_p11, %p9939_p8 }
 0x4f7   : > { %9947 = shalt.err (!%p9944_p12)
}
 0x4f8   : > { %9881 = dma.vmem_to_hbm [thread:$0]  (%p10065_p5), %s7668_s19, 16, %s13318_s22, %s7655_s23  }
 0x4f9 PF: > { %p9887_p13 = scmp.ge.s32.totalorder %s9982_s27, 2  ;;  %s7679_s20 = sand.u32 1, %s9970_s24  }
 0x4fa   : > { %s7680_s21 = scalar_lea.sflag [#allocation5], %s7679_s20 }
 0x4fb   : > { %p9884_p0 = pnand %p9887_p13, %p10069_p6 }
 0x4fd   : > { %p9885_p1 = pneg %p9884_p0 }
 0x4ff   : > { %9965 = dma.done.wait (%p9885_p1), %s7680_s21, 16  }
 0x500   : > { %9967 = vsyncadd (%p9885_p1), %s7680_s21, 4294967280  ;;  %p17_p2 = scmp.ge.s32.totalorder %s10052_s30, 4   ;;  %s13802_s24 = smov %s9974_s25 }
 0x501   : > { %s13803_s25 = smov %s9978_s26  ;;  %s13804_s26 = smov %s10063_s10 }
 0x502   : > { %s13805_s27 = smov %s10052_s30  ;;  %19 = sbr.rel (!%p17_p2) target bundleno = 3 (0x3), region = 103 }
 0x507   :  { %7684 = vsyncpa [#allocation5], 1 }
 0x508   :  { %7686 = vsyncpa [#allocation5 + $0x1], 1 }

</bundles_post_ra>
